<compile_context>
chip_gen: v7x
topology: tpu7x:2x2x1
jax: 0.10.0
libtpu: 0.0.40
codegen_flags: <defaults>
</compile_context>

<pallas_src>
import functools

import jax
import jax.numpy as jnp
from jax.experimental import pallas as pl
from jax.experimental.pallas import tpu as pltpu


def _layernorm(v, gamma, beta, eps=1e-5):
    mu = jnp.mean(v, axis=-1, keepdims=True)
    var = jnp.mean((v - mu) ** 2, axis=-1, keepdims=True)
    return (v - mu) * jax.lax.rsqrt(var + eps) * gamma + beta


def _swap01(x):
    """(A, B, D) -> (B, A, D), keeping the minor (lane) dim in place."""
    if hasattr(pltpu, "einshape"):
        return pltpu.einshape("abd->bad", x)
    return jnp.transpose(x, (1, 0, 2))


def block_kernel(x_ref, wqkv_ref, g1_ref, b1_ref, g2_ref, b2_ref,
                 w1_ref, bias1_ref, w2_ref, bias2_ref, o_ref, *,
                 num_heads, head_dim, head_dim_padded, matmul_dtype,
                 approx_recip, ff_chunk):
    H, Dh, Dp, md = num_heads, head_dim, head_dim_padded, matmul_dtype
    Bb, T, C = x_ref.shape
    rows = Bb * T
    HDp = H * Dp

    x = x_ref[...].astype(jnp.float32)               # (Bb, T, C), f32 math inside
    xf = x.reshape(rows, C)                          # dense (rows, C) slab

    # ---- LayerNorm 1 (f32 statistics) ----
    ln1 = _layernorm(xf, g1_ref[...], b1_ref[...])   # (rows, C)

    # ---- fused QKV projection: ONE dense matmul, then 128-aligned lane slices ----
    # Scale 1/sqrt(Dh) already folded into the Wq columns (wrapper side).
    qkv = jnp.dot(ln1.astype(md), wqkv_ref[...],
                  preferred_element_type=jnp.float32)     # (rows, 2*HDp + C)
    q2 = qkv[:, :HDp]                                     # (rows, H*Dp)  padded
    k2 = qkv[:, HDp:2 * HDp]                              # (rows, H*Dp)  padded
    v2 = qkv[:, 2 * HDp:]                                 # (rows, C)     unpadded

    # ---- head relayout using only proven 3-D swaps (batch index = h*Bb + b) ----
    def to_heads(m2d, d):
        m3 = m2d.reshape(rows, H, d)                      # split lanes per head
        return _swap01(m3).reshape(H * Bb, T, d)          # (H*Bb, T, d)

    def from_heads(a3, d):
        a = a3.reshape(H, rows, d)
        return _swap01(a).reshape(rows, H * d)            # (rows, H*d)

    qh = to_heads(q2, Dp)
    kh = to_heads(k2, Dp)
    vh = to_heads(v2, Dh)

    # ---- causal mask: boolean compare + where on the scores (no -inf temp add) ----
    row_i = jax.lax.broadcasted_iota(jnp.int32, (T, T), 0)    # query index
    col_j = jax.lax.broadcasted_iota(jnp.int32, (T, T), 1)    # key index
    causal = col_j <= row_i

    # ---- batched multi-head attention: single einsum over the (H*Bb) batch ----
    s = jnp.einsum("bqd,bkd->bqk", qh.astype(md), kh.astype(md),
                   preferred_element_type=jnp.float32)          # (H*Bb, T, T)
    s = jnp.where(causal[None], s, -jnp.inf)

    # Reference quirk: F.softmax(weights, dim=1) -> softmax over the QUERY axis.
    # Safe with -inf: every key column has at least one unmasked query (i >= j).
    m_ = jnp.max(s, axis=1, keepdims=True)
    e = jnp.exp(s - m_)
    denom = jnp.sum(e, axis=1, keepdims=True)
    p = e * pl.reciprocal(denom, approx=approx_recip)            # EUP reciprocal

    a = jnp.einsum("bqk,bkd->bqd", p.astype(md), vh.astype(md),
                   preferred_element_type=jnp.float32)           # (H*Bb, T, Dh)
    attn = from_heads(a, Dh)                                     # (rows, C)

    # ---- residual 1 ----
    x2 = xf + attn

    # ---- LayerNorm 2 + FeedForward (Linear -> ReLU -> Linear), hidden-dim chunked ----
    ln2 = _layernorm(x2, g2_ref[...], b2_ref[...])
    ln2m = ln2.astype(md)

    H4 = w1_ref.shape[1]
    n_chunks = H4 // ff_chunk
    ff = None
    for ci in range(n_chunks):                       # small static chunk count
        lo, hi = ci * ff_chunk, (ci + 1) * ff_chunk
        h1 = jnp.dot(ln2m, w1_ref[:, lo:hi], preferred_element_type=jnp.float32)
        h1 = jnp.maximum(h1 + bias1_ref[:, lo:hi], 0.0)
        part = jnp.dot(h1.astype(md), w2_ref[lo:hi, :],
                       preferred_element_type=jnp.float32)
        ff = part if ff is None else ff + part
    ff = ff + bias2_ref[...]

    # ---- residual 2 ----
    o_ref[...] = (x2 + ff).reshape(Bb, T, C).astype(o_ref.dtype)


def transformer_block(x, params, *, num_heads, batch_tile=None,
                      matmul_dtype=jnp.bfloat16, out_dtype=None,
                      single_buffer_weights=True):
    B, T, C = x.shape
    H = num_heads
    assert C % H == 0, "channels_embedding must be divisible by number_of_heads"
    Dh = C // H
    # Pad the per-head QK^T contraction dim to a multiple of 128 (MXU width); zero
    # columns contribute exactly 0 to the scores, so numerics are unchanged.
    Dp = Dh if Dh % 128 == 0 else ((Dh + 127) // 128) * 128
    HDp = H * Dp
    H4 = 4 * C
    qkv_cols = 2 * HDp + C
    if out_dtype is None:
        out_dtype = x.dtype

    f32 = jnp.float32
    scale = Dh ** (-0.5)

    # NOTE: folding 1/sqrt(Dh) into Wq before the bf16 cast rounds the scaled weights
    # once in bf16 (tiny deviation vs scaling f32 scores); exact on the f32 path.
    def head_cols(w, do_scale):
        w = w.astype(f32)
        if do_scale:
            w = w * scale
        w = w.reshape(C, H, Dh)
        if Dp != Dh:
            w = jnp.pad(w, ((0, 0), (0, 0), (0, Dp - Dh)))
        return w.reshape(C, HDp)

    wqkv = jnp.concatenate(
        [head_cols(params["wq"], True),       # Wq * scale, per-head padded
         head_cols(params["wk"], False),      # Wk, per-head padded
         params["wv"].astype(f32)],           # Wv, unpadded
        axis=1).astype(matmul_dtype)
    w1 = params["w1"].astype(matmul_dtype)
    w2 = params["w2"].astype(matmul_dtype)
    g1 = params["g1"].astype(f32)
    b1 = params["b1"].astype(f32)
    g2 = params["g2"].astype(f32)
    b2 = params["b2"].astype(f32)
    bias1 = params["bias1"].astype(f32)
    bias2 = params["bias2"].astype(f32)

    # FF hidden chunk: bounds the (rows, chunk) f32 intermediate (v7x: 64 MiB VMEM).
    ff_chunk = H4
    if H4 > 2048:
        for cand in (2048, 1024, 512, 256, 128):
            if H4 % cand == 0:
                ff_chunk = cand
                break

    # ---- generation-aware VMEM budget (per TensorCore) ----
    try:
        vmem_cap = int(getattr(pltpu.get_tpu_info(), "vmem_capacity_bytes",
                               64 * 2**20))
    except Exception:
        vmem_cap = 64 * 2**20                    # conservative (v7x-sized) fallback
    # ~48 MiB on 64 MiB parts (v7x), up to ~96-100 MiB on 128 MiB parts (v5e/v6e).
    vmem_budget = min(int(0.75 * vmem_cap), 100 * 2**20)

    w_bytes = jnp.dtype(matmul_dtype).itemsize
    x_bytes = jnp.dtype(x.dtype).itemsize
    o_bytes = jnp.dtype(out_dtype).itemsize
    weight_bytes = w_bytes * (C * qkv_cols + C * H4 + H4 * C)
    small_bytes = 4 * (5 * C + H4) * 2
    # Conservative: assume double-buffered weights even when Buffered(1) is accepted.
    resident_bytes = 2 * weight_bytes + small_bytes
    per_elem = (4 * T * (8 * C + qkv_cols + 2 * HDp + ff_chunk)   # f32 row slabs
                + 12 * H * T * T                                   # s / e / p
                + 4 * T * C * (x_bytes + o_bytes))                 # dbl-buffered I/O

    if batch_tile is None:
        avail = vmem_budget - resident_bytes - (2 << 20)
        batch_tile = int(max(1, min(B, avail // max(per_elem, 1))))
        while B % batch_tile:
            batch_tile -= 1
        # Only force >=2 grid steps (useful on 2-TensorCore v7x) when each step still
        # presents a dense (>=512-row) slab; on 1-TC parts extra steps are overhead.
        if B // batch_tile == 1 and B >= 2:
            for cand in range(B // 2, 0, -1):
                if B % cand == 0:
                    if cand * T >= 512:
                        batch_tile = cand
                    break
    assert B % batch_tile == 0
    grid_b = B // batch_tile

    est_usage = resident_bytes + batch_tile * per_elem + (2 << 20)
    vmem_limit = int(min(max(vmem_budget, est_usage), vmem_cap))

    flops = int(2 * B * T * C * qkv_cols
                + 2 * B * H * T * T * (Dp + Dh)
                + 4 * B * T * C * H4)
    cost = pl.CostEstimate(
        flops=flops,
        transcendentals=int(B * H * T * T),
        bytes_accessed=int(B * T * C * (x_bytes + o_bytes)
                           + weight_bytes + 4 * (5 * C + H4)))

    kernel = functools.partial(
        block_kernel,
        num_heads=H, head_dim=Dh, head_dim_padded=Dp,
        matmul_dtype=matmul_dtype,
        approx_recip=bool(jnp.dtype(matmul_dtype) != jnp.dtype(jnp.float32)),
        ff_chunk=ff_chunk)

    def make_call(weight_kwargs):
        def res(shape):
            # Resident (never re-fetched) operand; optionally single-buffered.
            return pl.BlockSpec(shape, lambda b: (0,) * len(shape), **weight_kwargs)

        return pl.pallas_call(
            kernel,
            out_shape=jax.ShapeDtypeStruct((B, T, C), out_dtype),
            grid_spec=pltpu.PrefetchScalarGridSpec(
                num_scalar_prefetch=0,
                grid=(grid_b,),
                in_specs=[
                    pl.BlockSpec((batch_tile, T, C), lambda b: (b, 0, 0)),  # x
                    res((C, qkv_cols)),            # fused [Wq*scale | Wk | Wv]
                    res((1, C)), res((1, C)),      # ln1 gamma / beta
                    res((1, C)), res((1, C)),      # ln2 gamma / beta
                    res((C, H4)), res((1, H4)),    # FF W1, b1
                    res((H4, C)), res((1, C)),     # FF W2, b2
                ],
                out_specs=pl.BlockSpec((batch_tile, T, C), lambda b: (b, 0, 0))),
            compiler_params=pltpu.CompilerParams(
                dimension_semantics=("parallel",),
                vmem_limit_bytes=vmem_limit),
            cost_estimate=cost)

    args = (x, wqkv, g1, b1, g2, b2, w1, bias1, w2, bias2)
    if single_buffer_weights and hasattr(pl, "Buffered"):
        try:
            return make_call(dict(pipeline_mode=pl.Buffered(1)))(*args)
        except Exception:
            pass  # runtime rejected single-buffering; use default pipelining
    return make_call({})(*args)


def reference_block(x, params, *, num_heads):
    """Pure-JAX f32 reference mirroring the PyTorch module (for validation)."""
    B, T, C = x.shape
    dh = C // num_heads
    ln1 = _layernorm(x, params["g1"][0], params["b1"][0])
    q = ln1 @ params["wq"]
    k = ln1 @ params["wk"]
    v = ln1 @ params["wv"]
    row = jnp.arange(T)[:, None]
    col = jnp.arange(T)[None, :]
    causal = col <= row
    outs = []
    for h in range(num_heads):
        s = slice(h * dh, (h + 1) * dh)
        w = jnp.einsum("btd,bsd->bts", q[..., s], k[..., s]) * dh ** (-0.5)
        w = jnp.where(causal[None], w, -jnp.inf)
        p = jax.nn.softmax(w, axis=1)        # dim=1 quirk reproduced
        outs.append(jnp.einsum("bts,bsd->btd", p, v[..., s]))
    x2 = x + jnp.concatenate(outs, axis=-1)
    ln2 = _layernorm(x2, params["g2"][0], params["b2"][0])
    h1 = jnp.maximum(ln2 @ params["w1"] + params["bias1"][0], 0.0)
    return x2 + (h1 @ params["w2"] + params["bias2"][0])


if __name__ == "__main__":
    # Small shapes consistent with the module; C=128 keeps the output lane-dense.
    B = 2
    block_size = 8          # sequence length T
    C = 128                 # channels_embedding
    num_heads = 4           # -> channels_head = 32 (padded to 128 for QK^T)
    H4 = 4 * C

    key = jax.random.PRNGKey(0)
    ks = jax.random.split(key, 8)

    params = {
        # per-head projection weights concatenated along output dim, stored (in, out)
        "wq": 0.1 * jax.random.normal(ks[0], (C, C), jnp.float32),
        "wk": 0.1 * jax.random.normal(ks[1], (C, C), jnp.float32),
        "wv": 0.1 * jax.random.normal(ks[2], (C, C), jnp.float32),
        "g1": jnp.ones((1, C), jnp.float32),
        "b1": jnp.zeros((1, C), jnp.float32),
        "g2": jnp.ones((1, C), jnp.float32),
        "b2": jnp.zeros((1, C), jnp.float32),
        "w1": 0.1 * jax.random.normal(ks[3], (C, H4), jnp.float32),
        "bias1": 0.01 * jax.random.normal(ks[4], (1, H4), jnp.float32),
        "w2": 0.1 * jax.random.normal(ks[5], (H4, C), jnp.float32),
        "bias2": 0.01 * jax.random.normal(ks[6], (1, C), jnp.float32),
    }

    x = jax.random.normal(ks[7], (B, block_size, C), jnp.float32)

    ref = reference_block(x, params, num_heads=num_heads)

    # 1) Exact-semantics check: f32 matmul path must match the f32 reference tightly.
    out_f32 = transformer_block(x, params, num_heads=num_heads,
                                matmul_dtype=jnp.float32)
    out_f32 = jax.block_until_ready(out_f32)
    assert out_f32.shape == (B, block_size, C)
    assert out_f32.dtype == jnp.float32
    assert jnp.allclose(out_f32, ref, atol=1e-3, rtol=1e-3), "f32 kernel mismatch"

    # 2) Performance path: bf16 activations at the HBM boundary + bf16 MXU matmuls
    #    with f32 accumulation (loose tolerance reflects bf16 rounding only).
    x_bf16 = x.astype(jnp.bfloat16)
    ref_bf = reference_block(x_bf16.astype(jnp.float32), params, num_heads=num_heads)
    out_bf16 = transformer_block(x_bf16, params, num_heads=num_heads,
                                 matmul_dtype=jnp.bfloat16)
    out_bf16 = jax.block_until_ready(out_bf16)
    assert out_bf16.shape == (B, block_size, C)
    assert out_bf16.dtype == jnp.bfloat16
    assert jnp.allclose(out_bf16.astype(jnp.float32), ref_bf,
                        atol=1.5e-1, rtol=1.5e-1), "bf16 kernel mismatch"

    print("KERNEL_OK")
</pallas_src>

<mosaic_0001>
module attributes {stable_mosaic.version = 11 : i64} {
  func.func @block_kernel(%arg0: i32, %arg1: memref<2x8x128xf32, #tpu.memory_space<vmem>>, %arg2: memref<128x1152xf32, #tpu.memory_space<vmem>>, %arg3: memref<1x128xf32, #tpu.memory_space<vmem>>, %arg4: memref<1x128xf32, #tpu.memory_space<vmem>>, %arg5: memref<1x128xf32, #tpu.memory_space<vmem>>, %arg6: memref<1x128xf32, #tpu.memory_space<vmem>>, %arg7: memref<128x512xf32, #tpu.memory_space<vmem>>, %arg8: memref<1x512xf32, #tpu.memory_space<vmem>>, %arg9: memref<512x128xf32, #tpu.memory_space<vmem>>, %arg10: memref<1x128xf32, #tpu.memory_space<vmem>>, %arg11: memref<2x8x128xf32, #tpu.memory_space<vmem>>) attributes {dimension_semantics = [#tpu.dimension_semantics<parallel>], iteration_bounds = array<i64: 1>, scalar_prefetch = 0 : i64, scratch_operands = 0 : i64, tpu.core_type = #tpu.core_type<tc>, window_params = [{transform_indices = @transform_0, window_bounds = array<i64: 2, 8, 128>}, {pipeline_mode = #tpu.pipeline_mode<synchronous>, transform_indices = @transform_1, window_bounds = array<i64: 128, 1152>}, {pipeline_mode = #tpu.pipeline_mode<synchronous>, transform_indices = @transform_2, window_bounds = array<i64: 1, 128>}, {pipeline_mode = #tpu.pipeline_mode<synchronous>, transform_indices = @transform_3, window_bounds = array<i64: 1, 128>}, {pipeline_mode = #tpu.pipeline_mode<synchronous>, transform_indices = @transform_4, window_bounds = array<i64: 1, 128>}, {pipeline_mode = #tpu.pipeline_mode<synchronous>, transform_indices = @transform_5, window_bounds = array<i64: 1, 128>}, {pipeline_mode = #tpu.pipeline_mode<synchronous>, transform_indices = @transform_6, window_bounds = array<i64: 128, 512>}, {pipeline_mode = #tpu.pipeline_mode<synchronous>, transform_indices = @transform_7, window_bounds = array<i64: 1, 512>}, {pipeline_mode = #tpu.pipeline_mode<synchronous>, transform_indices = @transform_8, window_bounds = array<i64: 512, 128>}, {pipeline_mode = #tpu.pipeline_mode<synchronous>, transform_indices = @transform_9, window_bounds = array<i64: 1, 128>}, {transform_indices = @transform_10, window_bounds = array<i64: 2, 8, 128>}]} {
    %c0 = arith.constant 0 : index
    %c0_0 = arith.constant 0 : index
    %c0_1 = arith.constant 0 : index
    %0 = vector.load %arg1[%c0, %c0_0, %c0_1] : memref<2x8x128xf32, #tpu.memory_space<vmem>>, vector<2x8x128xf32>
    %1 = vector.shape_cast %0 : vector<2x8x128xf32> to vector<16x128xf32>
    %c0_2 = arith.constant 0 : index
    %c0_3 = arith.constant 0 : index
    %2 = vector.load %arg3[%c0_2, %c0_3] : memref<1x128xf32, #tpu.memory_space<vmem>>, vector<1x128xf32>
    %c0_4 = arith.constant 0 : index
    %c0_5 = arith.constant 0 : index
    %3 = vector.load %arg4[%c0_4, %c0_5] : memref<1x128xf32, #tpu.memory_space<vmem>>, vector<1x128xf32>
    %cst = arith.constant dense<0.000000e+00> : vector<16xf32>
    %4 = vector.multi_reduction <add>, %1, %cst [1] : vector<16x128xf32> to vector<16xf32>
    %5 = vector.shape_cast %4 : vector<16xf32> to vector<16x1xf32>
    %cst_6 = arith.constant 1.280000e+02 : f32
    %6 = vector.broadcast %cst_6 : f32 to vector<16x1xf32>
    %7 = arith.divf %5, %6 : vector<16x1xf32>
    %8 = vector.broadcast %7 : vector<16x1xf32> to vector<16x128xf32>
    %9 = arith.subf %1, %8 : vector<16x128xf32>
    %10 = arith.mulf %9, %9 : vector<16x128xf32>
    %cst_7 = arith.constant dense<0.000000e+00> : vector<16xf32>
    %11 = vector.multi_reduction <add>, %10, %cst_7 [1] : vector<16x128xf32> to vector<16xf32>
    %12 = vector.shape_cast %11 : vector<16xf32> to vector<16x1xf32>
    %cst_8 = arith.constant 1.280000e+02 : f32
    %13 = vector.broadcast %cst_8 : f32 to vector<16x1xf32>
    %14 = arith.divf %12, %13 : vector<16x1xf32>
    %15 = vector.broadcast %7 : vector<16x1xf32> to vector<16x128xf32>
    %16 = arith.subf %1, %15 : vector<16x128xf32>
    %cst_9 = arith.constant 9.99999974E-6 : f32
    %17 = vector.broadcast %cst_9 : f32 to vector<16x1xf32>
    %18 = arith.addf %14, %17 : vector<16x1xf32>
    %19 = math.rsqrt %18 : vector<16x1xf32>
    %20 = vector.broadcast %19 : vector<16x1xf32> to vector<16x128xf32>
    %21 = arith.mulf %16, %20 : vector<16x128xf32>
    %22 = vector.broadcast %2 : vector<1x128xf32> to vector<16x128xf32>
    %23 = arith.mulf %21, %22 : vector<16x128xf32>
    %24 = vector.broadcast %3 : vector<1x128xf32> to vector<16x128xf32>
    %25 = arith.addf %23, %24 : vector<16x128xf32>
    %c0_10 = arith.constant 0 : index
    %c0_11 = arith.constant 0 : index
    %26 = vector.load %arg2[%c0_10, %c0_11] : memref<128x1152xf32, #tpu.memory_space<vmem>>, vector<128x1152xf32>
    %cst_12 = arith.constant dense<0.000000e+00> : vector<16x1152xf32>
    %27 = tpu.matmul %25, %26, %cst_12 {dimension_numbers = #tpu.dot_dimension_numbers<[1], [0], [0], [1], [0, 0, 1, 1], [], []>} : vector<16x128xf32>, vector<128x1152xf32>, vector<16x1152xf32> -> vector<16x1152xf32>
    %28 = vector.extract_strided_slice %27 {offsets = [0, 0], sizes = [16, 512], strides = [1, 1]} : vector<16x1152xf32> to vector<16x512xf32>
    %29 = vector.extract_strided_slice %27 {offsets = [0, 512], sizes = [16, 512], strides = [1, 1]} : vector<16x1152xf32> to vector<16x512xf32>
    %30 = vector.extract_strided_slice %27 {offsets = [0, 1024], sizes = [16, 128], strides = [1, 1]} : vector<16x1152xf32> to vector<16x128xf32>
    %31 = vector.shape_cast %28 : vector<16x512xf32> to vector<16x4x128xf32>
    %32 = tpu.transpose %31, [1, 0, 2] : vector<16x4x128xf32> -> vector<4x16x128xf32>
    %33 = vector.shape_cast %32 : vector<4x16x128xf32> to vector<8x8x128xf32>
    %34 = vector.shape_cast %29 : vector<16x512xf32> to vector<16x4x128xf32>
    %35 = tpu.transpose %34, [1, 0, 2] : vector<16x4x128xf32> -> vector<4x16x128xf32>
    %36 = vector.shape_cast %35 : vector<4x16x128xf32> to vector<8x8x128xf32>
    %37 = vector.shape_cast %30 : vector<16x128xf32> to vector<16x4x32xf32>
    %38 = tpu.transpose %37, [1, 0, 2] : vector<16x4x32xf32> -> vector<4x16x32xf32>
    %39 = vector.shape_cast %38 : vector<4x16x32xf32> to vector<8x8x32xf32>
    %40 = tpu.iota {dimensions = array<i32: 0>} : vector<8x8xi32>
    %41 = tpu.iota {dimensions = array<i32: 1>} : vector<8x8xi32>
    %42 = arith.cmpi sle, %41, %40 : vector<8x8xi32>
    "tpu.trace_start"() <{level = 10 : i32, message = "bqd,bkd->bqk"}> : () -> ()
    %cst_13 = arith.constant dense<0.000000e+00> : vector<8x8x8xf32>
    %43 = tpu.matmul %33, %36, %cst_13 {dimension_numbers = #tpu.dot_dimension_numbers<[2], [2], [1], [1], [0, 0, 0, 1, 1, 1], [0], [0]>} : vector<8x8x128xf32>, vector<8x8x128xf32>, vector<8x8x8xf32> -> vector<8x8x8xf32>
    "tpu.trace_stop"() : () -> ()
    %44 = vector.shape_cast %42 : vector<8x8xi1> to vector<1x8x8xi1>
    %cst_14 = arith.constant 0xFF800000 : f32
    %45 = vector.shape_cast %44 : vector<1x8x8xi1> to vector<1x8x8xi1>
    %46 = vector.broadcast %45 : vector<1x8x8xi1> to vector<8x8x8xi1>
    %47 = vector.broadcast %cst_14 : f32 to vector<8x8x8xf32>
    %48 = arith.select %46, %43, %47 : vector<8x8x8xi1>, vector<8x8x8xf32>
    %cst_15 = arith.constant dense<0xFF800000> : vector<8x8xf32>
    %49 = vector.multi_reduction <maximumf>, %48, %cst_15 [1] : vector<8x8x8xf32> to vector<8x8xf32>
    %50 = vector.shape_cast %49 : vector<8x8xf32> to vector<8x1x8xf32>
    %51 = vector.broadcast %50 : vector<8x1x8xf32> to vector<8x8x8xf32>
    %52 = arith.subf %48, %51 : vector<8x8x8xf32>
    %53 = math.exp %52 : vector<8x8x8xf32>
    %cst_16 = arith.constant dense<0.000000e+00> : vector<8x8xf32>
    %54 = vector.multi_reduction <add>, %53, %cst_16 [1] : vector<8x8x8xf32> to vector<8x8xf32>
    %55 = vector.shape_cast %54 : vector<8x8xf32> to vector<8x1x8xf32>
    %56 = tpu.reciprocal %55 : vector<8x1x8xf32> -> vector<8x1x8xf32>
    %57 = vector.broadcast %56 : vector<8x1x8xf32> to vector<8x8x8xf32>
    %58 = arith.mulf %53, %57 : vector<8x8x8xf32>
    "tpu.trace_start"() <{level = 10 : i32, message = "bqk,bkd->bqd"}> : () -> ()
    %cst_17 = arith.constant dense<0.000000e+00> : vector<8x8x32xf32>
    %59 = tpu.matmul %58, %39, %cst_17 {dimension_numbers = #tpu.dot_dimension_numbers<[2], [1], [1], [2], [0, 0, 0, 1, 1, 2], [0], [0]>} : vector<8x8x8xf32>, vector<8x8x32xf32>, vector<8x8x32xf32> -> vector<8x8x32xf32>
    "tpu.trace_stop"() : () -> ()
    %60 = vector.shape_cast %59 : vector<8x8x32xf32> to vector<4x16x32xf32>
    %61 = tpu.transpose %60, [1, 0, 2] : vector<4x16x32xf32> -> vector<16x4x32xf32>
    %62 = vector.shape_cast %61 : vector<16x4x32xf32> to vector<16x128xf32>
    %63 = arith.addf %1, %62 : vector<16x128xf32>
    %c0_18 = arith.constant 0 : index
    %c0_19 = arith.constant 0 : index
    %64 = vector.load %arg5[%c0_18, %c0_19] : memref<1x128xf32, #tpu.memory_space<vmem>>, vector<1x128xf32>
    %c0_20 = arith.constant 0 : index
    %c0_21 = arith.constant 0 : index
    %65 = vector.load %arg6[%c0_20, %c0_21] : memref<1x128xf32, #tpu.memory_space<vmem>>, vector<1x128xf32>
    %cst_22 = arith.constant dense<0.000000e+00> : vector<16xf32>
    %66 = vector.multi_reduction <add>, %63, %cst_22 [1] : vector<16x128xf32> to vector<16xf32>
    %67 = vector.shape_cast %66 : vector<16xf32> to vector<16x1xf32>
    %cst_23 = arith.constant 1.280000e+02 : f32
    %68 = vector.broadcast %cst_23 : f32 to vector<16x1xf32>
    %69 = arith.divf %67, %68 : vector<16x1xf32>
    %70 = vector.broadcast %69 : vector<16x1xf32> to vector<16x128xf32>
    %71 = arith.subf %63, %70 : vector<16x128xf32>
    %72 = arith.mulf %71, %71 : vector<16x128xf32>
    %cst_24 = arith.constant dense<0.000000e+00> : vector<16xf32>
    %73 = vector.multi_reduction <add>, %72, %cst_24 [1] : vector<16x128xf32> to vector<16xf32>
    %74 = vector.shape_cast %73 : vector<16xf32> to vector<16x1xf32>
    %cst_25 = arith.constant 1.280000e+02 : f32
    %75 = vector.broadcast %cst_25 : f32 to vector<16x1xf32>
    %76 = arith.divf %74, %75 : vector<16x1xf32>
    %77 = vector.broadcast %69 : vector<16x1xf32> to vector<16x128xf32>
    %78 = arith.subf %63, %77 : vector<16x128xf32>
    %cst_26 = arith.constant 9.99999974E-6 : f32
    %79 = vector.broadcast %cst_26 : f32 to vector<16x1xf32>
    %80 = arith.addf %76, %79 : vector<16x1xf32>
    %81 = math.rsqrt %80 : vector<16x1xf32>
    %82 = vector.broadcast %81 : vector<16x1xf32> to vector<16x128xf32>
    %83 = arith.mulf %78, %82 : vector<16x128xf32>
    %84 = vector.broadcast %64 : vector<1x128xf32> to vector<16x128xf32>
    %85 = arith.mulf %83, %84 : vector<16x128xf32>
    %86 = vector.broadcast %65 : vector<1x128xf32> to vector<16x128xf32>
    %87 = arith.addf %85, %86 : vector<16x128xf32>
    %c0_27 = arith.constant 0 : index
    %c0_28 = arith.constant 0 : index
    %88 = vector.load %arg7[%c0_27, %c0_28] : memref<128x512xf32, #tpu.memory_space<vmem>>, vector<128x512xf32>
    %cst_29 = arith.constant dense<0.000000e+00> : vector<16x512xf32>
    %89 = tpu.matmul %87, %88, %cst_29 {dimension_numbers = #tpu.dot_dimension_numbers<[1], [0], [0], [1], [0, 0, 1, 1], [], []>} : vector<16x128xf32>, vector<128x512xf32>, vector<16x512xf32> -> vector<16x512xf32>
    %c0_30 = arith.constant 0 : index
    %c0_31 = arith.constant 0 : index
    %90 = vector.load %arg8[%c0_30, %c0_31] : memref<1x512xf32, #tpu.memory_space<vmem>>, vector<1x512xf32>
    %91 = vector.broadcast %90 : vector<1x512xf32> to vector<16x512xf32>
    %92 = arith.addf %89, %91 : vector<16x512xf32>
    %cst_32 = arith.constant 0.000000e+00 : f32
    %93 = vector.broadcast %cst_32 : f32 to vector<16x512xf32>
    %94 = arith.maximumf %92, %93 : vector<16x512xf32>
    %c0_33 = arith.constant 0 : index
    %c0_34 = arith.constant 0 : index
    %95 = vector.load %arg9[%c0_33, %c0_34] : memref<512x128xf32, #tpu.memory_space<vmem>>, vector<512x128xf32>
    %cst_35 = arith.constant dense<0.000000e+00> : vector<16x128xf32>
    %96 = tpu.matmul %94, %95, %cst_35 {dimension_numbers = #tpu.dot_dimension_numbers<[1], [0], [0], [1], [0, 0, 1, 1], [], []>} : vector<16x512xf32>, vector<512x128xf32>, vector<16x128xf32> -> vector<16x128xf32>
    %c0_36 = arith.constant 0 : index
    %c0_37 = arith.constant 0 : index
    %97 = vector.load %arg10[%c0_36, %c0_37] : memref<1x128xf32, #tpu.memory_space<vmem>>, vector<1x128xf32>
    %98 = vector.broadcast %97 : vector<1x128xf32> to vector<16x128xf32>
    %99 = arith.addf %96, %98 : vector<16x128xf32>
    %100 = arith.addf %63, %99 : vector<16x128xf32>
    %101 = vector.shape_cast %100 : vector<16x128xf32> to vector<2x8x128xf32>
    %c0_38 = arith.constant 0 : index
    %c0_39 = arith.constant 0 : index
    %c0_40 = arith.constant 0 : index
    %102 = vector.load %arg11[%c0_38, %c0_39, %c0_40] : memref<2x8x128xf32, #tpu.memory_space<vmem>>, vector<2x8x128xf32>
    tpu.vector_store %arg11[%c0_38, %c0_39, %c0_40], %101 {strides = array<i32>} : memref<2x8x128xf32, #tpu.memory_space<vmem>>, vector<2x8x128xf32>,
    return
  }
  func.func @transform_0(%arg0: i32) -> (i32, i32, i32) {
    %c0_i32 = arith.constant 0 : i32
    %c0_i32_0 = arith.constant 0 : i32
    %c0_i32_1 = arith.constant 0 : i32
    return %arg0, %c0_i32, %c0_i32_0 : i32, i32, i32
  }
  func.func @transform_1(%arg0: i32) -> (i32, i32) {
    %c0_i32 = arith.constant 0 : i32
    %c0_i32_0 = arith.constant 0 : i32
    %c0_i32_1 = arith.constant 0 : i32
    return %c0_i32, %c0_i32_0 : i32, i32
  }
  func.func @transform_2(%arg0: i32) -> (i32, i32) {
    %c0_i32 = arith.constant 0 : i32
    %c0_i32_0 = arith.constant 0 : i32
    %c0_i32_1 = arith.constant 0 : i32
    return %c0_i32, %c0_i32_0 : i32, i32
  }
  func.func @transform_3(%arg0: i32) -> (i32, i32) {
    %c0_i32 = arith.constant 0 : i32
    %c0_i32_0 = arith.constant 0 : i32
    %c0_i32_1 = arith.constant 0 : i32
    return %c0_i32, %c0_i32_0 : i32, i32
  }
  func.func @transform_4(%arg0: i32) -> (i32, i32) {
    %c0_i32 = arith.constant 0 : i32
    %c0_i32_0 = arith.constant 0 : i32
    %c0_i32_1 = arith.constant 0 : i32
    return %c0_i32, %c0_i32_0 : i32, i32
  }
  func.func @transform_5(%arg0: i32) -> (i32, i32) {
    %c0_i32 = arith.constant 0 : i32
    %c0_i32_0 = arith.constant 0 : i32
    %c0_i32_1 = arith.constant 0 : i32
    return %c0_i32, %c0_i32_0 : i32, i32
  }
  func.func @transform_6(%arg0: i32) -> (i32, i32) {
    %c0_i32 = arith.constant 0 : i32
    %c0_i32_0 = arith.constant 0 : i32
    %c0_i32_1 = arith.constant 0 : i32
    return %c0_i32, %c0_i32_0 : i32, i32
  }
  func.func @transform_7(%arg0: i32) -> (i32, i32) {
    %c0_i32 = arith.constant 0 : i32
    %c0_i32_0 = arith.constant 0 : i32
    %c0_i32_1 = arith.constant 0 : i32
    return %c0_i32, %c0_i32_0 : i32, i32
  }
  func.func @transform_8(%arg0: i32) -> (i32, i32) {
    %c0_i32 = arith.constant 0 : i32
    %c0_i32_0 = arith.constant 0 : i32
    %c0_i32_1 = arith.constant 0 : i32
    return %c0_i32, %c0_i32_0 : i32, i32
  }
  func.func @transform_9(%arg0: i32) -> (i32, i32) {
    %c0_i32 = arith.constant 0 : i32
    %c0_i32_0 = arith.constant 0 : i32
    %c0_i32_1 = arith.constant 0 : i32
    return %c0_i32, %c0_i32_0 : i32, i32
  }
  func.func @transform_10(%arg0: i32) -> (i32, i32, i32) {
    %c0_i32 = arith.constant 0 : i32
    %c0_i32_0 = arith.constant 0 : i32
    %c0_i32_1 = arith.constant 0 : i32
    return %arg0, %c0_i32, %c0_i32_0 : i32, i32, i32
  }
}

module attributes {stable_mosaic.version = 11 : i64} {
  func.func @block_kernel(%arg0: i32, %arg1: memref<2x8x128xf32, #tpu.memory_space<vmem>>, %arg2: memref<128x1152xf32, #tpu.memory_space<vmem>>, %arg3: memref<1x128xf32, #tpu.memory_space<vmem>>, %arg4: memref<1x128xf32, #tpu.memory_space<vmem>>, %arg5: memref<1x128xf32, #tpu.memory_space<vmem>>, %arg6: memref<1x128xf32, #tpu.memory_space<vmem>>, %arg7: memref<128x512xf32, #tpu.memory_space<vmem>>, %arg8: memref<1x512xf32, #tpu.memory_space<vmem>>, %arg9: memref<512x128xf32, #tpu.memory_space<vmem>>, %arg10: memref<1x128xf32, #tpu.memory_space<vmem>>, %arg11: memref<2x8x128xf32, #tpu.memory_space<vmem>>) attributes {dimension_semantics = [#tpu.dimension_semantics<parallel>], iteration_bounds = array<i64: 1>, scalar_prefetch = 0 : i64, scratch_operands = 0 : i64, tpu.core_type = #tpu.core_type<tc>, window_params = [{transform_indices = @transform_0, window_bounds = array<i64: 2, 8, 128>}, {pipeline_mode = #tpu.pipeline_mode<synchronous>, transform_indices = @transform_1, window_bounds = array<i64: 128, 1152>}, {pipeline_mode = #tpu.pipeline_mode<synchronous>, transform_indices = @transform_2, window_bounds = array<i64: 1, 128>}, {pipeline_mode = #tpu.pipeline_mode<synchronous>, transform_indices = @transform_3, window_bounds = array<i64: 1, 128>}, {pipeline_mode = #tpu.pipeline_mode<synchronous>, transform_indices = @transform_4, window_bounds = array<i64: 1, 128>}, {pipeline_mode = #tpu.pipeline_mode<synchronous>, transform_indices = @transform_5, window_bounds = array<i64: 1, 128>}, {pipeline_mode = #tpu.pipeline_mode<synchronous>, transform_indices = @transform_6, window_bounds = array<i64: 128, 512>}, {pipeline_mode = #tpu.pipeline_mode<synchronous>, transform_indices = @transform_7, window_bounds = array<i64: 1, 512>}, {pipeline_mode = #tpu.pipeline_mode<synchronous>, transform_indices = @transform_8, window_bounds = array<i64: 512, 128>}, {pipeline_mode = #tpu.pipeline_mode<synchronous>, transform_indices = @transform_9, window_bounds = array<i64: 1, 128>}, {transform_indices = @transform_10, window_bounds = array<i64: 2, 8, 128>}]} {
    %c0 = arith.constant 0 : index
    %c0_0 = arith.constant 0 : index
    %c0_1 = arith.constant 0 : index
    %0 = vector.load %arg1[%c0, %c0_0, %c0_1] : memref<2x8x128xf32, #tpu.memory_space<vmem>>, vector<2x8x128xf32>
    %1 = vector.shape_cast %0 : vector<2x8x128xf32> to vector<16x128xf32>
    %c0_2 = arith.constant 0 : index
    %c0_3 = arith.constant 0 : index
    %2 = vector.load %arg3[%c0_2, %c0_3] : memref<1x128xf32, #tpu.memory_space<vmem>>, vector<1x128xf32>
    %c0_4 = arith.constant 0 : index
    %c0_5 = arith.constant 0 : index
    %3 = vector.load %arg4[%c0_4, %c0_5] : memref<1x128xf32, #tpu.memory_space<vmem>>, vector<1x128xf32>
    %cst = arith.constant dense<0.000000e+00> : vector<16xf32>
    %4 = vector.multi_reduction <add>, %1, %cst [1] : vector<16x128xf32> to vector<16xf32>
    %5 = vector.shape_cast %4 : vector<16xf32> to vector<16x1xf32>
    %cst_6 = arith.constant 1.280000e+02 : f32
    %6 = vector.broadcast %cst_6 : f32 to vector<16x1xf32>
    %7 = arith.divf %5, %6 : vector<16x1xf32>
    %8 = vector.broadcast %7 : vector<16x1xf32> to vector<16x128xf32>
    %9 = arith.subf %1, %8 : vector<16x128xf32>
    %10 = arith.mulf %9, %9 : vector<16x128xf32>
    %cst_7 = arith.constant dense<0.000000e+00> : vector<16xf32>
    %11 = vector.multi_reduction <add>, %10, %cst_7 [1] : vector<16x128xf32> to vector<16xf32>
    %12 = vector.shape_cast %11 : vector<16xf32> to vector<16x1xf32>
    %cst_8 = arith.constant 1.280000e+02 : f32
    %13 = vector.broadcast %cst_8 : f32 to vector<16x1xf32>
    %14 = arith.divf %12, %13 : vector<16x1xf32>
    %15 = vector.broadcast %7 : vector<16x1xf32> to vector<16x128xf32>
    %16 = arith.subf %1, %15 : vector<16x128xf32>
    %cst_9 = arith.constant 9.99999974E-6 : f32
    %17 = vector.broadcast %cst_9 : f32 to vector<16x1xf32>
    %18 = arith.addf %14, %17 : vector<16x1xf32>
    %19 = math.rsqrt %18 : vector<16x1xf32>
    %20 = vector.broadcast %19 : vector<16x1xf32> to vector<16x128xf32>
    %21 = arith.mulf %16, %20 : vector<16x128xf32>
    %22 = vector.broadcast %2 : vector<1x128xf32> to vector<16x128xf32>
    %23 = arith.mulf %21, %22 : vector<16x128xf32>
    %24 = vector.broadcast %3 : vector<1x128xf32> to vector<16x128xf32>
    %25 = arith.addf %23, %24 : vector<16x128xf32>
    %c0_10 = arith.constant 0 : index
    %c0_11 = arith.constant 0 : index
    %26 = vector.load %arg2[%c0_10, %c0_11] : memref<128x1152xf32, #tpu.memory_space<vmem>>, vector<128x1152xf32>
    %cst_12 = arith.constant dense<0.000000e+00> : vector<16x1152xf32>
    %27 = tpu.matmul %25, %26, %cst_12 {dimension_numbers = #tpu.dot_dimension_numbers<[1], [0], [0], [1], [0, 0, 1, 1], [], []>} : vector<16x128xf32>, vector<128x1152xf32>, vector<16x1152xf32> -> vector<16x1152xf32>
    %28 = vector.extract_strided_slice %27 {offsets = [0, 0], sizes = [16, 512], strides = [1, 1]} : vector<16x1152xf32> to vector<16x512xf32>
    %29 = vector.extract_strided_slice %27 {offsets = [0, 512], sizes = [16, 512], strides = [1, 1]} : vector<16x1152xf32> to vector<16x512xf32>
    %30 = vector.extract_strided_slice %27 {offsets = [0, 1024], sizes = [16, 128], strides = [1, 1]} : vector<16x1152xf32> to vector<16x128xf32>
    %31 = vector.shape_cast %28 : vector<16x512xf32> to vector<16x4x128xf32>
    %32 = tpu.transpose %31, [1, 0, 2] : vector<16x4x128xf32> -> vector<4x16x128xf32>
    %33 = vector.shape_cast %32 : vector<4x16x128xf32> to vector<8x8x128xf32>
    %34 = vector.shape_cast %29 : vector<16x512xf32> to vector<16x4x128xf32>
    %35 = tpu.transpose %34, [1, 0, 2] : vector<16x4x128xf32> -> vector<4x16x128xf32>
    %36 = vector.shape_cast %35 : vector<4x16x128xf32> to vector<8x8x128xf32>
    %37 = vector.shape_cast %30 : vector<16x128xf32> to vector<16x4x32xf32>
    %38 = tpu.transpose %37, [1, 0, 2] : vector<16x4x32xf32> -> vector<4x16x32xf32>
    %39 = vector.shape_cast %38 : vector<4x16x32xf32> to vector<8x8x32xf32>
    %40 = tpu.iota {dimensions = array<i32: 0>} : vector<8x8xi32>
    %41 = tpu.iota {dimensions = array<i32: 1>} : vector<8x8xi32>
    %42 = arith.cmpi sle, %41, %40 : vector<8x8xi32>
    "tpu.trace_start"() <{level = 10 : i32, message = "bqd,bkd->bqk"}> : () -> ()
    %cst_13 = arith.constant dense<0.000000e+00> : vector<8x8x8xf32>
    %43 = tpu.matmul %33, %36, %cst_13 {dimension_numbers = #tpu.dot_dimension_numbers<[2], [2], [1], [1], [0, 0, 0, 1, 1, 1], [0], [0]>} : vector<8x8x128xf32>, vector<8x8x128xf32>, vector<8x8x8xf32> -> vector<8x8x8xf32>
    "tpu.trace_stop"() : () -> ()
    %44 = vector.shape_cast %42 : vector<8x8xi1> to vector<1x8x8xi1>
    %cst_14 = arith.constant 0xFF800000 : f32
    %45 = vector.shape_cast %44 : vector<1x8x8xi1> to vector<1x8x8xi1>
    %46 = vector.broadcast %45 : vector<1x8x8xi1> to vector<8x8x8xi1>
    %47 = vector.broadcast %cst_14 : f32 to vector<8x8x8xf32>
    %48 = arith.select %46, %43, %47 : vector<8x8x8xi1>, vector<8x8x8xf32>
    %cst_15 = arith.constant dense<0xFF800000> : vector<8x8xf32>
    %49 = vector.multi_reduction <maximumf>, %48, %cst_15 [1] : vector<8x8x8xf32> to vector<8x8xf32>
    %50 = vector.shape_cast %49 : vector<8x8xf32> to vector<8x1x8xf32>
    %51 = vector.broadcast %50 : vector<8x1x8xf32> to vector<8x8x8xf32>
    %52 = arith.subf %48, %51 : vector<8x8x8xf32>
    %53 = math.exp %52 : vector<8x8x8xf32>
    %cst_16 = arith.constant dense<0.000000e+00> : vector<8x8xf32>
    %54 = vector.multi_reduction <add>, %53, %cst_16 [1] : vector<8x8x8xf32> to vector<8x8xf32>
    %55 = vector.shape_cast %54 : vector<8x8xf32> to vector<8x1x8xf32>
    %56 = tpu.reciprocal %55 : vector<8x1x8xf32> -> vector<8x1x8xf32>
    %57 = vector.broadcast %56 : vector<8x1x8xf32> to vector<8x8x8xf32>
    %58 = arith.mulf %53, %57 : vector<8x8x8xf32>
    "tpu.trace_start"() <{level = 10 : i32, message = "bqk,bkd->bqd"}> : () -> ()
    %cst_17 = arith.constant dense<0.000000e+00> : vector<8x8x32xf32>
    %59 = tpu.matmul %58, %39, %cst_17 {dimension_numbers = #tpu.dot_dimension_numbers<[2], [1], [1], [2], [0, 0, 0, 1, 1, 2], [0], [0]>} : vector<8x8x8xf32>, vector<8x8x32xf32>, vector<8x8x32xf32> -> vector<8x8x32xf32>
    "tpu.trace_stop"() : () -> ()
    %60 = vector.shape_cast %59 : vector<8x8x32xf32> to vector<4x16x32xf32>
    %61 = tpu.transpose %60, [1, 0, 2] : vector<4x16x32xf32> -> vector<16x4x32xf32>
    %62 = vector.shape_cast %61 : vector<16x4x32xf32> to vector<16x128xf32>
    %63 = arith.addf %1, %62 : vector<16x128xf32>
    %c0_18 = arith.constant 0 : index
    %c0_19 = arith.constant 0 : index
    %64 = vector.load %arg5[%c0_18, %c0_19] : memref<1x128xf32, #tpu.memory_space<vmem>>, vector<1x128xf32>
    %c0_20 = arith.constant 0 : index
    %c0_21 = arith.constant 0 : index
    %65 = vector.load %arg6[%c0_20, %c0_21] : memref<1x128xf32, #tpu.memory_space<vmem>>, vector<1x128xf32>
    %cst_22 = arith.constant dense<0.000000e+00> : vector<16xf32>
    %66 = vector.multi_reduction <add>, %63, %cst_22 [1] : vector<16x128xf32> to vector<16xf32>
    %67 = vector.shape_cast %66 : vector<16xf32> to vector<16x1xf32>
    %cst_23 = arith.constant 1.280000e+02 : f32
    %68 = vector.broadcast %cst_23 : f32 to vector<16x1xf32>
    %69 = arith.divf %67, %68 : vector<16x1xf32>
    %70 = vector.broadcast %69 : vector<16x1xf32> to vector<16x128xf32>
    %71 = arith.subf %63, %70 : vector<16x128xf32>
    %72 = arith.mulf %71, %71 : vector<16x128xf32>
    %cst_24 = arith.constant dense<0.000000e+00> : vector<16xf32>
    %73 = vector.multi_reduction <add>, %72, %cst_24 [1] : vector<16x128xf32> to vector<16xf32>
    %74 = vector.shape_cast %73 : vector<16xf32> to vector<16x1xf32>
    %cst_25 = arith.constant 1.280000e+02 : f32
    %75 = vector.broadcast %cst_25 : f32 to vector<16x1xf32>
    %76 = arith.divf %74, %75 : vector<16x1xf32>
    %77 = vector.broadcast %69 : vector<16x1xf32> to vector<16x128xf32>
    %78 = arith.subf %63, %77 : vector<16x128xf32>
    %cst_26 = arith.constant 9.99999974E-6 : f32
    %79 = vector.broadcast %cst_26 : f32 to vector<16x1xf32>
    %80 = arith.addf %76, %79 : vector<16x1xf32>
    %81 = math.rsqrt %80 : vector<16x1xf32>
    %82 = vector.broadcast %81 : vector<16x1xf32> to vector<16x128xf32>
    %83 = arith.mulf %78, %82 : vector<16x128xf32>
    %84 = vector.broadcast %64 : vector<1x128xf32> to vector<16x128xf32>
    %85 = arith.mulf %83, %84 : vector<16x128xf32>
    %86 = vector.broadcast %65 : vector<1x128xf32> to vector<16x128xf32>
    %87 = arith.addf %85, %86 : vector<16x128xf32>
    %c0_27 = arith.constant 0 : index
    %c0_28 = arith.constant 0 : index
    %88 = vector.load %arg7[%c0_27, %c0_28] : memref<128x512xf32, #tpu.memory_space<vmem>>, vector<128x512xf32>
    %cst_29 = arith.constant dense<0.000000e+00> : vector<16x512xf32>
    %89 = tpu.matmul %87, %88, %cst_29 {dimension_numbers = #tpu.dot_dimension_numbers<[1], [0], [0], [1], [0, 0, 1, 1], [], []>} : vector<16x128xf32>, vector<128x512xf32>, vector<16x512xf32> -> vector<16x512xf32>
    %c0_30 = arith.constant 0 : index
    %c0_31 = arith.constant 0 : index
    %90 = vector.load %arg8[%c0_30, %c0_31] : memref<1x512xf32, #tpu.memory_space<vmem>>, vector<1x512xf32>
    %91 = vector.broadcast %90 : vector<1x512xf32> to vector<16x512xf32>
    %92 = arith.addf %89, %91 : vector<16x512xf32>
    %cst_32 = arith.constant 0.000000e+00 : f32
    %93 = vector.broadcast %cst_32 : f32 to vector<16x512xf32>
    %94 = arith.maximumf %92, %93 : vector<16x512xf32>
    %c0_33 = arith.constant 0 : index
    %c0_34 = arith.constant 0 : index
    %95 = vector.load %arg9[%c0_33, %c0_34] : memref<512x128xf32, #tpu.memory_space<vmem>>, vector<512x128xf32>
    %cst_35 = arith.constant dense<0.000000e+00> : vector<16x128xf32>
    %96 = tpu.matmul %94, %95, %cst_35 {dimension_numbers = #tpu.dot_dimension_numbers<[1], [0], [0], [1], [0, 0, 1, 1], [], []>} : vector<16x512xf32>, vector<512x128xf32>, vector<16x128xf32> -> vector<16x128xf32>
    %c0_36 = arith.constant 0 : index
    %c0_37 = arith.constant 0 : index
    %97 = vector.load %arg10[%c0_36, %c0_37] : memref<1x128xf32, #tpu.memory_space<vmem>>, vector<1x128xf32>
    %98 = vector.broadcast %97 : vector<1x128xf32> to vector<16x128xf32>
    %99 = arith.addf %96, %98 : vector<16x128xf32>
    %100 = arith.addf %63, %99 : vector<16x128xf32>
    %101 = vector.shape_cast %100 : vector<16x128xf32> to vector<2x8x128xf32>
    %c0_38 = arith.constant 0 : index
    %c0_39 = arith.constant 0 : index
    %c0_40 = arith.constant 0 : index
    %102 = vector.load %arg11[%c0_38, %c0_39, %c0_40] : memref<2x8x128xf32, #tpu.memory_space<vmem>>, vector<2x8x128xf32>
    tpu.vector_store %arg11[%c0_38, %c0_39, %c0_40], %101 {strides = array<i32>} : memref<2x8x128xf32, #tpu.memory_space<vmem>>, vector<2x8x128xf32>,
    return
  }
  func.func @transform_0(%arg0: i32) -> (i32, i32, i32) {
    %c0_i32 = arith.constant 0 : i32
    %c0_i32_0 = arith.constant 0 : i32
    %c0_i32_1 = arith.constant 0 : i32
    return %arg0, %c0_i32, %c0_i32_0 : i32, i32, i32
  }
  func.func @transform_1(%arg0: i32) -> (i32, i32) {
    %c0_i32 = arith.constant 0 : i32
    %c0_i32_0 = arith.constant 0 : i32
    %c0_i32_1 = arith.constant 0 : i32
    return %c0_i32, %c0_i32_0 : i32, i32
  }
  func.func @transform_2(%arg0: i32) -> (i32, i32) {
    %c0_i32 = arith.constant 0 : i32
    %c0_i32_0 = arith.constant 0 : i32
    %c0_i32_1 = arith.constant 0 : i32
    return %c0_i32, %c0_i32_0 : i32, i32
  }
  func.func @transform_3(%arg0: i32) -> (i32, i32) {
    %c0_i32 = arith.constant 0 : i32
    %c0_i32_0 = arith.constant 0 : i32
    %c0_i32_1 = arith.constant 0 : i32
    return %c0_i32, %c0_i32_0 : i32, i32
  }
  func.func @transform_4(%arg0: i32) -> (i32, i32) {
    %c0_i32 = arith.constant 0 : i32
    %c0_i32_0 = arith.constant 0 : i32
    %c0_i32_1 = arith.constant 0 : i32
    return %c0_i32, %c0_i32_0 : i32, i32
  }
  func.func @transform_5(%arg0: i32) -> (i32, i32) {
    %c0_i32 = arith.constant 0 : i32
    %c0_i32_0 = arith.constant 0 : i32
    %c0_i32_1 = arith.constant 0 : i32
    return %c0_i32, %c0_i32_0 : i32, i32
  }
  func.func @transform_6(%arg0: i32) -> (i32, i32) {
    %c0_i32 = arith.constant 0 : i32
    %c0_i32_0 = arith.constant 0 : i32
    %c0_i32_1 = arith.constant 0 : i32
    return %c0_i32, %c0_i32_0 : i32, i32
  }
  func.func @transform_7(%arg0: i32) -> (i32, i32) {
    %c0_i32 = arith.constant 0 : i32
    %c0_i32_0 = arith.constant 0 : i32
    %c0_i32_1 = arith.constant 0 : i32
    return %c0_i32, %c0_i32_0 : i32, i32
  }
  func.func @transform_8(%arg0: i32) -> (i32, i32) {
    %c0_i32 = arith.constant 0 : i32
    %c0_i32_0 = arith.constant 0 : i32
    %c0_i32_1 = arith.constant 0 : i32
    return %c0_i32, %c0_i32_0 : i32, i32
  }
  func.func @transform_9(%arg0: i32) -> (i32, i32) {
    %c0_i32 = arith.constant 0 : i32
    %c0_i32_0 = arith.constant 0 : i32
    %c0_i32_1 = arith.constant 0 : i32
    return %c0_i32, %c0_i32_0 : i32, i32
  }
  func.func @transform_10(%arg0: i32) -> (i32, i32, i32) {
    %c0_i32 = arith.constant 0 : i32
    %c0_i32_0 = arith.constant 0 : i32
    %c0_i32_1 = arith.constant 0 : i32
    return %arg0, %c0_i32, %c0_i32_0 : i32, i32, i32
  }
}

</mosaic_0001>

<bundles_post_ra>
// kernel: tpu_custom_call.1
= control target key start
LH: loop header
LB: loop body
LE: loop exit
PB: predicated region body
PF: predicated region fallthrough
CT: control target
= control target key end

     0   :  { %15 = vsyncpa [#allocation3], 0  ;;  %s4976_s0 = inlined_call_operand.hbm [shape: f32[2,8,128], index: 0, kind: input, shape index: {}]   ;;  %s4977_s1 = inlined_call_operand.hbm [shape: f32[128,1152], index: 1, kind: input, shape index: {}]   ;;  %s4978_s2 = inlined_call_operand.vmem [shape: f32[1,128], index: 2, kind: input, shape index: {}]   ;;  %s4979_s3 = inlined_call_operand.vmem [shape: f32[1,128], index: 3, kind: input, shape index: {}]   ;;  %s4980_s4 = inlined_call_operand.vmem [shape: f32[1,128], index: 4, kind: input, shape index: {}]   ;;  %s4981_s5 = inlined_call_operand.vmem [shape: f32[1,128], index: 5, kind: input, shape index: {}]   ;;  %s4982_s6 = inlined_call_operand.hbm [shape: f32[128,512], index: 6, kind: input, shape index: {}]   ;;  %s4983_s7 = inlined_call_operand.vmem [shape: f32[1,512], index: 7, kind: input, shape index: {}]   ;;  %s4984_s8 = inlined_call_operand.hbm [shape: f32[512,128], index: 8, kind: input, shape index: {}]   ;;  %s4985_s9 = inlined_call_operand.vmem [shape: f32[1,128], index: 9, kind: input, shape index: {}]   ;;  %s4986_s10 = inlined_call_operand.hbm [shape: f32[2,8,128], index: 10, kind: output, shape index: {}]  }
   0x1   :  { %16 = vsyncpa [#allocation6], 0 }
   0x2   :  { %17 = vsyncpa [#allocation9], 0 }
   0x3   :  { %18 = vsyncpa [#allocation4], 0  ;;  %s4383_s13 = smov [#allocation5]   ;;  %s4265_s17 = scalar_lea.hbm %s4977_s1, 18432 }
   0x4   :  { %s36_s14 = sshll.u32 %s4383_s13, 4  ;;  %p4266_p0 = scmp.ne.s32.totalorder %s4977_s1, %s4265_s17  ;;  %s37_s14 = int_to_ptr.vmem [resolvable:$true] %s36_s14 }
   0x5   :  { %p4269_p1 = scmp.lt.u32.totalorder %s4265_s17, %s4977_s1 }
   0x7   :  { %p4271_p2 = pnand %p4269_p1, %p4266_p0 }
   0x9   :  { %4274 = shalt.err (!%p4271_p2)
}
   0xa   :  { %s4275_s22 = scalar_lea.vmem %s37_s14, 18432  ;;  %p4280_p4 = scmp.lt.s32.totalorder %s37_s14, %s37_s14 }
   0xb   :  { %p4276_p3 = scmp.ne.s32.totalorder %s37_s14, %s4275_s22  ;;  %p4281_p5 = scmp.lt.s32.totalorder %s4275_s22, %s4275_s22 }
   0xd   :  { %p4282_p6 = por %p4281_p5, %p4280_p4 }
   0xf   :  { %p4283_p7 = pnand %p4282_p6, %p4276_p3 }
  0x11   :  { %4286 = shalt.err (!%p4283_p7)
}
  0x12   :  { %s4384_s23 = smov 1152   ;;  %s4385_s24 = smov 72  }
  0x13   :  { %42 = dma.hbm_to_vmem [thread:$0]  %s4977_s1, 18432, %s37_s14, [#allocation6], %s4384_s23, %s4384_s23, %s4385_s24  }
  0x14   :  { %s4386_s27 = smov [#allocation2]   ;;  %s4287_s11 = scalar_lea.hbm %s4976_s0, 256 }
  0x15   :  { %s24_s28 = sshll.u32 %s4386_s27, 4  ;;  %p4288_p8 = scmp.ne.s32.totalorder %s4976_s0, %s4287_s11  ;;  %s25_s28 = int_to_ptr.vmem [resolvable:$true] %s24_s28 }
  0x16   :  { %p4291_p9 = scmp.lt.u32.totalorder %s4287_s11, %s4976_s0 }
  0x18   :  { %p4293_p10 = pnand %p4291_p9, %p4288_p8 }
  0x1a   :  { %4296 = shalt.err (!%p4293_p10)
}
  0x1b   :  { %s4297_s17 = scalar_lea.vmem %s25_s28, 256  ;;  %p4302_p12 = scmp.lt.s32.totalorder %s25_s28, %s25_s28 }
  0x1c   :  { %p4298_p11 = scmp.ne.s32.totalorder %s25_s28, %s4297_s17  ;;  %p4303_p13 = scmp.lt.s32.totalorder %s4297_s17, %s4297_s17 }
  0x1e   :  { %p4304_p0 = por %p4303_p13, %p4302_p12 }
  0x20   :  { %p4305_p1 = pnand %p4304_p0, %p4298_p11 }
  0x22   :  { %4308 = shalt.err (!%p4305_p1)
}
  0x23   :  { %s4387_s1 = smov 128   ;;  %s4388_s14 = smov 8  }
  0x24   :  { %30 = dma.hbm_to_vmem [thread:$0]  %s4976_s0, 256, %s25_s28, [#allocation3], %s4387_s1, %s4387_s1, %s4388_s14  }
  0x25   :  { %s4389_s20 = smov [#allocation7]   ;;  %s4309_s24 = scalar_lea.hbm %s4982_s6, 8192 }
  0x26   :  { %s56_s21 = sshll.u32 %s4389_s20, 4  ;;  %p4310_p2 = scmp.ne.s32.totalorder %s4982_s6, %s4309_s24  ;;  %s57_s21 = int_to_ptr.vmem [resolvable:$true] %s56_s21 }
  0x27   :  { %p4313_p3 = scmp.lt.u32.totalorder %s4309_s24, %s4982_s6 }
  0x29   :  { %p4315_p4 = pnand %p4313_p3, %p4310_p2 }
  0x2b   :  { %4318 = shalt.err (!%p4315_p4)
}
  0x2c   :  { %s4319_s30 = scalar_lea.vmem %s57_s21, 8192  ;;  %p4324_p6 = scmp.lt.s32.totalorder %s57_s21, %s57_s21 }
  0x2d   :  { %p4320_p5 = scmp.ne.s32.totalorder %s57_s21, %s4319_s30  ;;  %p4325_p7 = scmp.lt.s32.totalorder %s4319_s30, %s4319_s30 }
  0x2f   :  { %p4326_p8 = por %p4325_p7, %p4324_p6 }
  0x31   :  { %p4327_p9 = pnand %p4326_p8, %p4320_p5 }
  0x33   :  { %4330 = shalt.err (!%p4327_p9)
}
  0x34   :  { %s4390_s0 = smov 512   ;;  %s4391_s28 = smov 32  }
  0x35   :  { %62 = dma.hbm_to_vmem [thread:$0]  %s4982_s6, 8192, %s57_s21, [#allocation6], %s4390_s0, %s4390_s0, %s4391_s28  }
  0x36   :  { %s4392_s13 = smov [#allocation8]   ;;  %s4331_s18 = scalar_lea.hbm %s4984_s8, 8192 }
  0x37   :  { %s70_s15 = sshll.u32 %s4392_s13, 4  ;;  %p4332_p10 = scmp.ne.s32.totalorder %s4984_s8, %s4331_s18  ;;  %s71_s15 = int_to_ptr.vmem [resolvable:$true] %s70_s15 }
  0x38   :  { %p4335_p11 = scmp.lt.u32.totalorder %s4331_s18, %s4984_s8 }
  0x3a   :  { %p4337_p12 = pnand %p4335_p11, %p4332_p10 }
  0x3c   :  { %4340 = shalt.err (!%p4337_p12)
}
  0x3d   :  { %s4341_s24 = scalar_lea.vmem %s71_s15, 8192  ;;  %p4346_p0 = scmp.lt.s32.totalorder %s71_s15, %s71_s15 }
  0x3e   :  { %p4342_p13 = scmp.ne.s32.totalorder %s71_s15, %s4341_s24  ;;  %p4347_p1 = scmp.lt.s32.totalorder %s4341_s24, %s4341_s24 }
  0x40   :  { %p4348_p2 = por %p4347_p1, %p4346_p0 }
  0x42   :  { %p4349_p3 = pnand %p4348_p2, %p4342_p13 }
  0x44   :  { %4352 = shalt.err (!%p4349_p3)
}
  0x45   :  { %76 = dma.hbm_to_vmem [thread:$0]  %s4984_s8, 8192, %s71_s15, [#allocation9], %s4387_s1, %s4387_s1, %s4388_s14  }
  0x46   :  { %4375 = dma.done.wait [#allocation3], 256  }
  0x47   :  { %4376 = vsyncadd [#allocation3], 4294967040 }
  0x48   :  { %4377 = dma.done.wait [#allocation6], 26624  }
  0x49   :  { %4378 = vsyncadd [#allocation6], 4294940672 }
  0x4a   :  { %4379 = dma.done.wait [#allocation9], 8192  }
  0x4b   :  { %4380 = vsyncadd [#allocation9], 4294959104  ;;  %v91_v0 = vld [vmem:[#allocation2] sm:$0xff]  ;;  %v92_v1 = vld [vmem:[#allocation2 + $0x8] sm:$0xff]  ;;  %vm4394_vm0 = vmmov 0   ;;  %vm2072_vm2 = vcmask 64512  }
  0x4c   :  { %95 = vadd.xlane.f32.xlu0 %v91_v0  ;;  %v135_v2 = vld [vmem:[#allocation5 + $0x8] sm:$0xff]  ;;  %v144_v3 = vld [vmem:[#allocation5 + $0x50] sm:$0xff]  ;;  %v137_v4 = vld [vmem:[#allocation5 + $0x18] sm:$0xff]  ;;  %vm3105_vm3 = vcmask 261120   ;;  %vm3108_vm4 = vcmask 523264   ;;  %vm3111_vm5 = vcmask 785408  }
  0x4d   :  { %v3918_v5 = vpack.c.bf16 %v144_v3, %v135_v2  ;;  %v146_v6 = vld [vmem:[#allocation5 + $0x60] sm:$0xff]  ;;  %v143_v8 = vld [vmem:[#allocation5 + $0x48] sm:$0xff]  ;;  %v136_v11 = vld [vmem:[#allocation5 + $0x10] sm:$0xff]  ;;  %s4399_s12 = smov [#allocation10]  }
  0x4e   :  { %v134_v7 = vld [vmem:[#allocation5] sm:$0xff]  ;;  %v3950_v9 = vpack.c.bf16 %v146_v6, %v137_v4  ;;  %v145_v12 = vld [vmem:[#allocation5 + $0x58] sm:$0xff]  ;;  %v155_v16 = vld [vmem:[#allocation5 + $0xa8] sm:$0xff]  ;;  %s3634_s13 = sshll.u32 %s4399_s12, 4  ;;  %s3635_s13 = int_to_ptr.vmem [resolvable:$true] %s3634_s13 }
  0x4f   :  { %v3920_v10 = vpack.c.bf16 %v143_v8, %v134_v7  ;;  %v153_v13 = vld [vmem:[#allocation5 + $0x98] sm:$0xff]  ;;  %3919 = vmatprep.subr.bf16.mxu0 %v3918_v5  ;;  %v3952_v14 = vpack.c.bf16 %v145_v12, %v136_v11  ;;  %v162_v15 = vld [vmem:[#allocation5 + $0xe0] sm:$0xff]  ;;  %v164_v17 = vld [vmem:[#allocation5 + $0xf0] sm:$0xff]  ;;  %p4358_p5 = scmp.lt.s32.totalorder %s3635_s13, %s3635_s13 }
  0x50   :  { %97 = vadd.xlane.f32.xlu0 %v92_v1  ;;  %3951 = vmatprep.subr.bf16.mxu1 %v3950_v9  ;;  %v3922_v18 = vpack.c.bf16 %v162_v15, %v153_v13  ;;  %v3954_v19 = vpack.c.bf16 %v164_v17, %v155_v16  ;;  %v152_v20 = vld [vmem:[#allocation5 + $0x90] sm:$0xff]  ;;  %v161_v21 = vld [vmem:[#allocation5 + $0xd8] sm:$0xff]  ;;  %v154_v22 = vld [vmem:[#allocation5 + $0xa0] sm:$0xff] }
  0x51   :  { %3921 = vmatpush1.bf16.msra.mxu0 %v3920_v10  ;;  %3953 = vmatpush1.bf16.msra.mxu1 %v3952_v14  ;;  %v3924_v23 = vpack.c.bf16 %v161_v21, %v152_v20  ;;  %v163_v24 = vld [vmem:[#allocation5 + $0xe8] sm:$0xff]  ;;  %v180_v26 = vld [vmem:[#allocation5 + $0x170] sm:$0xff]  ;;  %v173_v29 = vld [vmem:[#allocation5 + $0x138] sm:$0xff] }
  0x52   :  { %v171_v25 = vld [vmem:[#allocation5 + $0x128] sm:$0xff]  ;;  %3923 = vmatprep.subr.bf16.mxu0 %v3922_v18  ;;  %3955 = vmatprep.subr.bf16.mxu1 %v3954_v19  ;;  %v3956_v27 = vpack.c.bf16 %v163_v24, %v154_v22  ;;  %v182_v30 = vld [vmem:[#allocation5 + $0x180] sm:$0xff]  ;;  %v172_v34 = vld [vmem:[#allocation5 + $0x130] sm:$0xff] }
  0x53   :  { %v3926_v28 = vpack.c.bf16 %v180_v26, %v171_v25  ;;  %v170_v31 = vld [vmem:[#allocation5 + $0x120] sm:$0xff]  ;;  %v3958_v32 = vpack.c.bf16 %v182_v30, %v173_v29  ;;  %v179_v33 = vld [vmem:[#allocation5 + $0x168] sm:$0xff]  ;;  %v181_v35 = vld [vmem:[#allocation5 + $0x178] sm:$0xff] }
  0x54   :  { %v3928_v36 = vpack.c.bf16 %v179_v33, %v170_v31  ;;  %v3960_v37 = vpack.c.bf16 %v181_v35, %v172_v34  ;;  %v189_v46 = vld [vmem:[#allocation5 + $0x1b8] sm:$0xff]  ;;  %v198_v47 = vld [vmem:[#allocation5 + $0x200] sm:$0xff]  ;;  %v191_v48 = vld [vmem:[#allocation5 + $0x1c8] sm:$0xff] }
  0x55   :  { %3925 = vmatpush1.bf16.msra.mxu0 %v3924_v23  ;;  %3957 = vmatpush1.bf16.msra.mxu1 %v3956_v27  ;;  %v3930_v49 = vpack.c.bf16 %v198_v47, %v189_v46  ;;  %v200_v50 = vld [vmem:[#allocation5 + $0x210] sm:$0xff]  ;;  %v197_v52 = vld [vmem:[#allocation5 + $0x1f8] sm:$0xff]  ;;  %v190_v55 = vld [vmem:[#allocation5 + $0x1c0] sm:$0xff] }
  0x56   :  { %3927 = vmatprep.subr.bf16.mxu0 %v3926_v28  ;;  %3959 = vmatprep.subr.bf16.mxu1 %v3958_v32  ;;  %v188_v51 = vld [vmem:[#allocation5 + $0x1b0] sm:$0xff]  ;;  %v3962_v53 = vpack.c.bf16 %v200_v50, %v191_v48  ;;  %v199_v56 = vld [vmem:[#allocation5 + $0x208] sm:$0xff]  ;;  %v209_v60 = vld [vmem:[#allocation5 + $0x258] sm:$0xff]  ;;  %v4393_v50 = vmov 0.0  }
  0x57   :  { %v3932_v54 = vpack.c.bf16 %v197_v52, %v188_v51  ;;  %v3964_v57 = vpack.c.bf16 %v199_v56, %v190_v55  ;;  %v207_v58 = vld [vmem:[#allocation5 + $0x248] sm:$0xff]  ;;  %v216_v59 = vld [vmem:[#allocation5 + $0x290] sm:$0xff]  ;;  %v218_v62 = vld [vmem:[#allocation5 + $0x2a0] sm:$0xff]  ;;  %342 = vmatprep.mubr.f32.mxu0 %v4393_v50  ;;  %419 = vmatprep.mubr.f32.mxu1 %v4393_v50 }
  0x58   :  { %v3934_v61 = vpack.c.bf16 %v216_v59, %v207_v58  ;;  %v206_v63 = vld [vmem:[#allocation5 + $0x240] sm:$0xff]  ;;  %v208_v3 = vld [vmem:[#allocation5 + $0x250] sm:$0xff]  ;;  %v217_v4 = vld [vmem:[#allocation5 + $0x298] sm:$0xff] }
  0x59   :  { %3929 = vmatpush1.bf16.msra.mxu0 %v3928_v36  ;;  %3961 = vmatpush1.bf16.msra.mxu1 %v3960_v37  ;;  %v3968_v5 = vpack.c.bf16 %v217_v4, %v208_v3  ;;  %v225_v6 = vld [vmem:[#allocation5 + $0x2d8] sm:$0xff]  ;;  %v234_v7 = vld [vmem:[#allocation5 + $0x320] sm:$0xff]  ;;  %v227_v8 = vld [vmem:[#allocation5 + $0x2e8] sm:$0xff] }
  0x5a   :  { %3931 = vmatprep.subr.bf16.mxu0 %v3930_v49  ;;  %3963 = vmatprep.subr.bf16.mxu1 %v3962_v53  ;;  %v3938_v9 = vpack.c.bf16 %v234_v7, %v225_v6  ;;  %v236_v10 = vld [vmem:[#allocation5 + $0x330] sm:$0xff]  ;;  %v233_v12 = vld [vmem:[#allocation5 + $0x318] sm:$0xff]  ;;  %v226_v15 = vld [vmem:[#allocation5 + $0x2e0] sm:$0xff] }
  0x5b   :  { %v224_v11 = vld [vmem:[#allocation5 + $0x2d0] sm:$0xff]  ;;  %v3970_v13 = vpack.c.bf16 %v236_v10, %v227_v8  ;;  %v235_v16 = vld [vmem:[#allocation5 + $0x328] sm:$0xff]  ;;  %v245_v20 = vld [vmem:[#allocation5 + $0x378] sm:$0xff] }
  0x5c   :  { %v3940_v14 = vpack.c.bf16 %v233_v12, %v224_v11  ;;  %v3972_v17 = vpack.c.bf16 %v235_v16, %v226_v15  ;;  %v243_v18 = vld [vmem:[#allocation5 + $0x368] sm:$0xff]  ;;  %v252_v19 = vld [vmem:[#allocation5 + $0x3b0] sm:$0xff]  ;;  %v254_v22 = vld [vmem:[#allocation5 + $0x3c0] sm:$0xff] }
  0x5d   :  { %3933 = vmatpush1.bf16.msra.mxu0 %v3932_v54  ;;  %3965 = vmatpush1.bf16.msra.mxu1 %v3964_v57  ;;  %v3942_v21 = vpack.c.bf16 %v252_v19, %v243_v18  ;;  %v242_v23 = vld [vmem:[#allocation5 + $0x360] sm:$0xff]  ;;  %v251_v24 = vld [vmem:[#allocation5 + $0x3a8] sm:$0xff]  ;;  %v3974_v25 = vpack.c.bf16 %v254_v22, %v245_v20  ;;  %v244_v27 = vld [vmem:[#allocation5 + $0x370] sm:$0xff] }
  0x5e   :  { %3935 = vmatprep.subr.bf16.mxu0 %v3934_v61  ;;  %v3944_v26 = vpack.c.bf16 %v251_v24, %v242_v23  ;;  %v253_v28 = vld [vmem:[#allocation5 + $0x3b8] sm:$0xff]  ;;  %v270_v31 = vld [vmem:[#allocation5 + $0x440] sm:$0xff]  ;;  %v263_v32 = vld [vmem:[#allocation5 + $0x408] sm:$0xff] }
  0x5f   :  { %v3976_v29 = vpack.c.bf16 %v253_v28, %v244_v27  ;;  %v261_v30 = vld [vmem:[#allocation5 + $0x3f8] sm:$0xff]  ;;  %v272_v34 = vld [vmem:[#allocation5 + $0x450] sm:$0xff]  ;;  %v150_v48 = vld [vmem:[#allocation5 + $0x80] sm:$0xff] }
  0x60   :  { %v3946_v33 = vpack.c.bf16 %v270_v31, %v261_v30  ;;  %v260_v35 = vld [vmem:[#allocation5 + $0x3f0] sm:$0xff]  ;;  %v269_v36 = vld [vmem:[#allocation5 + $0x438] sm:$0xff]  ;;  %v3978_v37 = vpack.c.bf16 %v272_v34, %v263_v32  ;;  %v138_v59 = vld [vmem:[#allocation5 + $0x20] sm:$0xff] }
  0x61   :  { %v141_v46 = vld [vmem:[#allocation5 + $0x38] sm:$0xff]  ;;  %v3648_v58 = vld [vmem:[%s4978_s2] ss:$0 sm:$0xff]  ;;  %v147_v61 = vld [vmem:[#allocation5 + $0x68] sm:$0xff]  ;;  %s4397_s2 = smov 96  }
  0x62   :  { %v4014_v49 = vpack.c.bf16 %v150_v48, %v141_v46  ;;  %v166_v3 = vld [vmem:[#allocation5 + $0x100] sm:$0xff]  ;;  %v159_v4 = vld [vmem:[#allocation5 + $0xc8] sm:$0xff]  ;;  %v3984_v7 = vpack.c.bf16 %v147_v61, %v138_v59  ;;  %v165_v10 = vld [vmem:[#allocation5 + $0xf8] sm:$0xff] }
  0x63   :  { %v158_v12 = vld [vmem:[#allocation5 + $0xc0] sm:$0xff]  ;;  %v177_v18 = vld [vmem:[#allocation5 + $0x158] sm:$0xff]  ;;  %v183_v23 = vld [vmem:[#allocation5 + $0x188] sm:$0xff] }
  0x64   :  { %v186_v19 = vld [vmem:[#allocation5 + $0x1a0] sm:$0xff]  ;;  %v176_v27 = vld [vmem:[#allocation5 + $0x150] sm:$0xff]  ;;  %v185_v28 = vld [vmem:[#allocation5 + $0x198] sm:$0xff] }
  0x65   :  { %v202_v30 = vld [vmem:[#allocation5 + $0x220] sm:$0xff]  ;;  %v195_v31 = vld [vmem:[#allocation5 + $0x1e8] sm:$0xff]  ;;  %v204_v32 = vld [vmem:[#allocation5 + $0x230] sm:$0xff]  ;;  %v4024_v34 = vpack.c.bf16 %v185_v28, %v176_v27 }
  0x66   :  { %v222_v46 = vld [vmem:[#allocation5 + $0x2c0] sm:$0xff]  ;;  %v240_v59 = vld [vmem:[#allocation5 + $0x350] sm:$0xff]  ;;  %v275_v27 = vld [vmem:[#allocation5 + $0x468] sm:$0xff] }
  0x67   :  { %v142_v28 = vld [vmem:[#allocation5 + $0x40] sm:$0xff] }
  0xd9   :  { %v96_v38 = vpop.xlane.xlu0 %95 }
  0xda   :  { %v100_v39 = vmul.f32 0.0078125, %v96_v38  ;;  %v3948_v38 = vpack.c.bf16 %v269_v36, %v260_v35  ;;  %v192_v35 = vld [vmem:[#allocation5 + $0x1d0] sm:$0xff]  ;;  %v201_v36 = vld [vmem:[#allocation5 + $0x218] sm:$0xff] }
  0xdc   :  { %v4510_v40 = vsub.f32 %v91_v0, %v100_v39  ;;  %v215_v0 = vld [vmem:[#allocation5 + $0x288] sm:$0xff]  ;;  %v262_v39 = vld [vmem:[#allocation5 + $0x400] sm:$0xff] }
  0xdd   :  { %v98_v41 = vpop.xlane.xlu0 %97  ;;  %v3936_v2 = vpack.c.bf16 %v215_v0, %v206_v63  ;;  %v149_v63 = vld [vmem:[#allocation5 + $0x78] sm:$0xff]  ;;  %v3649_v0 = vld [vmem:[%s4979_s3] ss:$0 sm:$0xff]  ;;  %s4398_s3 = smov 64  }
  0xde   :  { %v101_v42 = vmul.f32 0.0078125, %v98_v41  ;;  %v104_v43 = vmul.f32 %v4510_v40, %v4510_v40  ;;  %v271_v41 = vld [vmem:[#allocation5 + $0x448] sm:$0xff] }
  0xdf   :  { %3937 = vmatpush1.bf16.msra.mxu0 %v3936_v2 }
  0xe0   :  { %v4514_v44 = vsub.f32 %v92_v1, %v101_v42  ;;  %106 = vadd.xlane.f32.xlu1 %v104_v43  ;;  %v3966_v1 = vpack.c.bf16 %v218_v62, %v209_v60  ;;  %3939 = vmatprep.subr.bf16.mxu0 %v3938_v9  ;;  %v3980_v42 = vpack.c.bf16 %v271_v41, %v262_v39  ;;  %v139_v43 = vld [vmem:[#allocation5 + $0x28] sm:$0xff]  ;;  %v140_v62 = vld [vmem:[#allocation5 + $0x30] sm:$0xff]  ;;  %v194_v39 = vld [vmem:[#allocation5 + $0x1e0] sm:$0xff] }
  0xe1   :  { %v4016_v8 = vpack.c.bf16 %v149_v63, %v140_v62  ;;  %v156_v9 = vld [vmem:[#allocation5 + $0xb0] sm:$0xff]  ;;  %v203_v41 = vld [vmem:[#allocation5 + $0x228] sm:$0xff]  ;;  %v237_v63 = vld [vmem:[#allocation5 + $0x338] sm:$0xff] }
  0xe2   :  { %v105_v45 = vmul.f32 %v4514_v44, %v4514_v44  ;;  %3967 = vmatprep.subr.bf16.mxu1 %v3966_v1  ;;  %v157_v1 = vld [vmem:[#allocation5 + $0xb8] sm:$0xff]  ;;  %v4028_v48 = vpack.c.bf16 %v203_v41, %v194_v39  ;;  %v228_v62 = vld [vmem:[#allocation5 + $0x2f0] sm:$0xff] }
  0xe3   :  { %3969 = vmatpush1.bf16.msra.mxu1 %v3968_v5  ;;  %3941 = vmatpush1.bf16.msra.mxu0 %v3940_v14  ;;  %v168_v5 = vld [vmem:[#allocation5 + $0x110] sm:$0xff]  ;;  %v175_v14 = vld [vmem:[#allocation5 + $0x148] sm:$0xff]  ;;  %v3986_v15 = vpack.c.bf16 %v166_v3, %v157_v1  ;;  %v205_v41 = vld [vmem:[#allocation5 + $0x238] sm:$0xff] }
  0xe4   :  { %108 = vadd.xlane.f32.xlu1 %v105_v45  ;;  %3971 = vmatprep.subr.bf16.mxu1 %v3970_v13  ;;  %v148_v45 = vld [vmem:[#allocation5 + $0x70] sm:$0xff]  ;;  %v167_v13 = vld [vmem:[#allocation5 + $0x108] sm:$0xff]  ;;  %v4018_v16 = vpack.c.bf16 %v168_v5, %v159_v4 }
  0xe5   :  { %3943 = vmatprep.subr.bf16.mxu0 %v3942_v21  ;;  %v3982_v47 = vpack.c.bf16 %v148_v45, %v139_v43  ;;  %v3988_v21 = vpack.c.bf16 %v165_v10, %v156_v9  ;;  %v4020_v22 = vpack.c.bf16 %v167_v13, %v158_v12  ;;  %v220_v43 = vld [vmem:[#allocation5 + $0x2b0] sm:$0xff]  ;;  %v213_v45 = vld [vmem:[#allocation5 + $0x278] sm:$0xff]  ;;  %v239_v3 = vld [vmem:[#allocation5 + $0x348] sm:$0xff] }
  0xe6   :  { %v247_v4 = vld [vmem:[#allocation5 + $0x388] sm:$0xff]  ;;  %v256_v5 = vld [vmem:[#allocation5 + $0x3d0] sm:$0xff]  ;;  %v246_v10 = vld [vmem:[#allocation5 + $0x380] sm:$0xff] }
  0xe7   :  { %3973 = vmatpush1.bf16.msra.mxu1 %v3972_v17  ;;  %3945 = vmatpush1.bf16.msra.mxu0 %v3944_v26  ;;  %v184_v17 = vld [vmem:[#allocation5 + $0x190] sm:$0xff]  ;;  %v4022_v26 = vpack.c.bf16 %v186_v19, %v177_v18  ;;  %v4006_v12 = vpack.c.bf16 %v256_v5, %v247_v4  ;;  %v267_v18 = vld [vmem:[#allocation5 + $0x428] sm:$0xff] }
  0xe8   :  { %3975 = vmatprep.subr.bf16.mxu1 %v3974_v25  ;;  %3947 = vmatprep.subr.bf16.mxu0 %v3946_v33  ;;  %v3990_v25 = vpack.c.bf16 %v184_v17, %v175_v14  ;;  %v248_v14 = vld [vmem:[#allocation5 + $0x390] sm:$0xff]  ;;  %v274_v17 = vld [vmem:[#allocation5 + $0x460] sm:$0xff] }
  0xe9   :  { %v276_v19 = vld [vmem:[#allocation5 + $0x470] sm:$0xff] }
  0xea   :  { %v196_v39 = vld [vmem:[#allocation5 + $0x1f0] sm:$0xff] }
  0xeb   :  { %3977 = vmatpush1.bf16.msra.mxu1 %v3976_v29  ;;  %3949 = vmatpush1.bf16.msra.mxu0 %v3948_v38  ;;  %v193_v29 = vld [vmem:[#allocation5 + $0x1d8] sm:$0xff]  ;;  %v4026_v38 = vpack.c.bf16 %v204_v32, %v195_v31 }
  0xec   :  { %3979 = vmatprep.subr.bf16.mxu1 %v3978_v37  ;;  %3983 = vmatprep.subr.bf16.mxu0 %v3982_v47  ;;  %v3994_v37 = vpack.c.bf16 %v202_v30, %v193_v29  ;;  %v3996_v47 = vpack.c.bf16 %v201_v36, %v192_v35  ;;  %v151_v29 = vld [vmem:[#allocation5 + $0x88] sm:$0xff]  ;;  %v178_v36 = vld [vmem:[#allocation5 + $0x160] sm:$0xff] }
  0xed   :  { %v4046_v32 = vpack.c.bf16 %v151_v29, %v142_v28 }
  0xef   :  { %3981 = vmatpush1.bf16.msra.mxu1 %v3980_v42  ;;  %v211_v42 = vld [vmem:[#allocation5 + $0x268] sm:$0xff] }
  0xf0   :  { %4015 = vmatprep.subr.bf16.mxu1 %v4014_v49  ;;  %v210_v49 = vld [vmem:[#allocation5 + $0x260] sm:$0xff] }
 0x16d   :  { %v107_v51 = vpop.xlane.xlu1 %106 }
 0x16e   :  { %v110_v52 = vmul.f32 0.0078125, %v107_v51  ;;  %v219_v51 = vld [vmem:[#allocation5 + $0x2a8] sm:$0xff] }
 0x170   :  { %v112_v53 = vadd.f32 1e-05, %v110_v52  ;;  %v3998_v52 = vpack.c.bf16 %v220_v43, %v211_v42  ;;  %v4058_v42 = vpack.c.bf16 %v205_v41, %v196_v39  ;;  %v214_v43 = vld [vmem:[#allocation5 + $0x280] sm:$0xff] }
 0x171   :  { %v109_v54 = vpop.xlane.xlu1 %108 }
 0x172   :  { %4223 = vrsqrt.f32 %v112_v53  ;;  %v111_v55 = vmul.f32 0.0078125, %v109_v54  ;;  %v4030_v53 = vpack.c.bf16 %v222_v46, %v213_v45  ;;  %v212_v54 = vld [vmem:[#allocation5 + $0x270] sm:$0xff]  ;;  %v223_v45 = vld [vmem:[#allocation5 + $0x2c8] sm:$0xff] }
 0x173   :  { %v4062_v46 = vpack.c.bf16 %v223_v45, %v214_v43 }
 0x174   :  { %v113_v56 = vadd.f32 1e-05, %v111_v55  ;;  %v221_v55 = vld [vmem:[#allocation5 + $0x2b8] sm:$0xff] }
 0x175   :  { %v4032_v61 = vpack.c.bf16 %v221_v55, %v212_v54  ;;  %v268_v54 = vld [vmem:[#allocation5 + $0x430] sm:$0xff]  ;;  %v277_v55 = vld [vmem:[#allocation5 + $0x478] sm:$0xff] }
 0x176   :  { %4225 = vrsqrt.f32 %v113_v56  ;;  %v229_v56 = vld [vmem:[#allocation5 + $0x2f8] sm:$0xff] }
 0x17c   :  { %v4224_v57 = vpop.eup %4223 }
 0x17d   :  { %v116_v60 = vmul.f32 %v4224_v57, %v4510_v40  ;;  %v238_v57 = vld [vmem:[#allocation5 + $0x340] sm:$0xff] }
 0x17f   :  { %v124_v2 = vmul.f32 %v3648_v58, %v116_v60  ;;  %v4000_v60 = vpack.c.bf16 %v219_v51, %v210_v49  ;;  %v250_v51 = vld [vmem:[#allocation5 + $0x3a0] sm:$0xff] }
 0x180   :  { %v4226_v6 = vpop.eup %4225 }
 0x181   :  { %v117_v11 = vmul.f32 %v4226_v6, %v4514_v44  ;;  %v4528_v40 = vadd.f32 %v3649_v0, %v124_v2  ;;  %v174_v44 = vld [vmem:[#allocation5 + $0x140] sm:$0xff]  ;;  %v249_v6 = vld [vmem:[#allocation5 + $0x398] sm:$0xff] }
 0x182   :  { %v3992_v33 = vpack.c.bf16 %v183_v23, %v174_v44  ;;  %v230_v2 = vld [vmem:[#allocation5 + $0x300] sm:$0xff]  ;;  %v4042_v23 = vpack.c.bf16 %v276_v19, %v267_v18 }
 0x183   :  { %343 = vmatmul.mubr.f32.vlgmr.msra.gmra.mrb[0].mxu0 %v4528_v40  ;;  %420 = vmatmul.mubr.f32.vlgmr.msra.gmra.mrb[0].mxu1 %v4528_v40  ;;  %v125_v20 = vmul.f32 %v3648_v58, %v117_v11  ;;  %v231_v58 = vld [vmem:[#allocation5 + $0x308] sm:$0xff]  ;;  %v4036_v9 = vpack.c.bf16 %v239_v3, %v230_v2 }
 0x184   :  { %3985 = vmatpush1.bf16.msra.mxu0 %v3984_v7  ;;  %4017 = vmatpush1.bf16.msra.mxu1 %v4016_v8  ;;  %v4034_v1 = vpack.c.bf16 %v240_v59, %v231_v58  ;;  %v258_v7 = vld [vmem:[#allocation5 + $0x3e0] sm:$0xff]  ;;  %v4004_v8 = vpack.c.bf16 %v237_v63, %v228_v62  ;;  %v255_v11 = vld [vmem:[#allocation5 + $0x3c8] sm:$0xff]  ;;  %v666_v58 = vlaneseq }
 0x185   :  { %348 = vmatprep.mubr.f32.mxu0 %v4393_v50  ;;  %425 = vmatprep.mubr.f32.mxu1 %v4393_v50  ;;  %v4534_v24 = vadd.f32 %v3649_v0, %v125_v20  ;;  %v4002_v0 = vpack.c.bf16 %v238_v57, %v229_v56  ;;  %v4038_v13 = vpack.c.bf16 %v258_v7, %v249_v6  ;;  %v4395_v56 = vmov 1983009808  }
 0x186   :  { %3987 = vmatprep.subr.bf16.mxu0 %v3986_v15  ;;  %4019 = vmatprep.subr.bf16.mxu1 %v4018_v16  ;;  %v257_v15 = vld [vmem:[#allocation5 + $0x3d8] sm:$0xff]  ;;  %v4008_v20 = vpack.c.bf16 %v255_v11, %v246_v10  ;;  %v664_v57 = vunpack.c.l.s4 %v4395_v56 }
 0x187   :  { %349 = vmatmul.mubr.f32.gmra.mrb[2].mxu0 %v4534_v24  ;;  %426 = vmatmul.mubr.f32.gmra.mrb[2].mxu1 %v4534_v24  ;;  %v265_v16 = vld [vmem:[#allocation5 + $0x418] sm:$0xff] }
 0x188   :  { %3989 = vmatpush1.bf16.msra.mxu0 %v3988_v21  ;;  %4021 = vmatpush1.bf16.msra.mxu1 %v4020_v22  ;;  %v4040_v21 = vpack.c.bf16 %v257_v15, %v248_v14  ;;  %v264_v22 = vld [vmem:[#allocation5 + $0x410] sm:$0xff]  ;;  %v4010_v44 = vpack.c.bf16 %v274_v17, %v265_v16  ;;  %v665_v59 = vunpack.c.0.s8 %v664_v57 }
 0x189   :  { %3991 = vmatprep.subr.bf16.mxu0 %v3990_v25  ;;  %4023 = vmatprep.subr.bf16.mxu1 %v4022_v26  ;;  %v273_v25 = vld [vmem:[#allocation5 + $0x458] sm:$0xff]  ;;  %v266_v26 = vld [vmem:[#allocation5 + $0x420] sm:$0xff] }
 0x18a   :  { %496 = vmatprep.mubr.f32.mxu0 %v4393_v50  ;;  %573 = vmatprep.mubr.f32.mxu1 %v4393_v50  ;;  %v4012_v30 = vpack.c.bf16 %v273_v25, %v264_v22  ;;  %v4044_v31 = vpack.c.bf16 %v275_v27, %v266_v26 }
 0x18c   :  { %3993 = vmatpush1.bf16.msra.mxu0 %v3992_v33  ;;  %4025 = vmatpush1.bf16.msra.mxu1 %v4024_v34  ;;  %v160_v33 = vld [vmem:[#allocation5 + $0xd0] sm:$0xff]  ;;  %v169_v34 = vld [vmem:[#allocation5 + $0x118] sm:$0xff] }
 0x18d   :  { %3995 = vmatprep.subr.bf16.mxu0 %v3994_v37  ;;  %4027 = vmatprep.subr.bf16.mxu1 %v4026_v38  ;;  %v4050_v35 = vpack.c.bf16 %v169_v34, %v160_v33  ;;  %v187_v37 = vld [vmem:[#allocation5 + $0x1a8] sm:$0xff] }
 0x18e   :  { %v4054_v38 = vpack.c.bf16 %v187_v37, %v178_v36 }
 0x190   :  { %3997 = vmatpush1.bf16.msra.mxu0 %v3996_v47  ;;  %4029 = vmatpush1.bf16.msra.mxu1 %v4028_v48  ;;  %v232_v47 = vld [vmem:[#allocation5 + $0x310] sm:$0xff]  ;;  %v241_v48 = vld [vmem:[#allocation5 + $0x358] sm:$0xff] }
 0x191   :  { %3999 = vmatprep.subr.bf16.mxu0 %v3998_v52  ;;  %4031 = vmatprep.subr.bf16.mxu1 %v4030_v53  ;;  %v4066_v49 = vpack.c.bf16 %v241_v48, %v232_v47  ;;  %v259_v52 = vld [vmem:[#allocation5 + $0x3e8] sm:$0xff] }
 0x192   :  { %v4070_v53 = vpack.c.bf16 %v259_v52, %v250_v51 }
 0x194   :  { %4001 = vmatpush1.bf16.msra.mxu0 %v4000_v60  ;;  %4033 = vmatpush1.bf16.msra.mxu1 %v4032_v61  ;;  %v4555_v60 = vshrl.u32 %v666_v58, 7  ;;  %v4396_v61 = vmov 1934713408  }
 0x195   :  { %4003 = vmatprep.subr.bf16.mxu0 %v4002_v0  ;;  %4035 = vmatprep.subr.bf16.mxu1 %v4034_v1  ;;  %v696_v62 = vunpack.c.l.s4 %v4396_v61 }
 0x196   :  { %v4558_v63 = vsub.s32 %v665_v59, %v4555_v60 }
 0x197   :  { %v697_v1 = vunpack.c.0.s8 %v696_v62 }
 0x198   :  { %4005 = vmatpush1.bf16.msra.mxu0 %v4004_v8  ;;  %4037 = vmatpush1.bf16.msra.mxu1 %v4036_v9 }
 0x199   :  { %4007 = vmatprep.subr.bf16.mxu0 %v4006_v12  ;;  %4039 = vmatprep.subr.bf16.mxu1 %v4038_v13  ;;  %v4565_v12 = vsub.s32 %v697_v1, %v4555_v60 }
 0x19c   :  { %4009 = vmatpush1.bf16.msra.mxu0 %v4008_v20  ;;  %4041 = vmatpush1.bf16.msra.mxu1 %v4040_v21 }
 0x19d   :  { %4011 = vmatprep.subr.bf16.mxu0 %v4010_v44  ;;  %4043 = vmatprep.subr.bf16.mxu1 %v4042_v23 }
 0x1a0   :  { %4013 = vmatpush1.bf16.msra.mxu0 %v4012_v30  ;;  %4045 = vmatpush1.bf16.msra.mxu1 %v4044_v31 }
 0x1a1   :  { %4047 = vmatprep.subr.bf16.mxu0 %v4046_v32  ;;  %3838 = vmatprep.subr.mxu1 %v4393_v50 }
 0x1a3   :  { %497 = vmatmul.mubr.f32.vlgmr.msra.gmra.mrb[4].mxu0 %v4528_v40  ;;  %574 = vmatmul.mubr.f32.vlgmr.msra.gmra.mrb[4].mxu1 %v4528_v40 }
 0x1a4   :  { %4049 = vmatpush3.bf16.msra.mxu0 %v4046_v32  ;;  %502 = vmatprep.mubr.f32.mxu0 %v4393_v50 }
 0x1a5   :  { %579 = vmatprep.mubr.f32.mxu1 %v4393_v50  ;;  %4051 = vmatprep.subr.bf16.mxu0 %v4050_v35 }
 0x1a7   :  { %503 = vmatmul.mubr.f32.gmra.mrb[6].mxu0 %v4534_v24  ;;  %580 = vmatmul.mubr.f32.gmra.mrb[6].mxu1 %v4534_v24 }
 0x1a8   :  { %4053 = vmatpush3.bf16.msra.mxu0 %v4050_v35  ;;  %3835 = vmatprep.mubr.f32.mxu0 %v4528_v40  ;;  %v4074_v40 = vpack.c.bf16 %v277_v55, %v268_v54 }
 0x1a9   :  { %4055 = vmatprep.subr.bf16.mxu0 %v4054_v38  ;;  %3840 = vmatprep.mubr.msk.f32.mxu1 %vm4394_vm0, %v4393_v50 }
 0x1ac   :  { %4057 = vmatpush3.bf16.msra.mxu0 %v4054_v38 }
 0x1ad   :  { %4059 = vmatprep.subr.bf16.mxu0 %v4058_v42 }
 0x1b0   :  { %4061 = vmatpush3.bf16.msra.mxu0 %v4058_v42 }
 0x1b1   :  { %4063 = vmatprep.subr.bf16.mxu0 %v4062_v46 }
 0x1b4   :  { %4065 = vmatpush3.bf16.msra.mxu0 %v4062_v46 }
 0x1b5   :  { %4067 = vmatprep.subr.bf16.mxu0 %v4066_v49 }
 0x1b8   :  { %4069 = vmatpush3.bf16.msra.mxu0 %v4066_v49 }
 0x1b9   :  { %4071 = vmatprep.subr.bf16.mxu0 %v4070_v53 }
 0x1bc   :  { %4073 = vmatpush3.bf16.msra.mxu0 %v4070_v53 }
 0x1bd   :  { %4075 = vmatprep.subr.bf16.mxu0 %v4074_v40 }
 0x1c0   :  { %4077 = vmatpush3.bf16.msra.mxu0 %v4074_v40 }
 0x1c1   :  { %3873 = vmatprep.subr.mxu0 %v4393_v50 }
 0x1c3   :  { %3836 = vmatmul.mubr.f32.vlgmr.msra.gmra.mrb[8].mxu0 %v4534_v24 }
 0x1c4   :  { %3875 = vmatprep.mubr.msk.f32.mxu0 %vm4394_vm0, %v4393_v50 }
 0x256   :  { %v344_v24 = vpop.f32.mrb[0].mxu0  ;;  %v421_v0 = vpop.f32.mrb[0].mxu1 }
 0x257   :  { %v661_v2 = vcombine.low %v344_v24, %v421_v0  ;;  %v662_v3 = vcombine.high %v344_v24, %v421_v0  ;;  %v346_v4 = vpop.f32.mrb[1].mxu0  ;;  %v423_v5 = vpop.f32.mrb[1].mxu1 }
 0x258   :  { %v677_v6 = vcombine.low %v346_v4, %v423_v5  ;;  %v678_v7 = vcombine.high %v346_v4, %v423_v5 }
 0x259   :  { %v669_v8 = vrot.slane %v661_v2, %v4558_v63  ;;  %v676_v9 = vrot.slane %v662_v3, %v4558_v63 }
 0x25a   :  { %v685_v10 = vrot.slane %v677_v6, %v4558_v63  ;;  %v692_v11 = vrot.slane %v678_v7, %v4558_v63  ;;  %v350_v13 = vpop.f32.mrb[2].mxu0  ;;  %v427_v14 = vpop.f32.mrb[2].mxu1 }
 0x25b   :  { %v729_v15 = vcombine.low %v350_v13, %v427_v14  ;;  %v730_v16 = vcombine.high %v350_v13, %v427_v14  ;;  %v352_v17 = vpop.f32.mrb[3].mxu0  ;;  %v429_v18 = vpop.f32.mrb[3].mxu1 }
 0x25c   :  { %v693_v19 = vcombine.low %v669_v8, %v685_v10  ;;  %v694_v20 = vcombine.high %v669_v8, %v685_v10  ;;  %v709_v21 = vcombine.low %v676_v9, %v692_v11  ;;  %v710_v22 = vcombine.high %v676_v9, %v692_v11 }
 0x25d   :  { %v737_v44 = vrot.slane %v729_v15, %v4558_v63  ;;  %v744_v23 = vrot.slane %v730_v16, %v4558_v63  ;;  %v745_v25 = vcombine.low %v352_v17, %v429_v18  ;;  %v746_v26 = vcombine.high %v352_v17, %v429_v18 }
 0x25e   :  { %v701_v27 = vrot.slane %v693_v19, %v4565_v12  ;;  %v708_v28 = vrot.slane %v694_v20, %v4565_v12  ;;  %v717_v29 = vrot.slane %v709_v21, %v4565_v12  ;;  %v724_v30 = vrot.slane %v710_v22, %v4565_v12 }
 0x25f   :  { %v753_v31 = vrot.slane %v745_v25, %v4558_v63  ;;  %v760_v32 = vrot.slane %v746_v26, %v4558_v63 }
 0x260   :  { %v797_v33 = vcombine.low %v701_v27, %v708_v28  ;;  %v3650_v34 = vcombine.high %v701_v27, %v708_v28  ;;  %v813_v35 = vcombine.low %v717_v29, %v724_v30  ;;  %v3651_v36 = vcombine.high %v717_v29, %v724_v30 }
 0x261   :  { %v761_v37 = vcombine.low %v737_v44, %v753_v31  ;;  %v762_v38 = vcombine.high %v737_v44, %v753_v31  ;;  %v777_v39 = vcombine.low %v744_v23, %v760_v32  ;;  %v778_v41 = vcombine.high %v744_v23, %v760_v32 }
 0x262   :  { %v804_v42 = vrot.slane %v797_v33, %v4558_v63  ;;  %v812_v43 = vrot.slane %v3650_v34, %v4558_v63  ;;  %v820_v45 = vrot.slane %v813_v35, %v4558_v63  ;;  %v828_v46 = vrot.slane %v3651_v36, %v4558_v63 }
 0x263   :  { %v769_v47 = vrot.slane %v761_v37, %v4565_v12  ;;  %v776_v48 = vrot.slane %v762_v38, %v4565_v12  ;;  %v785_v49 = vrot.slane %v777_v39, %v4565_v12  ;;  %v792_v51 = vrot.slane %v778_v41, %v4565_v12 }
 0x264   :  { %v829_v52 = vcombine.low %v804_v42, %v812_v43  ;;  %v845_v53 = vcombine.low %v820_v45, %v828_v46  ;;  %v830_v54 = vcombine.high %v804_v42, %v812_v43  ;;  %v846_v55 = vcombine.high %v820_v45, %v828_v46 }
 0x265   :  { %v865_v40 = vcombine.low %v769_v47, %v776_v48  ;;  %v3652_v56 = vcombine.high %v769_v47, %v776_v48  ;;  %v881_v57 = vcombine.low %v785_v49, %v792_v51  ;;  %v3653_v59 = vcombine.high %v785_v49, %v792_v51 }
 0x266   :  { %v4584_v61 = vrot.slane %v829_v52, %v4565_v12  ;;  %v4587_v62 = vrot.slane %v845_v53, %v4565_v12  ;;  %v4590_v24 = vrot.slane %v830_v54, %v4565_v12  ;;  %v4593_v0 = vrot.slane %v846_v55, %v4565_v12 }
 0x267   :  { %v872_v1 = vrot.slane %v865_v40, %v4558_v63  ;;  %v880_v2 = vrot.slane %v3652_v56, %v4558_v63  ;;  %v888_v3 = vrot.slane %v881_v57, %v4558_v63  ;;  %v896_v4 = vrot.slane %v3653_v59, %v4558_v63 }
 0x268   :  { %v861_v5 = vcombine.low %v4584_v61, %v4587_v62  ;;  %v862_v6 = vcombine.high %v4584_v61, %v4587_v62  ;;  %v863_v7 = vcombine.low %v4590_v24, %v4593_v0  ;;  %v864_v8 = vcombine.high %v4590_v24, %v4593_v0 }
 0x269   :  { %v897_v9 = vcombine.low %v872_v1, %v880_v2  ;;  %v913_v10 = vcombine.low %v888_v3, %v896_v4  ;;  %v898_v11 = vcombine.high %v872_v1, %v880_v2  ;;  %v914_v13 = vcombine.high %v888_v3, %v896_v4 }
 0x26b   :  { %v4608_v14 = vrot.slane %v897_v9, %v4565_v12  ;;  %v4611_v15 = vrot.slane %v913_v10, %v4565_v12  ;;  %v4614_v16 = vrot.slane %v898_v11, %v4565_v12  ;;  %v4617_v17 = vrot.slane %v914_v13, %v4565_v12 }
 0x26d   :  { %v929_v18 = vcombine.low %v4608_v14, %v4611_v15  ;;  %v932_v19 = vcombine.high %v4614_v16, %v4617_v17  ;;  %v930_v20 = vcombine.high %v4608_v14, %v4611_v15  ;;  %v931_v21 = vcombine.low %v4614_v16, %v4617_v17 }
 0x276   :  { %v498_v22 = vpop.f32.mrb[4].mxu0  ;;  %v575_v44 = vpop.f32.mrb[4].mxu1 }
 0x277   :  { %v933_v23 = vcombine.low %v498_v22, %v575_v44  ;;  %v934_v25 = vcombine.high %v498_v22, %v575_v44  ;;  %v500_v26 = vpop.f32.mrb[5].mxu0  ;;  %v577_v27 = vpop.f32.mrb[5].mxu1 }
 0x278   :  { %v949_v28 = vcombine.low %v500_v26, %v577_v27  ;;  %v950_v29 = vcombine.high %v500_v26, %v577_v27 }
 0x279   :  { %v941_v30 = vrot.slane %v933_v23, %v4558_v63  ;;  %v948_v31 = vrot.slane %v934_v25, %v4558_v63 }
 0x27a   :  { %v957_v32 = vrot.slane %v949_v28, %v4558_v63  ;;  %v964_v33 = vrot.slane %v950_v29, %v4558_v63  ;;  %v504_v34 = vpop.f32.mrb[6].mxu0  ;;  %v581_v35 = vpop.f32.mrb[6].mxu1 }
 0x27b   :  { %v1001_v36 = vcombine.low %v504_v34, %v581_v35  ;;  %v1002_v37 = vcombine.high %v504_v34, %v581_v35  ;;  %v506_v38 = vpop.f32.mrb[7].mxu0  ;;  %v583_v39 = vpop.f32.mrb[7].mxu1 }
 0x27c   :  { %v965_v41 = vcombine.low %v941_v30, %v957_v32  ;;  %v966_v42 = vcombine.high %v941_v30, %v957_v32  ;;  %v981_v43 = vcombine.low %v948_v31, %v964_v33  ;;  %v982_v45 = vcombine.high %v948_v31, %v964_v33 }
 0x27d   :  { %v1009_v46 = vrot.slane %v1001_v36, %v4558_v63  ;;  %v1016_v47 = vrot.slane %v1002_v37, %v4558_v63  ;;  %v1017_v48 = vcombine.low %v506_v38, %v583_v39  ;;  %v1018_v49 = vcombine.high %v506_v38, %v583_v39 }
 0x27e   :  { %v973_v51 = vrot.slane %v965_v41, %v4565_v12  ;;  %v980_v52 = vrot.slane %v966_v42, %v4565_v12  ;;  %v989_v53 = vrot.slane %v981_v43, %v4565_v12  ;;  %v996_v54 = vrot.slane %v982_v45, %v4565_v12 }
 0x27f   :  { %v1025_v55 = vrot.slane %v1017_v48, %v4558_v63  ;;  %v1032_v40 = vrot.slane %v1018_v49, %v4558_v63 }
 0x280   :  { %v1069_v56 = vcombine.low %v973_v51, %v980_v52  ;;  %v3654_v57 = vcombine.high %v973_v51, %v980_v52  ;;  %v1085_v59 = vcombine.low %v989_v53, %v996_v54  ;;  %v3655_v1 = vcombine.high %v989_v53, %v996_v54 }
 0x281   :  { %v1033_v2 = vcombine.low %v1009_v46, %v1025_v55  ;;  %v1034_v3 = vcombine.high %v1009_v46, %v1025_v55  ;;  %v1049_v4 = vcombine.low %v1016_v47, %v1032_v40  ;;  %v1050_v9 = vcombine.high %v1016_v47, %v1032_v40 }
 0x282   :  { %v1076_v10 = vrot.slane %v1069_v56, %v4558_v63  ;;  %v1084_v11 = vrot.slane %v3654_v57, %v4558_v63  ;;  %v1092_v13 = vrot.slane %v1085_v59, %v4558_v63  ;;  %v1100_v22 = vrot.slane %v3655_v1, %v4558_v63 }
 0x283   :  { %v1041_v44 = vrot.slane %v1033_v2, %v4565_v12  ;;  %v1048_v23 = vrot.slane %v1034_v3, %v4565_v12  ;;  %v1057_v25 = vrot.slane %v1049_v4, %v4565_v12  ;;  %v1064_v26 = vrot.slane %v1050_v9, %v4565_v12 }
 0x284   :  { %v1101_v27 = vcombine.low %v1076_v10, %v1084_v11  ;;  %v1117_v28 = vcombine.low %v1092_v13, %v1100_v22  ;;  %v1102_v29 = vcombine.high %v1076_v10, %v1084_v11  ;;  %v1118_v30 = vcombine.high %v1092_v13, %v1100_v22 }
 0x285   :  { %v1137_v31 = vcombine.low %v1041_v44, %v1048_v23  ;;  %v3656_v32 = vcombine.high %v1041_v44, %v1048_v23  ;;  %v1153_v33 = vcombine.low %v1057_v25, %v1064_v26  ;;  %v3657_v34 = vcombine.high %v1057_v25, %v1064_v26 }
 0x286   :  { %v1109_v35 = vrot.slane %v1101_v27, %v4565_v12  ;;  %v1125_v36 = vrot.slane %v1117_v28, %v4565_v12  ;;  %v1116_v37 = vrot.slane %v1102_v29, %v4565_v12  ;;  %v1132_v38 = vrot.slane %v1118_v30, %v4565_v12 }
 0x287   :  { %v1144_v39 = vrot.slane %v1137_v31, %v4558_v63  ;;  %v1152_v41 = vrot.slane %v3656_v32, %v4558_v63  ;;  %v1160_v42 = vrot.slane %v1153_v33, %v4558_v63  ;;  %v1168_v43 = vrot.slane %v3657_v34, %v4558_v63 }
 0x288   :  { %v1133_v45 = vcombine.low %v1109_v35, %v1125_v36  ;;  %v1134_v46 = vcombine.high %v1109_v35, %v1125_v36  ;;  %v1135_v47 = vcombine.low %v1116_v37, %v1132_v38  ;;  %v1136_v48 = vcombine.high %v1116_v37, %v1132_v38 }
 0x289   :  { %v1169_v49 = vcombine.low %v1144_v39, %v1152_v41  ;;  %v1185_v51 = vcombine.low %v1160_v42, %v1168_v43  ;;  %v1170_v52 = vcombine.high %v1144_v39, %v1152_v41  ;;  %v1186_v53 = vcombine.high %v1160_v42, %v1168_v43 }
 0x28a   :  { %3839 = vmatpush3.xpose.msra.mxu1 %v1133_v45 }
 0x28b   :  { %3843 = vmatprep.subr.mxu1 %v4393_v50  ;;  %v1177_v54 = vrot.slane %v1169_v49, %v4565_v12  ;;  %v1193_v55 = vrot.slane %v1185_v51, %v4565_v12  ;;  %v1184_v40 = vrot.slane %v1170_v52, %v4565_v12  ;;  %v1200_v56 = vrot.slane %v1186_v53, %v4565_v12 }
 0x28d   :  { %3841 = vmatmul.mubr.f32.vlgmr.msra.gmra.mrb[8].mxu1 %v861_v5  ;;  %v1201_v57 = vcombine.low %v1177_v54, %v1193_v55  ;;  %v1204_v59 = vcombine.high %v1184_v40, %v1200_v56  ;;  %v1202_v1 = vcombine.high %v1177_v54, %v1193_v55  ;;  %v1203_v2 = vcombine.low %v1184_v40, %v1200_v56 }
 0x28e   :  { %3845 = vmatprep.mubr.msk.f32.mxu1 %vm4394_vm0, %v4393_v50 }
 0x28f   :  { %3844 = vmatpush3.xpose.msra.mxu1 %v1201_v57  ;;  %3874 = vmatpush3.xpose.msra.mxu0 %v1204_v59 }
 0x290   :  { %3848 = vmatprep.subr.mxu1 %v4393_v50  ;;  %3883 = vmatprep.subr.mxu0 %v4393_v50 }
 0x292   :  { %3846 = vmatmul.mubr.f32.vlgmr.msra.gmra.mrb[10].mxu1 %v929_v18  ;;  %3876 = vmatmul.mubr.f32.vlgmr.msra.gmra.mrb[10].mxu0 %v932_v19 }
 0x293   :  { %3849 = vmatpush3.xpose.msra.mxu1 %v1134_v46  ;;  %3850 = vmatprep.mubr.msk.f32.mxu1 %vm4394_vm0, %v4393_v50 }
 0x294   :  { %3853 = vmatprep.subr.mxu1 %v4393_v50  ;;  %3885 = vmatprep.mubr.msk.f32.mxu0 %vm4394_vm0, %v4393_v50 }
 0x296   :  { %3851 = vmatmul.mubr.f32.vlgmr.msra.gmra.mrb[12].mxu1 %v862_v6  ;;  %v3837_v5 = vpop.f32.mrb[8].mxu0 }
 0x297   :  { %3854 = vmatpush3.xpose.msra.mxu1 %v1202_v1  ;;  %1209 = vrot.lane.b32.xlu1 %v3837_v5, %s4397_s2  ;;  %v652_v18 = vpop.f32.mrb[9].mxu0 }
 0x298   :  { %3855 = vmatprep.mubr.msk.f32.mxu1 %vm4394_vm0, %v4393_v50  ;;  %1207 = vrot.lane.b32.xlu0 %v652_v18, %s4397_s2 }
 0x299   :  { %3858 = vmatprep.subr.mxu1 %v4393_v50 }
 0x29a   :  { %3856 = vmatmul.mubr.f32.vlgmr.msra.gmra.mrb[14].mxu1 %v930_v20 }
 0x29b   :  { %3859 = vmatpush3.xpose.msra.mxu1 %v1135_v47  ;;  %1213 = vrot.lane.b32.xlu1 %v652_v18, %s4398_s3 }
 0x29c   :  { %3860 = vmatprep.mubr.msk.f32.mxu1 %vm4394_vm0, %v4393_v50  ;;  %1215 = vrot.lane.b32.xlu0 %v3837_v5, %s4398_s3 }
 0x29d   :  { %3863 = vmatprep.subr.mxu1 %v4393_v50 }
 0x29e   :  { %3861 = vmatmul.mubr.f32.vlgmr.msra.gmra.mrb[16].mxu1 %v863_v7 }
 0x29f   :  { %3864 = vmatpush3.xpose.msra.mxu1 %v1203_v2  ;;  %1219 = vrot.lane.b32.xlu1 %v652_v18, %s4391_s28 }
 0x2a0   :  { %3865 = vmatprep.mubr.msk.f32.mxu1 %vm4394_vm0, %v4393_v50  ;;  %3868 = vmatprep.subr.mxu1 %v4393_v50 }
 0x2a2   :  { %3866 = vmatmul.mubr.f32.vlgmr.msra.gmra.mrb[18].mxu1 %v931_v21 }
 0x2a3   :  { %3869 = vmatpush3.xpose.msra.mxu1 %v1136_v48  ;;  %1221 = vrot.lane.b32.xlu1 %v3837_v5, %s4391_s28 }
 0x2a4   :  { %3870 = vmatprep.mubr.msk.f32.mxu1 %vm4394_vm0, %v4393_v50  ;;  %3878 = vmatprep.subr.mxu1 %v4393_v50 }
 0x2a6   :  { %3871 = vmatmul.mubr.f32.vlgmr.msra.gmra.mrb[20].mxu1 %v864_v8 }
 0x2a7   :  { %3880 = vmatprep.mubr.msk.f32.mxu1 %vm4394_vm0, %v4393_v50 }
 0x309   :  { %v1210_v61 = vpop.permute.xlu1 %1209 }
 0x30a   :  { %v1208_v62 = vpop.permute.xlu0 %1207 }
 0x30d   :  { %v1214_v6 = vpop.permute.xlu1 %1213 }
 0x30e   :  { %v1225_v7 = vcombine.low %v652_v18, %v1214_v6  ;;  %v1226_v14 = vcombine.high %v652_v18, %v1214_v6  ;;  %v1216_v16 = vpop.permute.xlu0 %1215 }
 0x30f   :  { %v1293_v0 = vcombine.low %v3837_v5, %v1216_v16  ;;  %v1294_v8 = vcombine.high %v3837_v5, %v1216_v16 }
 0x310   :  { %v1233_v20 = vrot.slane %v1225_v7, %v4558_v63  ;;  %v1240_v21 = vrot.slane %v1226_v14, %v4558_v63 }
 0x311   :  { %v1220_v15 = vpop.permute.xlu1 %1219  ;;  %v1301_v28 = vrot.slane %v1293_v0, %v4558_v63  ;;  %v1308_v29 = vrot.slane %v1294_v8, %v4558_v63 }
 0x312   :  { %v1241_v17 = vcombine.low %v1208_v62, %v1220_v15  ;;  %v1242_v19 = vcombine.high %v1208_v62, %v1220_v15 }
 0x314   :  { %v1249_v3 = vrot.slane %v1241_v17, %v4558_v63  ;;  %v1256_v24 = vrot.slane %v1242_v19, %v4558_v63 }
 0x315   :  { %v1222_v4 = vpop.permute.xlu1 %1221 }
 0x316   :  { %v1257_v9 = vcombine.low %v1233_v20, %v1249_v3  ;;  %v1258_v10 = vcombine.high %v1233_v20, %v1249_v3  ;;  %v1273_v11 = vcombine.low %v1240_v21, %v1256_v24  ;;  %v1274_v13 = vcombine.high %v1240_v21, %v1256_v24 }
 0x317   :  { %v1309_v22 = vcombine.low %v1210_v61, %v1222_v4  ;;  %v1310_v44 = vcombine.high %v1210_v61, %v1222_v4 }
 0x318   :  { %v1265_v23 = vrot.slane %v1257_v9, %v4565_v12  ;;  %v1272_v25 = vrot.slane %v1258_v10, %v4565_v12  ;;  %v1281_v26 = vrot.slane %v1273_v11, %v4565_v12  ;;  %v1288_v27 = vrot.slane %v1274_v13, %v4565_v12 }
 0x319   :  { %v1317_v30 = vrot.slane %v1309_v22, %v4558_v63  ;;  %v1324_v31 = vrot.slane %v1310_v44, %v4558_v63  ;;  %v1500_v13 = vand.u32 127, %v666_v58 }
 0x31a   :  { %v1361_v32 = vcombine.low %v1265_v23, %v1272_v25  ;;  %v3658_v33 = vcombine.high %v1265_v23, %v1272_v25  ;;  %v1377_v34 = vcombine.low %v1281_v26, %v1288_v27  ;;  %v3659_v35 = vcombine.high %v1281_v26, %v1288_v27 }
 0x31b   :  { %v1325_v36 = vcombine.low %v1301_v28, %v1317_v30  ;;  %v1326_v37 = vcombine.high %v1301_v28, %v1317_v30  ;;  %v1341_v38 = vcombine.low %v1308_v29, %v1324_v31  ;;  %v1342_v39 = vcombine.high %v1308_v29, %v1324_v31 }
 0x31c   :  { %v1368_v41 = vrot.slane %v1361_v32, %v4558_v63  ;;  %v1376_v42 = vrot.slane %v3658_v33, %v4558_v63  ;;  %v1384_v43 = vrot.slane %v1377_v34, %v4558_v63  ;;  %v1392_v45 = vrot.slane %v3659_v35, %v4558_v63 }
 0x31d   :  { %v1333_v46 = vrot.slane %v1325_v36, %v4565_v12  ;;  %v1340_v47 = vrot.slane %v1326_v37, %v4565_v12  ;;  %v1349_v48 = vrot.slane %v1341_v38, %v4565_v12  ;;  %v1356_v49 = vrot.slane %v1342_v39, %v4565_v12 }
 0x31e   :  { %v1393_v51 = vcombine.low %v1368_v41, %v1376_v42  ;;  %v1409_v52 = vcombine.low %v1384_v43, %v1392_v45  ;;  %v1394_v53 = vcombine.high %v1368_v41, %v1376_v42  ;;  %v1410_v54 = vcombine.high %v1384_v43, %v1392_v45 }
 0x31f   :  { %v1429_v55 = vcombine.low %v1333_v46, %v1340_v47  ;;  %v3660_v40 = vcombine.high %v1333_v46, %v1340_v47  ;;  %v1445_v56 = vcombine.low %v1349_v48, %v1356_v49  ;;  %v3661_v57 = vcombine.high %v1349_v48, %v1356_v49 }
 0x320   :  { %v4734_v59 = vrot.slane %v1393_v51, %v4565_v12  ;;  %v4737_v1 = vrot.slane %v1409_v52, %v4565_v12  ;;  %v4740_v2 = vrot.slane %v1394_v53, %v4565_v12  ;;  %v4743_v5 = vrot.slane %v1410_v54, %v4565_v12 }
 0x321   :  { %v1436_v18 = vrot.slane %v1429_v55, %v4558_v63  ;;  %v1444_v61 = vrot.slane %v3660_v40, %v4558_v63  ;;  %v1452_v62 = vrot.slane %v1445_v56, %v4558_v63  ;;  %v1460_v6 = vrot.slane %v3661_v57, %v4558_v63 }
 0x322   :  { %v1425_v7 = vcombine.low %v4734_v59, %v4737_v1  ;;  %v1426_v14 = vcombine.high %v4734_v59, %v4737_v1  ;;  %v1427_v15 = vcombine.low %v4740_v2, %v4743_v5  ;;  %v1428_v16 = vcombine.high %v4740_v2, %v4743_v5 }
 0x323   :  { %v1461_v17 = vcombine.low %v1436_v18, %v1444_v61  ;;  %v1477_v19 = vcombine.low %v1452_v62, %v1460_v6  ;;  %v1462_v20 = vcombine.high %v1436_v18, %v1444_v61  ;;  %v1478_v21 = vcombine.high %v1452_v62, %v1460_v6 }
 0x324   :  { %3879 = vmatpush3.msra.mxu1 %v1425_v7  ;;  %vm4781_vm1 = vcmp.le.s32.totalorder %v1500_v13, %v4555_v60 }
 0x325   :  { %v4758_v3 = vrot.slane %v1461_v17, %v4565_v12  ;;  %v4761_v24 = vrot.slane %v1477_v19, %v4565_v12  ;;  %3888 = vmatprep.subr.mxu1 %v4393_v50  ;;  %v4765_v0 = vrot.slane %v1462_v20, %v4565_v12  ;;  %v4768_v8 = vrot.slane %v1478_v21, %v4565_v12 }
 0x327   :  { %v1493_v4 = vcombine.low %v4758_v3, %v4761_v24  ;;  %v1494_v9 = vcombine.high %v4758_v3, %v4761_v24  ;;  %v1495_v10 = vcombine.low %v4765_v0, %v4768_v8  ;;  %v1496_v11 = vcombine.high %v4765_v0, %v4768_v8 }
 0x329   :  { %3884 = vmatpush3.msra.mxu0 %v1493_v4 }
 0x32a   :  { %3893 = vmatprep.subr.mxu0 %v4393_v50 }
 0x360   :  { %v1568_v44 = vpop.f32.mrb[8].mxu1 }
 0x361   :  { %v2064_v23 = vsel %vm4781_vm1, %v1568_v44, -inf  ;;  %v3842_v25 = vpop.f32.mrb[9].mxu1 }
 0x362   :  { %v2073_v26 = vsel %vm2072_vm2, %v2064_v23, -inf }
 0x363   :  { %v2074_v27 = vrot.slane %v2073_v26, 4 }
 0x365   :  { %v2075_v28 = vmax.f32 %v2073_v26, %v2074_v27  ;;  %v1638_v29 = vpop.f32.mrb[10].mxu1  ;;  %v2058_v30 = vpop.f32.mrb[10].mxu0 }
 0x366   :  { %v2065_v58 = vsel %vm4781_vm1, %v1638_v29, -inf  ;;  %v2071_v31 = vsel %vm4781_vm1, %v2058_v30, -inf  ;;  %v3847_v32 = vpop.f32.mrb[11].mxu1  ;;  %v3877_v33 = vpop.f32.mrb[11].mxu0 }
 0x367   :  { %v2076_v34 = vrot.slane %v2075_v28, 2  ;;  %v2080_v35 = vsel %vm2072_vm2, %v2065_v58, -inf  ;;  %v2122_v36 = vsel %vm2072_vm2, %v2071_v31, -inf }
 0x368   :  { %v2081_v37 = vrot.slane %v2080_v35, 4  ;;  %v2123_v38 = vrot.slane %v2122_v36, 4 }
 0x369   :  { %v2077_v39 = vmax.f32 %v2075_v28, %v2076_v34  ;;  %v1708_v41 = vpop.f32.mrb[12].mxu1 }
 0x36a   :  { %v2082_v42 = vmax.f32 %v2080_v35, %v2081_v37  ;;  %v2124_v43 = vmax.f32 %v2122_v36, %v2123_v38  ;;  %v2066_v45 = vsel %vm4781_vm1, %v1708_v41, -inf  ;;  %v3852_v46 = vpop.f32.mrb[13].mxu1 }
 0x36b   :  { %v2078_v47 = vrot.slane %v2077_v39, 1  ;;  %v2087_v48 = vsel %vm2072_vm2, %v2066_v45, -inf }
 0x36c   :  { %v2083_v49 = vrot.slane %v2082_v42, 2  ;;  %v2125_v51 = vrot.slane %v2124_v43, 2  ;;  %v2088_v52 = vrot.slane %v2087_v48, 4 }
 0x36d   :  { %v2079_v53 = vmax.f32 %v2077_v39, %v2078_v47  ;;  %v1778_v54 = vpop.f32.mrb[14].mxu1 }
 0x36e   :  { %v2084_v55 = vmax.f32 %v2082_v42, %v2083_v49  ;;  %v2126_v40 = vmax.f32 %v2124_v43, %v2125_v51  ;;  %v2089_v56 = vmax.f32 %v2087_v48, %v2088_v52  ;;  %v2067_v57 = vsel %vm4781_vm1, %v1778_v54, -inf  ;;  %v3857_v18 = vpop.f32.mrb[15].mxu1 }
 0x36f   :  { %v2129_v61 = vsub.f32 %v2064_v23, %v2079_v53  ;;  %v2094_v62 = vsel %vm2072_vm2, %v2067_v57, -inf }
 0x370   :  { %v2085_v6 = vrot.slane %v2084_v55, 1  ;;  %v2127_v7 = vrot.slane %v2126_v40, 1  ;;  %v2090_v17 = vrot.slane %v2089_v56, 2  ;;  %v2095_v19 = vrot.slane %v2094_v62, 4 }
 0x371   :  { %v2137_v20 = vmul.f32 1.442695, %v2129_v61  ;;  %v1848_v21 = vpop.f32.mrb[16].mxu1 }
 0x372   :  { %v2086_v4 = vmax.f32 %v2084_v55, %v2085_v6  ;;  %v2128_v13 = vmax.f32 %v2126_v40, %v2127_v7  ;;  %v2091_v44 = vmax.f32 %v2089_v56, %v2090_v17  ;;  %v2096_v25 = vmax.f32 %v2094_v62, %v2095_v19  ;;  %v3862_v26 = vpop.f32.mrb[17].mxu1 }
 0x373   :  { %4227 = vpow2.f32 %v2137_v20  ;;  %v2068_v27 = vsel %vm4781_vm1, %v1848_v21, -inf }
 0x374   :  { %v2130_v28 = vsub.f32 %v2065_v58, %v2086_v4  ;;  %v2136_v29 = vsub.f32 %v2071_v31, %v2128_v13  ;;  %v2092_v23 = vrot.slane %v2091_v44, 1  ;;  %v2097_v30 = vrot.slane %v2096_v25, 2 }
 0x375   :  { %v2101_v32 = vsel %vm2072_vm2, %v2068_v27, -inf  ;;  %v1918_v33 = vpop.f32.mrb[18].mxu1 }
 0x376   :  { %v2139_v34 = vmul.f32 1.442695, %v2130_v28  ;;  %v2151_v35 = vmul.f32 1.442695, %v2136_v29  ;;  %v2093_v36 = vmax.f32 %v2091_v44, %v2092_v23  ;;  %v2098_v37 = vmax.f32 %v2096_v25, %v2097_v30  ;;  %v3867_v38 = vpop.f32.mrb[19].mxu1 }
 0x377   :  { %v2102_v39 = vrot.slane %v2101_v32, 4  ;;  %v2069_v41 = vsel %vm4781_vm1, %v1918_v33, -inf }
 0x378   :  { %4229 = vpow2.f32 %v2139_v34  ;;  %v2131_v42 = vsub.f32 %v2066_v45, %v2093_v36  ;;  %v2099_v43 = vrot.slane %v2098_v37, 1  ;;  %v2108_v58 = vsel %vm2072_vm2, %v2069_v41, -inf }
 0x379   :  { %v2103_v31 = vmax.f32 %v2101_v32, %v2102_v39  ;;  %v2109_v46 = vrot.slane %v2108_v58, 4  ;;  %v1988_v47 = vpop.f32.mrb[20].mxu1  ;;  %4231 = vpow2.f32 %v2151_v35 }
 0x37a   :  { %v2141_v48 = vmul.f32 1.442695, %v2131_v42  ;;  %v2100_v49 = vmax.f32 %v2098_v37, %v2099_v43  ;;  %v2070_v51 = vsel %vm4781_vm1, %v1988_v47, -inf  ;;  %v3872_v52 = vpop.f32.mrb[21].mxu1 }
 0x37b   :  { %v2104_v53 = vrot.slane %v2103_v31, 2  ;;  %v2110_v54 = vmax.f32 %v2108_v58, %v2109_v46  ;;  %v2115_v55 = vsel %vm2072_vm2, %v2070_v51, -inf }
 0x37c   :  { %4233 = vpow2.f32 %v2141_v48  ;;  %v2132_v40 = vsub.f32 %v2067_v57, %v2100_v49  ;;  %v2116_v45 = vrot.slane %v2115_v55, 4 }
 0x37d   :  { %v4809_v56 = vpop.eup %4227  ;;  %v2105_v18 = vmax.f32 %v2103_v31, %v2104_v53  ;;  %v2111_v61 = vrot.slane %v2110_v54, 2 }
 0x37e   :  { %v2153_v62 = vsel %vm2072_vm2, %v4809_v56, 0.0  ;;  %v2143_v6 = vmul.f32 1.442695, %v2132_v40  ;;  %v2117_v7 = vmax.f32 %v2115_v55, %v2116_v45 }
 0x37f   :  { %v2154_v17 = vrot.slane %v2153_v62, 4  ;;  %v2106_v22 = vrot.slane %v2105_v18, 1  ;;  %v2112_v19 = vmax.f32 %v2110_v54, %v2111_v61 }
 0x380   :  { %4235 = vpow2.f32 %v2143_v6  ;;  %v2118_v20 = vrot.slane %v2117_v7, 2 }
 0x381   :  { %v2155_v21 = vadd.f32 %v2154_v17, %v2153_v62  ;;  %v2107_v4 = vmax.f32 %v2105_v18, %v2106_v22  ;;  %v2113_v13 = vrot.slane %v2112_v19, 1 }
 0x382   :  { %v4813_v44 = vpop.eup %4229  ;;  %v2119_v57 = vmax.f32 %v2117_v7, %v2118_v20 }
 0x383   :  { %v2156_v25 = vrot.slane %v2155_v21, 2  ;;  %v2160_v26 = vsel %vm2072_vm2, %v4813_v44, 0.0  ;;  %v2133_v28 = vsub.f32 %v2068_v27, %v2107_v4  ;;  %v2114_v29 = vmax.f32 %v2112_v19, %v2113_v13  ;;  %v4817_v23 = vpop.eup %4231 }
 0x384   :  { %v2161_v30 = vrot.slane %v2160_v26, 4  ;;  %v2120_v32 = vrot.slane %v2119_v57, 1  ;;  %v2202_v42 = vsel %vm2072_vm2, %v4817_v23, 0.0 }
 0x385   :  { %v2157_v33 = vadd.f32 %v2156_v25, %v2155_v21  ;;  %v2145_v34 = vmul.f32 1.442695, %v2133_v28  ;;  %v2134_v35 = vsub.f32 %v2069_v41, %v2114_v29  ;;  %v2203_v53 = vrot.slane %v2202_v42, 4 }
 0x386   :  { %v4819_v36 = vpop.eup %4233  ;;  %v2162_v37 = vadd.f32 %v2161_v30, %v2160_v26  ;;  %v2121_v38 = vmax.f32 %v2119_v57, %v2120_v32 }
 0x387   :  { %v2158_v39 = vrot.slane %v2157_v33, 1  ;;  %v2167_v43 = vsel %vm2072_vm2, %v4819_v36, 0.0  ;;  %4237 = vpow2.f32 %v2145_v34  ;;  %v2147_v31 = vmul.f32 1.442695, %v2134_v35 }
 0x388   :  { %v2163_v27 = vrot.slane %v2162_v37, 2  ;;  %v2168_v58 = vrot.slane %v2167_v43, 4  ;;  %v2135_v46 = vsub.f32 %v2070_v51, %v2121_v38  ;;  %v2204_v51 = vadd.f32 %v2203_v53, %v2202_v42 }
 0x389   :  { %v2159_v47 = vadd.f32 %v2158_v39, %v2157_v33  ;;  %4239 = vpow2.f32 %v2147_v31 }
 0x38a   :  { %v4825_v48 = vpop.eup %4235  ;;  %v2164_v41 = vadd.f32 %v2163_v27, %v2162_v37  ;;  %v2169_v49 = vadd.f32 %v2168_v58, %v2167_v43  ;;  %v2149_v52 = vmul.f32 1.442695, %v2135_v46  ;;  %v2205_v21 = vrot.slane %v2204_v51, 2 }
 0x38b   :  { %4241 = vrcp.f32 %v2159_v47  ;;  %v2174_v54 = vsel %vm2072_vm2, %v4825_v48, 0.0 }
 0x38c   :  { %v2165_v55 = vrot.slane %v2164_v41, 1  ;;  %v2170_v40 = vrot.slane %v2169_v49, 2  ;;  %v2175_v45 = vrot.slane %v2174_v54, 4  ;;  %4243 = vpow2.f32 %v2149_v52 }
 0x38d   :  { %v2206_v34 = vadd.f32 %v2205_v21, %v2204_v51 }
 0x38e   :  { %v2166_v18 = vadd.f32 %v2165_v55, %v2164_v41  ;;  %v2171_v61 = vadd.f32 %v2170_v40, %v2169_v49  ;;  %v2176_v62 = vadd.f32 %v2175_v45, %v2174_v54 }
 0x38f   :  { %v2207_v58 = vrot.slane %v2206_v34, 1 }
 0x390   :  { %4245 = vrcp.f32 %v2166_v18  ;;  %v2172_v6 = vrot.slane %v2171_v61, 1  ;;  %v2177_v7 = vrot.slane %v2176_v62, 2 }
 0x391   :  { %v4829_v17 = vpop.eup %4237 }
 0x392   :  { %v2173_v22 = vadd.f32 %v2172_v6, %v2171_v61  ;;  %v2178_v19 = vadd.f32 %v2177_v7, %v2176_v62  ;;  %v2181_v20 = vsel %vm2072_vm2, %v4829_v17, 0.0 }
 0x393   :  { %v2182_v4 = vrot.slane %v2181_v20, 4  ;;  %v4240_v13 = vpop.eup %4239 }
 0x394   :  { %4247 = vrcp.f32 %v2173_v22  ;;  %v2179_v57 = vrot.slane %v2178_v19, 1  ;;  %v2188_v28 = vsel %vm2072_vm2, %v4240_v13, 0.0 }
 0x395   :  { %v4242_v25 = vpop.eup %4241  ;;  %v2183_v26 = vadd.f32 %v2182_v4, %v2181_v20  ;;  %v2189_v32 = vrot.slane %v2188_v28, 4 }
 0x396   :  { %v4244_v29 = vpop.eup %4243  ;;  %v2180_v30 = vadd.f32 %v2179_v57, %v2178_v19  ;;  %v2217_v33 = vmul.f32 %v4242_v25, %v4809_v56 }
 0x397   :  { %v2184_v35 = vrot.slane %v2183_v26, 2  ;;  %v2195_v37 = vsel %vm2072_vm2, %v4244_v29, 0.0  ;;  %v2190_v38 = vadd.f32 %v2189_v32, %v2188_v28 }
 0x398   :  { %4249 = vrcp.f32 %v2180_v30  ;;  %v2196_v39 = vrot.slane %v2195_v37, 4  ;;  %3881 = vmatmul.mubr.msk.f32.vlgmr.msra.gmra.mrb[22].mxu1 %vm2072_vm2, %v2217_v33 }
 0x399   :  { %v2185_v42 = vadd.f32 %v2184_v35, %v2183_v26  ;;  %3889 = vmatpush3.msra.mxu1 %v1426_v14  ;;  %3890 = vmatprep.mubr.msk.f32.mxu1 %vm4394_vm0, %v4393_v50  ;;  %v2191_v27 = vrot.slane %v2190_v38, 2  ;;  %v2208_v14 = vadd.f32 %v2207_v58, %v2206_v34 }
 0x39a   :  { %v4246_v43 = vpop.eup %4245  ;;  %v2197_v56 = vadd.f32 %v2196_v39, %v2195_v37  ;;  %3898 = vmatprep.subr.mxu1 %v4393_v50 }
 0x39b   :  { %v2186_v31 = vrot.slane %v2185_v42, 1  ;;  %v2218_v46 = vmul.f32 %v4246_v43, %v4813_v44  ;;  %v2192_v47 = vadd.f32 %v2191_v27, %v2190_v38 }
 0x39c   :  { %v2198_v41 = vrot.slane %v2197_v56, 2 }
 0x39d   :  { %v2187_v49 = vadd.f32 %v2186_v31, %v2185_v42  ;;  %3886 = vmatmul.mubr.msk.f32.vlgmr.msra.gmra.mrb[12].mxu0 %vm2072_vm2, %v2218_v46  ;;  %v2193_v59 = vrot.slane %v2192_v47, 1 }
 0x39e   :  { %v4248_v52 = vpop.eup %4247  ;;  %v2199_v1 = vadd.f32 %v2198_v41, %v2197_v56  ;;  %3894 = vmatpush3.msra.mxu0 %v1494_v9  ;;  %3895 = vmatprep.mubr.msk.f32.mxu0 %vm4394_vm0, %v4393_v50 }
 0x39f   :  { %4251 = vrcp.f32 %v2187_v49  ;;  %v2219_v53 = vmul.f32 %v4248_v52, %v4819_v36  ;;  %3903 = vmatprep.subr.mxu0 %v4393_v50  ;;  %v2194_v44 = vadd.f32 %v2193_v59, %v2192_v47 }
 0x3a0   :  { %v2200_v54 = vrot.slane %v2199_v1, 1 }
 0x3a1   :  { %3891 = vmatmul.mubr.msk.f32.vlgmr.msra.gmra.mrb[24].mxu1 %vm2072_vm2, %v2219_v53  ;;  %4253 = vrcp.f32 %v2194_v44 }
 0x3a2   :  { %v4250_v55 = vpop.eup %4249  ;;  %v2201_v40 = vadd.f32 %v2200_v54, %v2199_v1  ;;  %3899 = vmatpush3.msra.mxu1 %v1427_v15  ;;  %3900 = vmatprep.mubr.msk.f32.mxu1 %vm4394_vm0, %v4393_v50  ;;  %4255 = vrcp.f32 %v2208_v14 }
 0x3a3   :  { %v2220_v3 = vmul.f32 %v4250_v55, %v4825_v48  ;;  %3908 = vmatprep.subr.mxu1 %v4393_v50 }
 0x3a4   :  { %4257 = vrcp.f32 %v2201_v40 }
 0x3a5   :  { %3896 = vmatmul.mubr.msk.f32.vlgmr.msra.gmra.mrb[14].mxu0 %vm2072_vm2, %v2220_v3 }
 0x3a6   :  { %3904 = vmatpush3.msra.mxu0 %v1495_v10  ;;  %3905 = vmatprep.mubr.msk.f32.mxu0 %vm4394_vm0, %v4393_v50 }
 0x3a7   :  { %3913 = vmatprep.subr.mxu0 %v4393_v50 }
 0x3a9   :  { %v4252_v15 = vpop.eup %4251 }
 0x3aa   :  { %v2221_v24 = vmul.f32 %v4252_v15, %v4829_v17 }
 0x3ab   :  { %v4254_v9 = vpop.eup %4253 }
 0x3ac   :  { %3901 = vmatmul.mubr.msk.f32.vlgmr.msra.gmra.mrb[26].mxu1 %vm2072_vm2, %v2221_v24  ;;  %v4256_v36 = vpop.eup %4255  ;;  %v2222_v48 = vmul.f32 %v4254_v9, %v4240_v13 }
 0x3ad   :  { %3909 = vmatpush3.msra.mxu1 %v1428_v16  ;;  %3910 = vmatprep.mubr.msk.f32.mxu1 %vm4394_vm0, %v4393_v50  ;;  %v2224_v2 = vmul.f32 %v4256_v36, %v4817_v23 }
 0x3ae   :  { %v4258_v10 = vpop.eup %4257  ;;  %3906 = vmatmul.mubr.msk.f32.vlgmr.msra.gmra.mrb[16].mxu0 %vm2072_vm2, %v2222_v48 }
 0x3af   :  { %v2223_v45 = vmul.f32 %v4258_v10, %v4244_v29  ;;  %3914 = vmatpush3.msra.mxu0 %v1496_v11  ;;  %3915 = vmatprep.mubr.msk.f32.mxu0 %vm4394_vm0, %v4393_v50 }
 0x3b1   :  { %3911 = vmatmul.mubr.msk.f32.vlgmr.msra.gmra.mrb[28].mxu1 %vm2072_vm2, %v2223_v45 }
 0x3b2   :  { %3306 = vmatprep.mubr.f32.mxu1 %v4393_v50  ;;  %3916 = vmatmul.mubr.msk.f32.vlgmr.msra.gmra.mrb[18].mxu0 %vm2072_vm2, %v2224_v2 }
 0x3b3   :  { %3383 = vmatprep.mubr.f32.mxu0 %v4393_v50 }
 0x46b   :  { %v2294_v5 = vpop.f32.mrb[22].mxu1 }
 0x46c   :  { %v3882_v16 = vpop.f32.mrb[23].mxu1 }
 0x470   :  { %v2367_v18 = vpop.f32.mrb[12].mxu0 }
 0x471   :  { %v3887_v61 = vpop.f32.mrb[13].mxu0 }
 0x474   :  { %v2440_v62 = vpop.f32.mrb[24].mxu1 }
 0x475   :  { %v3892_v0 = vpop.f32.mrb[25].mxu1 }
 0x478   :  { %v2513_v8 = vpop.f32.mrb[14].mxu0 }
 0x479   :  { %v3897_v11 = vpop.f32.mrb[15].mxu0 }
 0x47f   :  { %v2586_v51 = vpop.f32.mrb[26].mxu1 }
 0x480   :  { %v2809_v6 = vcombine.low %v2294_v5, %v2586_v51  ;;  %v2810_v7 = vcombine.high %v2294_v5, %v2586_v51  ;;  %v3902_v17 = vpop.f32.mrb[27].mxu1 }
 0x481   :  { %v2659_v22 = vpop.f32.mrb[16].mxu0 }
 0x482   :  { %v2877_v23 = vcombine.low %v2367_v18, %v2659_v22  ;;  %v2878_v19 = vcombine.high %v2367_v18, %v2659_v22  ;;  %v3907_v20 = vpop.f32.mrb[17].mxu0  ;;  %v2817_v25 = vrot.slane %v2809_v6, %v4558_v63  ;;  %v2824_v26 = vrot.slane %v2810_v7, %v4558_v63 }
 0x484   :  { %v2732_v21 = vpop.f32.mrb[28].mxu1  ;;  %v2885_v42 = vrot.slane %v2877_v23, %v4558_v63  ;;  %v2892_v43 = vrot.slane %v2878_v19, %v4558_v63 }
 0x485   :  { %v2825_v4 = vcombine.low %v2440_v62, %v2732_v21  ;;  %v2826_v13 = vcombine.high %v2440_v62, %v2732_v21  ;;  %v3912_v57 = vpop.f32.mrb[29].mxu1  ;;  %v2805_v28 = vpop.f32.mrb[18].mxu0 }
 0x486   :  { %v2893_v32 = vcombine.low %v2513_v8, %v2805_v28  ;;  %v2894_v33 = vcombine.high %v2513_v8, %v2805_v28  ;;  %v3917_v34 = vpop.f32.mrb[19].mxu0 }
 0x487   :  { %v2833_v29 = vrot.slane %v2825_v4, %v4558_v63  ;;  %v2840_v30 = vrot.slane %v2826_v13, %v4558_v63 }
 0x488   :  { %v2901_v27 = vrot.slane %v2893_v32, %v4558_v63  ;;  %v2908_v56 = vrot.slane %v2894_v33, %v4558_v63 }
 0x489   :  { %v2841_v35 = vcombine.low %v2817_v25, %v2833_v29  ;;  %v2842_v37 = vcombine.high %v2817_v25, %v2833_v29  ;;  %v2857_v38 = vcombine.low %v2824_v26, %v2840_v30  ;;  %v2858_v39 = vcombine.high %v2824_v26, %v2840_v30 }
 0x48a   :  { %v2909_v41 = vcombine.low %v2885_v42, %v2901_v27  ;;  %v2910_v49 = vcombine.high %v2885_v42, %v2901_v27  ;;  %v2925_v52 = vcombine.low %v2892_v43, %v2908_v56  ;;  %v2926_v59 = vcombine.high %v2892_v43, %v2908_v56  ;;  %v4263_v43 = vld [vmem:[#allocation2] sm:$0xff] }
 0x48b   :  { %v2849_v58 = vrot.slane %v2841_v35, %v4565_v12  ;;  %v2856_v31 = vrot.slane %v2842_v37, %v4565_v12  ;;  %v2865_v46 = vrot.slane %v2857_v38, %v4565_v12  ;;  %v2872_v47 = vrot.slane %v2858_v39, %v4565_v12 }
 0x48c   :  { %v2917_v54 = vrot.slane %v2909_v41, %v4565_v12  ;;  %v2924_v55 = vrot.slane %v2910_v49, %v4565_v12  ;;  %v2933_v40 = vrot.slane %v2925_v52, %v4565_v12  ;;  %v2940_v3 = vrot.slane %v2926_v59, %v4565_v12  ;;  %v4264_v41 = vld [vmem:[#allocation2 + $0x8] sm:$0xff]  ;;  %v3157_v52 = vld [vmem:[#allocation7 + $0x8] sm:$0xff] }
 0x48d   :  { %v2945_v1 = vcombine.low %v2849_v58, %v2856_v31  ;;  %v3670_v14 = vcombine.high %v2849_v58, %v2856_v31  ;;  %v2961_v53 = vcombine.low %v2865_v46, %v2872_v47  ;;  %v3671_v44 = vcombine.high %v2865_v46, %v2872_v47  ;;  %v3161_v59 = vld [vmem:[#allocation7 + $0x28] sm:$0xff] }
 0x48e   :  { %v3013_v48 = vcombine.low %v2917_v54, %v2924_v55  ;;  %v3672_v10 = vcombine.high %v2917_v54, %v2924_v55  ;;  %v3029_v45 = vcombine.low %v2933_v40, %v2940_v3  ;;  %v3673_v2 = vcombine.high %v2933_v40, %v2940_v3  ;;  %v3160_v54 = vld [vmem:[#allocation7 + $0x20] sm:$0xff]  ;;  %v3158_v3 = vld [vmem:[#allocation7 + $0x10] sm:$0xff] }
 0x48f   :  { %v2952_v15 = vrot.slane %v2945_v1, %v4558_v63  ;;  %v2960_v24 = vrot.slane %v3670_v14, %v4558_v63  ;;  %v2968_v9 = vrot.slane %v2961_v53, %v4558_v63  ;;  %v2976_v36 = vrot.slane %v3671_v44, %v4558_v63  ;;  %v3159_v1 = vld [vmem:[#allocation7 + $0x18] sm:$0xff]  ;;  %v3156_v44 = vld [vmem:[#allocation7] sm:$0xff] }
 0x490   :  { %v3020_v62 = vrot.slane %v3013_v48, %v4558_v63  ;;  %v3028_v0 = vrot.slane %v3672_v10, %v4558_v63  ;;  %v3036_v8 = vrot.slane %v3029_v45, %v4558_v63  ;;  %v3044_v11 = vrot.slane %v3673_v2, %v4558_v63  ;;  %v3163_v53 = vld [vmem:[#allocation7 + $0x38] sm:$0xff] }
 0x491   :  { %v2978_v5 = vcombine.high %v2952_v15, %v2960_v24  ;;  %v2994_v16 = vcombine.high %v2968_v9, %v2976_v36  ;;  %v2977_v18 = vcombine.low %v2952_v15, %v2960_v24  ;;  %v2993_v61 = vcombine.low %v2968_v9, %v2976_v36  ;;  %v3162_v15 = vld [vmem:[#allocation7 + $0x30] sm:$0xff]  ;;  %v3165_v24 = vld [vmem:[#allocation7 + $0x48] sm:$0xff]  ;;  %v3167_v48 = vld [vmem:[#allocation7 + $0x58] sm:$0xff] }
 0x492   :  { %v3045_v22 = vcombine.low %v3020_v62, %v3028_v0  ;;  %v3061_v23 = vcombine.low %v3036_v8, %v3044_v11  ;;  %v3046_v19 = vcombine.high %v3020_v62, %v3028_v0  ;;  %v3062_v20 = vcombine.high %v3036_v8, %v3044_v11  ;;  %v3169_v36 = vld [vmem:[#allocation7 + $0x68] sm:$0xff]  ;;  %v3171_v10 = vld [vmem:[#allocation7 + $0x78] sm:$0xff]  ;;  %v3170_v62 = vld [vmem:[#allocation7 + $0x70] sm:$0xff] }
 0x493   :  { %v2992_v51 = vrot.slane %v2978_v5, %v4565_v12  ;;  %v3008_v6 = vrot.slane %v2994_v16, %v4565_v12  ;;  %v2985_v7 = vrot.slane %v2977_v18, %v4565_v12  ;;  %v3001_v17 = vrot.slane %v2993_v61, %v4565_v12  ;;  %v3164_v5 = vld [vmem:[#allocation7 + $0x40] sm:$0xff]  ;;  %v3166_v18 = vld [vmem:[#allocation7 + $0x50] sm:$0xff]  ;;  %v3173_v0 = vld [vmem:[#allocation7 + $0x88] sm:$0xff] }
 0x494   :  { %v3053_v25 = vrot.slane %v3045_v22, %v4565_v12  ;;  %v3069_v63 = vrot.slane %v3061_v23, %v4565_v12  ;;  %v3060_v26 = vrot.slane %v3046_v19, %v4565_v12  ;;  %v3076_v28 = vrot.slane %v3062_v20, %v4565_v12  ;;  %v3168_v16 = vld [vmem:[#allocation7 + $0x60] sm:$0xff]  ;;  %v3177_v8 = vld [vmem:[#allocation7 + $0xa8] sm:$0xff]  ;;  %v3174_v19 = vld [vmem:[#allocation7 + $0x90] sm:$0xff] }
 0x495   :  { %v3011_v21 = vcombine.low %v2992_v51, %v3008_v6  ;;  %v3010_v4 = vcombine.high %v2985_v7, %v3001_v17  ;;  %v3009_v13 = vcombine.low %v2985_v7, %v3001_v17  ;;  %v3012_v57 = vcombine.high %v2992_v51, %v3008_v6  ;;  %v3175_v6 = vld [vmem:[#allocation7 + $0x98] sm:$0xff]  ;;  %v3172_v17 = vld [vmem:[#allocation7 + $0x80] sm:$0xff]  ;;  %v3178_v20 = vld [vmem:[#allocation7 + $0xb0] sm:$0xff] }
 0x496   :  { %v3078_v29 = vcombine.high %v3053_v25, %v3069_v63  ;;  %v3077_v30 = vcombine.low %v3053_v25, %v3069_v63  ;;  %v3079_v32 = vcombine.low %v3060_v26, %v3076_v28  ;;  %v3080_v33 = vcombine.high %v3060_v26, %v3076_v28  ;;  %v3179_v7 = vld [vmem:[#allocation7 + $0xb8] sm:$0xff]  ;;  %v3176_v23 = vld [vmem:[#allocation7 + $0xa0] sm:$0xff] }
 0x497   :  { %3091 = vrot.lane.b32.xlu1 %v3011_v21, %s4398_s3  ;;  %3083 = vrot.lane.b32.xlu0 %v3010_v4, %s4391_s28  ;;  %v4078_v14 = vpack.c.bf16 %v3161_v59, %v3157_v52  ;;  %v4110_v55 = vpack.c.bf16 %v3163_v53, %v3159_v1  ;;  %v4080_v40 = vpack.c.bf16 %v3160_v54, %v3156_v44  ;;  %v3195_v52 = vld [vmem:[#allocation7 + $0x138] sm:$0xff]  ;;  %v3188_v59 = vld [vmem:[#allocation7 + $0x100] sm:$0xff]  ;;  %v3190_v44 = vld [vmem:[#allocation7 + $0x110] sm:$0xff] }
 0x498   :  { %v4112_v9 = vpack.c.bf16 %v3162_v15, %v3158_v3  ;;  %v4082_v45 = vpack.c.bf16 %v3169_v36, %v3165_v24  ;;  %v4114_v2 = vpack.c.bf16 %v3171_v10, %v3167_v48  ;;  %v4084_v61 = vpack.c.bf16 %v3168_v16, %v3164_v5  ;;  %v3192_v1 = vld [vmem:[#allocation7 + $0x120] sm:$0xff]  ;;  %v3194_v54 = vld [vmem:[#allocation7 + $0x130] sm:$0xff]  ;;  %v3201_v3 = vld [vmem:[#allocation7 + $0x168] sm:$0xff] }
 0x499   :  { %4079 = vmatprep.subr.bf16.mxu1 %v4078_v14  ;;  %4111 = vmatprep.subr.bf16.mxu0 %v4110_v55  ;;  %v4116_v11 = vpack.c.bf16 %v3170_v62, %v3166_v18  ;;  %v4086_v51 = vpack.c.bf16 %v3177_v8, %v3173_v0  ;;  %v4118_v22 = vpack.c.bf16 %v3179_v7, %v3175_v6  ;;  %v3199_v15 = vld [vmem:[#allocation7 + $0x158] sm:$0xff]  ;;  %v3196_v36 = vld [vmem:[#allocation7 + $0x140] sm:$0xff]  ;;  %v3202_v5 = vld [vmem:[#allocation7 + $0x170] sm:$0xff] }
 0x49a   :  { %4081 = vmatpush1.bf16.msra.mxu1 %v4080_v40  ;;  %4113 = vmatpush1.bf16.msra.mxu0 %v4112_v9  ;;  %v4088_v21 = vpack.c.bf16 %v3176_v23, %v3172_v17  ;;  %v4120_v4 = vpack.c.bf16 %v3178_v20, %v3174_v19  ;;  %v4096_v53 = vpack.c.bf16 %v3192_v1, %v3188_v59  ;;  %v3197_v40 = vld [vmem:[#allocation7 + $0x148] sm:$0xff]  ;;  %v3203_v9 = vld [vmem:[#allocation7 + $0x178] sm:$0xff]  ;;  %v3200_v48 = vld [vmem:[#allocation7 + $0x160] sm:$0xff] }
 0x49b   :  { %3099 = vrot.lane.b32.xlu0 %v3012_v57, %s4397_s2  ;;  %3085 = vrot.lane.b32.xlu1 %v3078_v29, %s4391_s28  ;;  %v4128_v55 = vpack.c.bf16 %v3194_v54, %v3190_v44  ;;  %v4098_v24 = vpack.c.bf16 %v3201_v3, %v3197_v40  ;;  %v4130_v10 = vpack.c.bf16 %v3203_v9, %v3199_v15  ;;  %v3205_v16 = vld [vmem:[#allocation7 + $0x188] sm:$0xff]  ;;  %v3207_v62 = vld [vmem:[#allocation7 + $0x198] sm:$0xff]  ;;  %v3208_v6 = vld [vmem:[#allocation7 + $0x1a0] sm:$0xff] }
 0x49c   :  { %4083 = vmatprep.subr.bf16.mxu1 %v4082_v45  ;;  %4115 = vmatprep.subr.bf16.mxu0 %v4114_v2  ;;  %v4100_v45 = vpack.c.bf16 %v3200_v48, %v3196_v36  ;;  %v3198_v2 = vld [vmem:[#allocation7 + $0x150] sm:$0xff]  ;;  %v3211_v0 = vld [vmem:[#allocation7 + $0x1b8] sm:$0xff]  ;;  %v3213_v23 = vld [vmem:[#allocation7 + $0x1c8] sm:$0xff] }
 0x49d   :  { %v4132_v18 = vpack.c.bf16 %v3202_v5, %v3198_v2  ;;  %v3206_v7 = vld [vmem:[#allocation7 + $0x190] sm:$0xff]  ;;  %v3217_v19 = vld [vmem:[#allocation7 + $0x1e8] sm:$0xff]  ;;  %v3404_v1 = vld [vmem:[#allocation8] sm:$0xff] }
 0x49e   :  { %4085 = vmatpush1.bf16.msra.mxu1 %v4084_v61  ;;  %4117 = vmatpush1.bf16.msra.mxu0 %v4116_v11  ;;  %v3209_v61 = vld [vmem:[#allocation7 + $0x1a8] sm:$0xff]  ;;  %v4134_v11 = vpack.c.bf16 %v3211_v0, %v3207_v62  ;;  %v3422_v54 = vld [vmem:[#allocation8 + $0x90] sm:$0xff]  ;;  %v3423_v40 = vld [vmem:[#allocation8 + $0x98] sm:$0xff] }
 0x49f   :  { %3093 = vrot.lane.b32.xlu0 %v3079_v32, %s4398_s3  ;;  %3101 = vrot.lane.b32.xlu1 %v3080_v33, %s4397_s2  ;;  %v3181_v32 = vld [vmem:[#allocation7 + $0xc8] sm:$0xff]  ;;  %v4102_v8 = vpack.c.bf16 %v3209_v61, %v3205_v16  ;;  %v3454_v3 = vld [vmem:[#allocation8 + $0x190] sm:$0xff]  ;;  %v3455_v15 = vld [vmem:[#allocation8 + $0x198] sm:$0xff]  ;;  %v4146_v5 = vpack.c.bf16 %v3423_v40, %v3422_v54 }
 0x4a0   :  { %4087 = vmatprep.subr.bf16.mxu1 %v4086_v51  ;;  %4119 = vmatprep.subr.bf16.mxu0 %v4118_v22  ;;  %v3185_v33 = vld [vmem:[#allocation7 + $0xe8] sm:$0xff]  ;;  %v3204_v51 = vld [vmem:[#allocation7 + $0x180] sm:$0xff]  ;;  %v3210_v22 = vld [vmem:[#allocation7 + $0x1b0] sm:$0xff]  ;;  %v4178_v16 = vpack.c.bf16 %v3455_v15, %v3454_v3 }
 0x4a1   :  { %v4104_v17 = vpack.c.bf16 %v3208_v6, %v3204_v51  ;;  %v4136_v20 = vpack.c.bf16 %v3210_v22, %v3206_v7  ;;  %v3437_v44 = vld [vmem:[#allocation8 + $0x108] sm:$0xff]  ;;  %v3424_v61 = vld [vmem:[#allocation8 + $0xa0] sm:$0xff]  ;;  %v3415_v54 = vld [vmem:[#allocation8 + $0x58] sm:$0xff] }
 0x4a2   :  { %4089 = vmatpush1.bf16.msra.mxu1 %v4088_v21  ;;  %4121 = vmatpush1.bf16.msra.mxu0 %v4120_v4  ;;  %v4106_v21 = vpack.c.bf16 %v3217_v19, %v3213_v23  ;;  %v3215_v4 = vld [vmem:[#allocation7 + $0x1d8] sm:$0xff]  ;;  %v3425_v62 = vld [vmem:[#allocation8 + $0xa8] sm:$0xff]  ;;  %v3456_v0 = vld [vmem:[#allocation8 + $0x1a0] sm:$0xff] }
 0x4a3   :  { %v3409_v7 = vld [vmem:[#allocation8 + $0x28] sm:$0xff]  ;;  %v4150_v22 = vpack.c.bf16 %v3425_v62, %v3424_v61  ;;  %v3440_v19 = vld [vmem:[#allocation8 + $0x120] sm:$0xff]  ;;  %v3446_v3 = vld [vmem:[#allocation8 + $0x150] sm:$0xff] }
 0x4a4   :  { %v3447_v15 = vld [vmem:[#allocation8 + $0x158] sm:$0xff]  ;;  %v3449_v62 = vld [vmem:[#allocation8 + $0x168] sm:$0xff] }
 0x509   :  { %v3092_v34 = vpop.permute.xlu1 %3091  ;;  %v3084_v35 = vpop.permute.xlu0 %3083 }
 0x50a   :  { %v3106_v12 = vsel %vm3105_vm3, %v3009_v13, %v3084_v35  ;;  %v4090_v35 = vpack.c.bf16 %v3185_v33, %v3181_v32 }
 0x50b   :  { %v3109_v37 = vsel %vm3108_vm4, %v3106_v12, %v3092_v34  ;;  %v3183_v34 = vld [vmem:[#allocation7 + $0xd8] sm:$0xff] }
 0x50c   :  { %v3187_v12 = vld [vmem:[#allocation7 + $0xf8] sm:$0xff]  ;;  %4091 = vmatprep.subr.bf16.mxu1 %v4090_v35  ;;  %v3421_v35 = vld [vmem:[#allocation8 + $0x88] sm:$0xff] }
 0x50d   :  { %v3100_v38 = vpop.permute.xlu0 %3099  ;;  %v3086_v39 = vpop.permute.xlu1 %3085 }
 0x50e   :  { %v3112_v42 = vsel %vm3111_vm5, %v3109_v37, %v3100_v38  ;;  %v3107_v56 = vsel %vm3105_vm3, %v3077_v30, %v3086_v39  ;;  %v3180_v37 = vld [vmem:[#allocation7 + $0xc0] sm:$0xff]  ;;  %v4122_v39 = vpack.c.bf16 %v3187_v12, %v3183_v34 }
 0x50f   :  { %v4923_v27 = vadd.f32 %v4263_v43, %v3112_v42  ;;  %v3184_v38 = vld [vmem:[#allocation7 + $0xe0] sm:$0xff]  ;;  %v3182_v43 = vld [vmem:[#allocation7 + $0xd0] sm:$0xff] }
 0x510   :  { %v4092_v42 = vpack.c.bf16 %v3184_v38, %v3180_v37  ;;  %4123 = vmatprep.subr.bf16.mxu0 %v4122_v39  ;;  %v3420_v34 = vld [vmem:[#allocation8 + $0x80] sm:$0xff]  ;;  %v3453_v38 = vld [vmem:[#allocation8 + $0x188] sm:$0xff] }
 0x511   :  { %3118 = vadd.xlane.f32.xlu0 %v4923_v27  ;;  %v3094_v58 = vpop.permute.xlu0 %3093  ;;  %v3102_v31 = vpop.permute.xlu1 %3101  ;;  %v3452_v12 = vld [vmem:[#allocation8 + $0x180] sm:$0xff]  ;;  %v4142_v37 = vpack.c.bf16 %v3421_v35, %v3420_v34  ;;  %v3443_v34 = vld [vmem:[#allocation8 + $0x138] sm:$0xff] }
 0x512   :  { %v3110_v46 = vsel %vm3108_vm4, %v3107_v56, %v3094_v58  ;;  %v3186_v56 = vld [vmem:[#allocation7 + $0xf0] sm:$0xff]  ;;  %4093 = vmatpush1.bf16.msra.mxu1 %v4092_v42  ;;  %v4174_v39 = vpack.c.bf16 %v3453_v38, %v3452_v12  ;;  %v3428_v35 = vld [vmem:[#allocation8 + $0xc0] sm:$0xff]  ;;  %v3429_v12 = vld [vmem:[#allocation8 + $0xc8] sm:$0xff] }
 0x513   :  { %v3113_v47 = vsel %vm3111_vm5, %v3110_v46, %v3102_v31  ;;  %v4124_v58 = vpack.c.bf16 %v3186_v56, %v3182_v43  ;;  %v3189_v31 = vld [vmem:[#allocation7 + $0x108] sm:$0xff] }
 0x514   :  { %v4926_v49 = vadd.f32 %v4264_v41, %v3113_v47  ;;  %v3193_v46 = vld [vmem:[#allocation7 + $0x128] sm:$0xff]  ;;  %v3191_v47 = vld [vmem:[#allocation7 + $0x118] sm:$0xff] }
 0x515   :  { %4125 = vmatpush1.bf16.msra.mxu0 %v4124_v58  ;;  %v4094_v41 = vpack.c.bf16 %v3193_v46, %v3189_v31  ;;  %v4126_v14 = vpack.c.bf16 %v3195_v52, %v3191_v47  ;;  %v3675_v52 = vld [vmem:[%s4981_s5] ss:$0 sm:$0xff]  ;;  %v3461_v38 = vld [vmem:[#allocation8 + $0x1c8] sm:$0xff] }
 0x516   :  { %3120 = vadd.xlane.f32.xlu1 %v4926_v49 }
 0x517   :  { %4095 = vmatprep.subr.bf16.mxu1 %v4094_v41  ;;  %4127 = vmatprep.subr.bf16.mxu0 %v4126_v14  ;;  %v3674_v41 = vld [vmem:[%s4980_s4] ss:$0 sm:$0xff]  ;;  %v3405_v14 = vld [vmem:[#allocation8 + $0x8] sm:$0xff] }
 0x518   :  { %4097 = vmatpush1.bf16.msra.mxu1 %v4096_v53  ;;  %v3436_v53 = vld [vmem:[#allocation8 + $0x100] sm:$0xff]  ;;  %v4144_v36 = vpack.c.bf16 %v3405_v14, %v3404_v1  ;;  %v3463_v1 = vld [vmem:[#allocation8 + $0x1d8] sm:$0xff] }
 0x519   :  { %4129 = vmatpush1.bf16.msra.mxu0 %v4128_v55  ;;  %4099 = vmatprep.subr.bf16.mxu1 %v4098_v24  ;;  %v4176_v48 = vpack.c.bf16 %v3437_v44, %v3436_v53  ;;  %v3414_v44 = vld [vmem:[#allocation8 + $0x50] sm:$0xff] }
 0x51a   :  { %4131 = vmatprep.subr.bf16.mxu0 %v4130_v10  ;;  %v3406_v10 = vld [vmem:[#allocation8 + $0x10] sm:$0xff] }
 0x51c   :  { %4101 = vmatpush1.bf16.msra.mxu1 %v4100_v45  ;;  %v3407_v45 = vld [vmem:[#allocation8 + $0x18] sm:$0xff] }
 0x51d   :  { %4133 = vmatpush1.bf16.msra.mxu0 %v4132_v18  ;;  %4103 = vmatprep.subr.bf16.mxu1 %v4102_v8  ;;  %v3439_v18 = vld [vmem:[#allocation8 + $0x118] sm:$0xff]  ;;  %v3457_v8 = vld [vmem:[#allocation8 + $0x1a8] sm:$0xff]  ;;  %v4148_v51 = vpack.c.bf16 %v3407_v45, %v3406_v10  ;;  %v4164_v10 = vpack.c.bf16 %v3415_v54, %v3414_v44  ;;  %v4196_v45 = vpack.c.bf16 %v3447_v15, %v3446_v3  ;;  %v3676_v15 = vld [vmem:[%s4985_s9] ss:$0 sm:$0xff]  ;;  %s4353_s9 = scalar_lea.vmem %s3635_s13, 256 }
 0x51e   :  { %4135 = vmatprep.subr.bf16.mxu0 %v4134_v11  ;;  %v4182_v23 = vpack.c.bf16 %v3457_v8, %v3456_v0  ;;  %v3434_v8 = vld [vmem:[#allocation8 + $0xf0] sm:$0xff]  ;;  %p4354_p4 = scmp.ne.s32.totalorder %s3635_s13, %s4353_s9  ;;  %p4359_p6 = scmp.lt.s32.totalorder %s4353_s9, %s4353_s9 }
 0x520   :  { %4105 = vmatpush1.bf16.msra.mxu1 %v4104_v17  ;;  %p4360_p7 = por %p4359_p6, %p4358_p5 }
 0x521   :  { %4137 = vmatpush1.bf16.msra.mxu0 %v4136_v20  ;;  %4107 = vmatprep.subr.bf16.mxu1 %v4106_v21  ;;  %v3441_v20 = vld [vmem:[#allocation8 + $0x128] sm:$0xff]  ;;  %v3426_v21 = vld [vmem:[#allocation8 + $0xb0] sm:$0xff] }
 0x522   :  { %p4361_p8 = pnand %p4360_p7, %p4354_p4 }
 0x59e   :  { %v3119_v13 = vpop.xlane.xlu0 %3118 }
 0x59f   :  { %v3122_v57 = vmul.f32 0.0078125, %v3119_v13  ;;  %v3219_v13 = vld [vmem:[#allocation7 + $0x1f8] sm:$0xff] }
 0x5a1   :  { %v4930_v25 = vsub.f32 %v4923_v27, %v3122_v57  ;;  %v3212_v57 = vld [vmem:[#allocation7 + $0x1c0] sm:$0xff] }
 0x5a3   :  { %v3121_v63 = vpop.xlane.xlu1 %3120  ;;  %v3126_v26 = vmul.f32 %v4930_v25, %v4930_v25 }
 0x5a4   :  { %v3123_v28 = vmul.f32 0.0078125, %v3121_v63  ;;  %v4138_v63 = vpack.c.bf16 %v3219_v13, %v3215_v4  ;;  %v3427_v4 = vld [vmem:[#allocation8 + $0xb8] sm:$0xff]  ;;  %v3458_v13 = vld [vmem:[#allocation8 + $0x1b0] sm:$0xff] }
 0x5a5   :  { %3128 = vadd.xlane.f32.xlu0 %v3126_v26  ;;  %v3216_v26 = vld [vmem:[#allocation7 + $0x1e0] sm:$0xff] }
 0x5a6   :  { %v4935_v29 = vsub.f32 %v4926_v49, %v3123_v28  ;;  %v3214_v28 = vld [vmem:[#allocation7 + $0x1d0] sm:$0xff]  ;;  %v4108_v32 = vpack.c.bf16 %v3216_v26, %v3212_v57  ;;  %4139 = vmatprep.subr.bf16.mxu0 %v4138_v63  ;;  %v3459_v57 = vld [vmem:[#allocation8 + $0x1b8] sm:$0xff]  ;;  %v4184_v63 = vpack.c.bf16 %v3441_v20, %v3440_v19 }
 0x5a7   :  { %v3410_v26 = vld [vmem:[#allocation8 + $0x30] sm:$0xff]  ;;  %v3451_v20 = vld [vmem:[#allocation8 + $0x178] sm:$0xff] }
 0x5a8   :  { %v3127_v30 = vmul.f32 %v4935_v29, %v4935_v29  ;;  %4109 = vmatpush1.bf16.msra.mxu1 %v4108_v32  ;;  %v4186_v32 = vpack.c.bf16 %v3459_v57, %v3458_v13  ;;  %v3450_v19 = vld [vmem:[#allocation8 + $0x170] sm:$0xff]  ;;  %v3232_v13 = vsub.s32 2, %v4555_v60 }
 0x5a9   :  { %4143 = vmatprep.subr.bf16.mxu1 %v4142_v37  ;;  %v3460_v37 = vld [vmem:[#allocation8 + $0x1c0] sm:$0xff]  ;;  %v3220_v57 = vld [vmem:[%s4983_s7] sm:$0xf] }
 0x5aa   :  { %3130 = vadd.xlane.f32.xlu0 %v3127_v30  ;;  %v3218_v30 = vld [vmem:[#allocation7 + $0x1f0] sm:$0xff] }
 0x5ab   :  { %v4140_v33 = vpack.c.bf16 %v3218_v30, %v3214_v28  ;;  %v3411_v28 = vld [vmem:[#allocation8 + $0x38] sm:$0xff]  ;;  %v4154_v30 = vpack.c.bf16 %v3427_v4, %v3426_v21  ;;  %v4204_v21 = vpack.c.bf16 %v3451_v20, %v3450_v19  ;;  %v3224_v4 = vsub.s32 0, %v4555_v60 }
 0x5ad   :  { %4141 = vmatpush1.bf16.msra.mxu0 %v4140_v33  ;;  %v3442_v33 = vld [vmem:[#allocation8 + $0x130] sm:$0xff] }
 0x5ae   :  { %4175 = vmatprep.subr.bf16.mxu0 %v4174_v39  ;;  %v4156_v39 = vpack.c.bf16 %v3411_v28, %v3410_v26  ;;  %v3225_v26 = vrot.slane %v3220_v57, %v3224_v4  ;;  %v3233_v28 = vrot.slane %v3220_v57, %v3232_v13 }
 0x632   :  { %v3129_v42 = vpop.xlane.xlu0 %3128 }
 0x633   :  { %v3132_v43 = vmul.f32 0.0078125, %v3129_v42  ;;  %v4188_v42 = vpack.c.bf16 %v3443_v34, %v3442_v33 }
 0x635   :  { %v3134_v56 = vadd.f32 1e-05, %v3132_v43  ;;  %v3412_v43 = vld [vmem:[#allocation8 + $0x40] sm:$0xff] }
 0x637   :  { %4259 = vrsqrt.f32 %v3134_v56  ;;  %v3131_v58 = vpop.xlane.xlu0 %3130  ;;  %v3413_v56 = vld [vmem:[#allocation8 + $0x48] sm:$0xff] }
 0x638   :  { %v3133_v31 = vmul.f32 0.0078125, %v3131_v58  ;;  %v4158_v58 = vpack.c.bf16 %v3429_v12, %v3428_v35  ;;  %v4160_v14 = vpack.c.bf16 %v3413_v56, %v3412_v43 }
 0x63a   :  { %v3135_v46 = vadd.f32 1e-05, %v3133_v31  ;;  %v4190_v31 = vpack.c.bf16 %v3461_v38, %v3460_v37 }
 0x63c   :  { %4261 = vrsqrt.f32 %v3135_v46  ;;  %v3444_v46 = vld [vmem:[#allocation8 + $0x140] sm:$0xff] }
 0x641   :  { %v4260_v47 = vpop.eup %4259 }
 0x642   :  { %v3138_v59 = vmul.f32 %v4260_v47, %v4930_v25  ;;  %v3438_v25 = vld [vmem:[#allocation8 + $0x110] sm:$0xff]  ;;  %v3445_v47 = vld [vmem:[#allocation8 + $0x148] sm:$0xff] }
 0x643   :  { %v4180_v6 = vpack.c.bf16 %v3439_v18, %v3438_v25  ;;  %v4192_v53 = vpack.c.bf16 %v3445_v47, %v3444_v46  ;;  %v3417_v25 = vld [vmem:[#allocation8 + $0x68] sm:$0xff]  ;;  %v3448_v18 = vld [vmem:[#allocation8 + $0x160] sm:$0xff] }
 0x644   :  { %v3146_v55 = vmul.f32 %v3674_v41, %v3138_v59  ;;  %v3462_v59 = vld [vmem:[#allocation8 + $0x1d0] sm:$0xff]  ;;  %v4200_v0 = vpack.c.bf16 %v3449_v62, %v3448_v18 }
 0x645   :  { %v4194_v40 = vpack.c.bf16 %v3463_v1, %v3462_v59 }
 0x646   :  { %v4262_v24 = vpop.eup %4261  ;;  %v3154_v9 = vadd.f32 %v3675_v52, %v3146_v55 }
 0x647   :  { %v3139_v2 = vmul.f32 %v4262_v24, %v4935_v29  ;;  %v3408_v29 = vld [vmem:[#allocation8 + $0x20] sm:$0xff] }
 0x648   :  { %3307 = vmatmul.mubr.f32.vlgmr.msra.gmra.mrb[30].mxu1 %v3154_v9  ;;  %3384 = vmatmul.mubr.f32.vlgmr.msra.gmra.mrb[20].mxu0 %v3154_v9  ;;  %v3432_v24 = vld [vmem:[#allocation8 + $0xe0] sm:$0xff]  ;;  %v3433_v9 = vld [vmem:[#allocation8 + $0xe8] sm:$0xff] }
 0x649   :  { %3312 = vmatprep.mubr.f32.mxu1 %v4393_v50  ;;  %3389 = vmatprep.mubr.f32.mxu0 %v4393_v50  ;;  %v3147_v11 = vmul.f32 %v3674_v41, %v3139_v2  ;;  %v4152_v50 = vpack.c.bf16 %v3409_v7, %v3408_v29  ;;  %v3430_v41 = vld [vmem:[#allocation8 + $0xd0] sm:$0xff]  ;;  %v4166_v2 = vpack.c.bf16 %v3433_v9, %v3432_v24  ;;  %v3467_v29 = vld [vmem:[#allocation8 + $0x1f8] sm:$0xff] }
 0x64a   :  { %4145 = vmatpush3.bf16.msra.mxu1 %v4144_v36  ;;  %4177 = vmatpush3.bf16.msra.mxu0 %v4176_v48  ;;  %v3464_v36 = vld [vmem:[#allocation8 + $0x1e0] sm:$0xff]  ;;  %v3465_v48 = vld [vmem:[#allocation8 + $0x1e8] sm:$0xff]  ;;  %v3418_v7 = vld [vmem:[#allocation8 + $0x70] sm:$0xff] }
 0x64b   :  { %v3155_v17 = vadd.f32 %v3675_v52, %v3147_v11  ;;  %4147 = vmatprep.subr.bf16.mxu1 %v4146_v5  ;;  %4179 = vmatprep.subr.bf16.mxu0 %v4178_v16  ;;  %v3431_v52 = vld [vmem:[#allocation8 + $0xd8] sm:$0xff]  ;;  %v4198_v5 = vpack.c.bf16 %v3465_v48, %v3464_v36  ;;  %v3416_v16 = vld [vmem:[#allocation8 + $0x60] sm:$0xff] }
 0x64c   :  { %v4162_v55 = vpack.c.bf16 %v3431_v52, %v3430_v41  ;;  %v4168_v61 = vpack.c.bf16 %v3417_v25, %v3416_v16  ;;  %v3435_v11 = vld [vmem:[#allocation8 + $0xf8] sm:$0xff] }
 0x64d   :  { %3313 = vmatmul.mubr.f32.gmra.mrb[32].mxu1 %v3155_v17  ;;  %3390 = vmatmul.mubr.f32.gmra.mrb[22].mxu0 %v3155_v17  ;;  %v3419_v17 = vld [vmem:[#allocation8 + $0x78] sm:$0xff] }
 0x64e   :  { %4149 = vmatpush3.bf16.msra.mxu1 %v4148_v51  ;;  %4181 = vmatpush3.bf16.msra.mxu0 %v4180_v6  ;;  %v3466_v51 = vld [vmem:[#allocation8 + $0x1f0] sm:$0xff]  ;;  %v4170_v6 = vpack.c.bf16 %v3435_v11, %v3434_v8 }
 0x64f   :  { %4151 = vmatprep.subr.bf16.mxu1 %v4150_v22  ;;  %4183 = vmatprep.subr.bf16.mxu0 %v4182_v23  ;;  %v4202_v22 = vpack.c.bf16 %v3467_v29, %v3466_v51  ;;  %v4172_v23 = vpack.c.bf16 %v3419_v17, %v3418_v7 }
 0x652   :  { %4153 = vmatpush3.bf16.msra.mxu1 %v4152_v50  ;;  %4185 = vmatpush3.bf16.msra.mxu0 %v4184_v63  ;;  %v3228_v50 = vsub.s32 1, %v4555_v60  ;;  %v3236_v63 = vsub.s32 3, %v4555_v60 }
 0x653   :  { %4155 = vmatprep.subr.bf16.mxu1 %v4154_v30  ;;  %4187 = vmatprep.subr.bf16.mxu0 %v4186_v32 }
 0x654   :  { %v3229_v30 = vrot.slane %v3220_v57, %v3228_v50  ;;  %v3237_v32 = vrot.slane %v3220_v57, %v3236_v63 }
 0x656   :  { %4157 = vmatpush3.bf16.msra.mxu1 %v4156_v39  ;;  %4189 = vmatpush3.bf16.msra.mxu0 %v4188_v42 }
 0x657   :  { %4159 = vmatprep.subr.bf16.mxu1 %v4158_v58  ;;  %4191 = vmatprep.subr.bf16.mxu0 %v4190_v31 }
 0x65a   :  { %4161 = vmatpush3.bf16.msra.mxu1 %v4160_v14  ;;  %4193 = vmatpush3.bf16.msra.mxu0 %v4192_v53 }
 0x65b   :  { %4163 = vmatprep.subr.bf16.mxu1 %v4162_v55  ;;  %4195 = vmatprep.subr.bf16.mxu0 %v4194_v40 }
 0x65e   :  { %4165 = vmatpush3.bf16.msra.mxu1 %v4164_v10  ;;  %4197 = vmatpush3.bf16.msra.mxu0 %v4196_v45 }
 0x65f   :  { %4167 = vmatprep.subr.bf16.mxu1 %v4166_v2  ;;  %4199 = vmatprep.subr.bf16.mxu0 %v4198_v5 }
 0x662   :  { %4169 = vmatpush3.bf16.msra.mxu1 %v4168_v61  ;;  %4201 = vmatpush3.bf16.msra.mxu0 %v4200_v0 }
 0x663   :  { %4171 = vmatprep.subr.bf16.mxu1 %v4170_v6  ;;  %4203 = vmatprep.subr.bf16.mxu0 %v4202_v22 }
 0x666   :  { %4173 = vmatpush3.bf16.msra.mxu1 %v4172_v23  ;;  %4205 = vmatpush3.bf16.msra.mxu0 %v4204_v21 }
 0x71b   :  { %v3308_v33 = vpop.f32.mrb[30].mxu1  ;;  %v3385_v34 = vpop.f32.mrb[20].mxu0 }
 0x71c   :  { %v3309_v35 = vadd.f32 %v3308_v33, %v3225_v26  ;;  %v3386_v12 = vadd.f32 %v3385_v34, %v3233_v28  ;;  %v3310_v37 = vpop.f32.mrb[31].mxu1  ;;  %v3387_v38 = vpop.f32.mrb[21].mxu0 }
 0x71d   :  { %v3311_v39 = vadd.f32 %v3310_v37, %v3229_v30  ;;  %v3388_v42 = vadd.f32 %v3387_v38, %v3237_v32 }
 0x71e   :  { %v3396_v58 = vmax.f32 %v3309_v35, 0.0  ;;  %v3398_v31 = vmax.f32 %v3386_v12, 0.0 }
 0x71f   :  { %v3397_v43 = vmax.f32 %v3311_v39, 0.0  ;;  %v3399_v56 = vmax.f32 %v3388_v42, 0.0 }
 0x720   :  { %v3314_v46 = vpop.f32.mrb[32].mxu1  ;;  %v3391_v47 = vpop.f32.mrb[22].mxu0 }
 0x721   :  { %v3315_v41 = vadd.f32 %v3314_v46, %v3225_v26  ;;  %v3392_v60 = vadd.f32 %v3391_v47, %v3233_v28  ;;  %v3316_v52 = vpop.f32.mrb[33].mxu1  ;;  %v3393_v59 = vpop.f32.mrb[23].mxu0  ;;  %3539 = vmatprep.mubr.f32.mxu1 %v3397_v43  ;;  %3614 = vmatprep.mubr.f32.mxu0 %v3399_v56 }
 0x722   :  { %v3317_v1 = vadd.f32 %v3316_v52, %v3229_v30  ;;  %v3394_v14 = vadd.f32 %v3393_v59, %v3237_v32  ;;  %3540 = vmatmul.mubr.f32.vlgmr.msra.gmra.mrb[34].mxu1 %v3396_v58  ;;  %3615 = vmatmul.mubr.f32.vlgmr.msra.gmra.mrb[24].mxu0 %v3398_v31 }
 0x723   :  { %v3400_v54 = vmax.f32 %v3315_v41, 0.0  ;;  %v3402_v55 = vmax.f32 %v3392_v60, 0.0 }
 0x724   :  { %v3401_v53 = vmax.f32 %v3317_v1, 0.0  ;;  %v3403_v44 = vmax.f32 %v3394_v14, 0.0 }
 0x726   :  { %3544 = vmatprep.mubr.f32.mxu1 %v3401_v53  ;;  %3619 = vmatprep.mubr.f32.mxu0 %v3403_v44 }
 0x727   :  { %3545 = vmatmul.mubr.f32.gmra.mrb[36].mxu1 %v3400_v54  ;;  %3620 = vmatmul.mubr.f32.gmra.mrb[26].mxu0 %v3402_v55 }
 0x7f5   :  { %v3759_v40 = vpop.f32.mrb[34].mxu1  ;;  %v3797_v3 = vpop.f32.mrb[24].mxu0 }
 0x7f6   :  { %v3760_v24 = vpop.f32.mrb[35].mxu1  ;;  %v3798_v9 = vpop.f32.mrb[25].mxu0 }
 0x7f7   :  { %v3761_v36 = vadd.f32 %v3760_v24, %v3759_v40  ;;  %v3799_v48 = vadd.f32 %v3798_v9, %v3797_v3 }
 0x7f9   :  { %v3542_v10 = vadd.f32 %v3761_v36, %v3676_v15 }
 0x7fa   :  { %v3762_v45 = vpop.f32.mrb[36].mxu1  ;;  %v3800_v2 = vpop.f32.mrb[26].mxu0 }
 0x7fb   :  { %v3617_v5 = vadd.f32 %v3799_v48, %v3542_v10  ;;  %v3763_v16 = vpop.f32.mrb[37].mxu1  ;;  %v3801_v25 = vpop.f32.mrb[27].mxu0 }
 0x7fc   :  { %v3764_v18 = vadd.f32 %v3763_v16, %v3762_v45  ;;  %v3802_v61 = vadd.f32 %v3801_v25, %v3800_v2 }
 0x7fd   :  { %v3625_v62 = vadd.f32 %v3617_v5, %v4923_v27 }
 0x7fe   :  { %v3547_v0 = vadd.f32 %v3764_v18, %v3676_v15 }
 0x7ff   :  { %3627 = vst [vmem:[#allocation10] sm:$0xff] %v3625_v62 }
 0x800   :  { %v3622_v8 = vadd.f32 %v3802_v61, %v3547_v0 }
 0x802   :  { %v3626_v11 = vadd.f32 %v3622_v8, %v4926_v49 }
 0x804   :  { %3628 = vst [vmem:[#allocation10 + $0x8] sm:$0xff] %v3626_v11 }
 0x805   :  { %4364 = shalt.err (!%p4361_p8)
}
 0x806   :  { %s4365_s17 = scalar_lea.hbm %s4986_s10, 256 }
 0x807   :  { %p4366_p9 = scmp.ne.s32.totalorder %s4986_s10, %s4365_s17  ;;  %p4369_p10 = scmp.lt.u32.totalorder %s4365_s17, %s4986_s10 }
 0x809   :  { %p4371_p11 = pnand %p4369_p10, %p4366_p9 }
 0x80b   :  { %4374 = shalt.err (!%p4371_p11)
}
 0x80c   :  { %3640 = dma.vmem_to_hbm [thread:$0]  %s3635_s13, 256, %s4986_s10, [#allocation4], %s4387_s1, %s4387_s1, %s4388_s14  }
 0x80d   :  { %4381 = dma.done.wait [#allocation4], 256  }
 0x80e   :  { %4382 = vsyncadd [#allocation4], 4294967040 }
 0x80f   :  { %3644 = vsyncpa [#allocation3], 1 }
 0x810   :  { %3645 = vsyncpa [#allocation6], 1 }
 0x811   :  { %3646 = vsyncpa [#allocation9], 1 }
 0x812   :  { %3647 = vsyncpa [#allocation4], 1 }

// kernel: tpu_custom_call.1
= control target key start
LH: loop header
LB: loop body
LE: loop exit
PB: predicated region body
PF: predicated region fallthrough
CT: control target
= control target key end

     0   :  { %15 = vsyncpa [#allocation3], 0  ;;  %s4976_s0 = inlined_call_operand.hbm [shape: f32[2,8,128], index: 0, kind: input, shape index: {}]   ;;  %s4977_s1 = inlined_call_operand.hbm [shape: f32[128,1152], index: 1, kind: input, shape index: {}]   ;;  %s4978_s2 = inlined_call_operand.vmem [shape: f32[1,128], index: 2, kind: input, shape index: {}]   ;;  %s4979_s3 = inlined_call_operand.vmem [shape: f32[1,128], index: 3, kind: input, shape index: {}]   ;;  %s4980_s4 = inlined_call_operand.vmem [shape: f32[1,128], index: 4, kind: input, shape index: {}]   ;;  %s4981_s5 = inlined_call_operand.vmem [shape: f32[1,128], index: 5, kind: input, shape index: {}]   ;;  %s4982_s6 = inlined_call_operand.hbm [shape: f32[128,512], index: 6, kind: input, shape index: {}]   ;;  %s4983_s7 = inlined_call_operand.vmem [shape: f32[1,512], index: 7, kind: input, shape index: {}]   ;;  %s4984_s8 = inlined_call_operand.hbm [shape: f32[512,128], index: 8, kind: input, shape index: {}]   ;;  %s4985_s9 = inlined_call_operand.vmem [shape: f32[1,128], index: 9, kind: input, shape index: {}]   ;;  %s4986_s10 = inlined_call_operand.hbm [shape: f32[2,8,128], index: 10, kind: output, shape index: {}]  }
   0x1   :  { %16 = vsyncpa [#allocation6], 0 }
   0x2   :  { %17 = vsyncpa [#allocation9], 0 }
   0x3   :  { %18 = vsyncpa [#allocation4], 0  ;;  %s4383_s13 = smov [#allocation5]   ;;  %s4265_s17 = scalar_lea.hbm %s4977_s1, 18432 }
   0x4   :  { %s36_s14 = sshll.u32 %s4383_s13, 4  ;;  %p4266_p0 = scmp.ne.s32.totalorder %s4977_s1, %s4265_s17  ;;  %s37_s14 = int_to_ptr.vmem [resolvable:$true] %s36_s14 }
   0x5   :  { %p4269_p1 = scmp.lt.u32.totalorder %s4265_s17, %s4977_s1 }
   0x7   :  { %p4271_p2 = pnand %p4269_p1, %p4266_p0 }
   0x9   :  { %4274 = shalt.err (!%p4271_p2)
}
   0xa   :  { %s4275_s22 = scalar_lea.vmem %s37_s14, 18432  ;;  %p4280_p4 = scmp.lt.s32.totalorder %s37_s14, %s37_s14 }
   0xb   :  { %p4276_p3 = scmp.ne.s32.totalorder %s37_s14, %s4275_s22  ;;  %p4281_p5 = scmp.lt.s32.totalorder %s4275_s22, %s4275_s22 }
   0xd   :  { %p4282_p6 = por %p4281_p5, %p4280_p4 }
   0xf   :  { %p4283_p7 = pnand %p4282_p6, %p4276_p3 }
  0x11   :  { %4286 = shalt.err (!%p4283_p7)
}
  0x12   :  { %s4384_s23 = smov 1152   ;;  %s4385_s24 = smov 72  }
  0x13   :  { %42 = dma.hbm_to_vmem [thread:$0]  %s4977_s1, 18432, %s37_s14, [#allocation6], %s4384_s23, %s4384_s23, %s4385_s24  }
  0x14   :  { %s4386_s27 = smov [#allocation2]   ;;  %s4287_s11 = scalar_lea.hbm %s4976_s0, 256 }
  0x15   :  { %s24_s28 = sshll.u32 %s4386_s27, 4  ;;  %p4288_p8 = scmp.ne.s32.totalorder %s4976_s0, %s4287_s11  ;;  %s25_s28 = int_to_ptr.vmem [resolvable:$true] %s24_s28 }
  0x16   :  { %p4291_p9 = scmp.lt.u32.totalorder %s4287_s11, %s4976_s0 }
  0x18   :  { %p4293_p10 = pnand %p4291_p9, %p4288_p8 }
  0x1a   :  { %4296 = shalt.err (!%p4293_p10)
}
  0x1b   :  { %s4297_s17 = scalar_lea.vmem %s25_s28, 256  ;;  %p4302_p12 = scmp.lt.s32.totalorder %s25_s28, %s25_s28 }
  0x1c   :  { %p4298_p11 = scmp.ne.s32.totalorder %s25_s28, %s4297_s17  ;;  %p4303_p13 = scmp.lt.s32.totalorder %s4297_s17, %s4297_s17 }
  0x1e   :  { %p4304_p0 = por %p4303_p13, %p4302_p12 }
  0x20   :  { %p4305_p1 = pnand %p4304_p0, %p4298_p11 }
  0x22   :  { %4308 = shalt.err (!%p4305_p1)
}
  0x23   :  { %s4387_s1 = smov 128   ;;  %s4388_s14 = smov 8  }
  0x24   :  { %30 = dma.hbm_to_vmem [thread:$0]  %s4976_s0, 256, %s25_s28, [#allocation3], %s4387_s1, %s4387_s1, %s4388_s14  }
  0x25   :  { %s4389_s20 = smov [#allocation7]   ;;  %s4309_s24 = scalar_lea.hbm %s4982_s6, 8192 }
  0x26   :  { %s56_s21 = sshll.u32 %s4389_s20, 4  ;;  %p4310_p2 = scmp.ne.s32.totalorder %s4982_s6, %s4309_s24  ;;  %s57_s21 = int_to_ptr.vmem [resolvable:$true] %s56_s21 }
  0x27   :  { %p4313_p3 = scmp.lt.u32.totalorder %s4309_s24, %s4982_s6 }
  0x29   :  { %p4315_p4 = pnand %p4313_p3, %p4310_p2 }
  0x2b   :  { %4318 = shalt.err (!%p4315_p4)
}
  0x2c   :  { %s4319_s30 = scalar_lea.vmem %s57_s21, 8192  ;;  %p4324_p6 = scmp.lt.s32.totalorder %s57_s21, %s57_s21 }
  0x2d   :  { %p4320_p5 = scmp.ne.s32.totalorder %s57_s21, %s4319_s30  ;;  %p4325_p7 = scmp.lt.s32.totalorder %s4319_s30, %s4319_s30 }
  0x2f   :  { %p4326_p8 = por %p4325_p7, %p4324_p6 }
  0x31   :  { %p4327_p9 = pnand %p4326_p8, %p4320_p5 }
  0x33   :  { %4330 = shalt.err (!%p4327_p9)
}
  0x34   :  { %s4390_s0 = smov 512   ;;  %s4391_s28 = smov 32  }
  0x35   :  { %62 = dma.hbm_to_vmem [thread:$0]  %s4982_s6, 8192, %s57_s21, [#allocation6], %s4390_s0, %s4390_s0, %s4391_s28  }
  0x36   :  { %s4392_s13 = smov [#allocation8]   ;;  %s4331_s18 = scalar_lea.hbm %s4984_s8, 8192 }
  0x37   :  { %s70_s15 = sshll.u32 %s4392_s13, 4  ;;  %p4332_p10 = scmp.ne.s32.totalorder %s4984_s8, %s4331_s18  ;;  %s71_s15 = int_to_ptr.vmem [resolvable:$true] %s70_s15 }
  0x38   :  { %p4335_p11 = scmp.lt.u32.totalorder %s4331_s18, %s4984_s8 }
  0x3a   :  { %p4337_p12 = pnand %p4335_p11, %p4332_p10 }
  0x3c   :  { %4340 = shalt.err (!%p4337_p12)
}
  0x3d   :  { %s4341_s24 = scalar_lea.vmem %s71_s15, 8192  ;;  %p4346_p0 = scmp.lt.s32.totalorder %s71_s15, %s71_s15 }
  0x3e   :  { %p4342_p13 = scmp.ne.s32.totalorder %s71_s15, %s4341_s24  ;;  %p4347_p1 = scmp.lt.s32.totalorder %s4341_s24, %s4341_s24 }
  0x40   :  { %p4348_p2 = por %p4347_p1, %p4346_p0 }
  0x42   :  { %p4349_p3 = pnand %p4348_p2, %p4342_p13 }
  0x44   :  { %4352 = shalt.err (!%p4349_p3)
}
  0x45   :  { %76 = dma.hbm_to_vmem [thread:$0]  %s4984_s8, 8192, %s71_s15, [#allocation9], %s4387_s1, %s4387_s1, %s4388_s14  }
  0x46   :  { %4375 = dma.done.wait [#allocation3], 256  }
  0x47   :  { %4376 = vsyncadd [#allocation3], 4294967040 }
  0x48   :  { %4377 = dma.done.wait [#allocation6], 26624  }
  0x49   :  { %4378 = vsyncadd [#allocation6], 4294940672 }
  0x4a   :  { %4379 = dma.done.wait [#allocation9], 8192  }
  0x4b   :  { %4380 = vsyncadd [#allocation9], 4294959104  ;;  %v91_v0 = vld [vmem:[#allocation2] sm:$0xff]  ;;  %v92_v1 = vld [vmem:[#allocation2 + $0x8] sm:$0xff]  ;;  %vm4394_vm0 = vmmov 0   ;;  %vm2072_vm2 = vcmask 64512  }
  0x4c   :  { %95 = vadd.xlane.f32.xlu0 %v91_v0  ;;  %v135_v2 = vld [vmem:[#allocation5 + $0x8] sm:$0xff]  ;;  %v144_v3 = vld [vmem:[#allocation5 + $0x50] sm:$0xff]  ;;  %v137_v4 = vld [vmem:[#allocation5 + $0x18] sm:$0xff]  ;;  %vm3105_vm3 = vcmask 261120   ;;  %vm3108_vm4 = vcmask 523264   ;;  %vm3111_vm5 = vcmask 785408  }
  0x4d   :  { %v3918_v5 = vpack.c.bf16 %v144_v3, %v135_v2  ;;  %v146_v6 = vld [vmem:[#allocation5 + $0x60] sm:$0xff]  ;;  %v143_v8 = vld [vmem:[#allocation5 + $0x48] sm:$0xff]  ;;  %v136_v11 = vld [vmem:[#allocation5 + $0x10] sm:$0xff]  ;;  %s4399_s12 = smov [#allocation10]  }
  0x4e   :  { %v134_v7 = vld [vmem:[#allocation5] sm:$0xff]  ;;  %v3950_v9 = vpack.c.bf16 %v146_v6, %v137_v4  ;;  %v145_v12 = vld [vmem:[#allocation5 + $0x58] sm:$0xff]  ;;  %v155_v16 = vld [vmem:[#allocation5 + $0xa8] sm:$0xff]  ;;  %s3634_s13 = sshll.u32 %s4399_s12, 4  ;;  %s3635_s13 = int_to_ptr.vmem [resolvable:$true] %s3634_s13 }
  0x4f   :  { %v3920_v10 = vpack.c.bf16 %v143_v8, %v134_v7  ;;  %v153_v13 = vld [vmem:[#allocation5 + $0x98] sm:$0xff]  ;;  %3919 = vmatprep.subr.bf16.mxu0 %v3918_v5  ;;  %v3952_v14 = vpack.c.bf16 %v145_v12, %v136_v11  ;;  %v162_v15 = vld [vmem:[#allocation5 + $0xe0] sm:$0xff]  ;;  %v164_v17 = vld [vmem:[#allocation5 + $0xf0] sm:$0xff]  ;;  %p4358_p5 = scmp.lt.s32.totalorder %s3635_s13, %s3635_s13 }
  0x50   :  { %97 = vadd.xlane.f32.xlu0 %v92_v1  ;;  %3951 = vmatprep.subr.bf16.mxu1 %v3950_v9  ;;  %v3922_v18 = vpack.c.bf16 %v162_v15, %v153_v13  ;;  %v3954_v19 = vpack.c.bf16 %v164_v17, %v155_v16  ;;  %v152_v20 = vld [vmem:[#allocation5 + $0x90] sm:$0xff]  ;;  %v161_v21 = vld [vmem:[#allocation5 + $0xd8] sm:$0xff]  ;;  %v154_v22 = vld [vmem:[#allocation5 + $0xa0] sm:$0xff] }
  0x51   :  { %3921 = vmatpush1.bf16.msra.mxu0 %v3920_v10  ;;  %3953 = vmatpush1.bf16.msra.mxu1 %v3952_v14  ;;  %v3924_v23 = vpack.c.bf16 %v161_v21, %v152_v20  ;;  %v163_v24 = vld [vmem:[#allocation5 + $0xe8] sm:$0xff]  ;;  %v180_v26 = vld [vmem:[#allocation5 + $0x170] sm:$0xff]  ;;  %v173_v29 = vld [vmem:[#allocation5 + $0x138] sm:$0xff] }
  0x52   :  { %v171_v25 = vld [vmem:[#allocation5 + $0x128] sm:$0xff]  ;;  %3923 = vmatprep.subr.bf16.mxu0 %v3922_v18  ;;  %3955 = vmatprep.subr.bf16.mxu1 %v3954_v19  ;;  %v3956_v27 = vpack.c.bf16 %v163_v24, %v154_v22  ;;  %v182_v30 = vld [vmem:[#allocation5 + $0x180] sm:$0xff]  ;;  %v172_v34 = vld [vmem:[#allocation5 + $0x130] sm:$0xff] }
  0x53   :  { %v3926_v28 = vpack.c.bf16 %v180_v26, %v171_v25  ;;  %v170_v31 = vld [vmem:[#allocation5 + $0x120] sm:$0xff]  ;;  %v3958_v32 = vpack.c.bf16 %v182_v30, %v173_v29  ;;  %v179_v33 = vld [vmem:[#allocation5 + $0x168] sm:$0xff]  ;;  %v181_v35 = vld [vmem:[#allocation5 + $0x178] sm:$0xff] }
  0x54   :  { %v3928_v36 = vpack.c.bf16 %v179_v33, %v170_v31  ;;  %v3960_v37 = vpack.c.bf16 %v181_v35, %v172_v34  ;;  %v189_v46 = vld [vmem:[#allocation5 + $0x1b8] sm:$0xff]  ;;  %v198_v47 = vld [vmem:[#allocation5 + $0x200] sm:$0xff]  ;;  %v191_v48 = vld [vmem:[#allocation5 + $0x1c8] sm:$0xff] }
  0x55   :  { %3925 = vmatpush1.bf16.msra.mxu0 %v3924_v23  ;;  %3957 = vmatpush1.bf16.msra.mxu1 %v3956_v27  ;;  %v3930_v49 = vpack.c.bf16 %v198_v47, %v189_v46  ;;  %v200_v50 = vld [vmem:[#allocation5 + $0x210] sm:$0xff]  ;;  %v197_v52 = vld [vmem:[#allocation5 + $0x1f8] sm:$0xff]  ;;  %v190_v55 = vld [vmem:[#allocation5 + $0x1c0] sm:$0xff] }
  0x56   :  { %3927 = vmatprep.subr.bf16.mxu0 %v3926_v28  ;;  %3959 = vmatprep.subr.bf16.mxu1 %v3958_v32  ;;  %v188_v51 = vld [vmem:[#allocation5 + $0x1b0] sm:$0xff]  ;;  %v3962_v53 = vpack.c.bf16 %v200_v50, %v191_v48  ;;  %v199_v56 = vld [vmem:[#allocation5 + $0x208] sm:$0xff]  ;;  %v209_v60 = vld [vmem:[#allocation5 + $0x258] sm:$0xff]  ;;  %v4393_v50 = vmov 0.0  }
  0x57   :  { %v3932_v54 = vpack.c.bf16 %v197_v52, %v188_v51  ;;  %v3964_v57 = vpack.c.bf16 %v199_v56, %v190_v55  ;;  %v207_v58 = vld [vmem:[#allocation5 + $0x248] sm:$0xff]  ;;  %v216_v59 = vld [vmem:[#allocation5 + $0x290] sm:$0xff]  ;;  %v218_v62 = vld [vmem:[#allocation5 + $0x2a0] sm:$0xff]  ;;  %342 = vmatprep.mubr.f32.mxu0 %v4393_v50  ;;  %419 = vmatprep.mubr.f32.mxu1 %v4393_v50 }
  0x58   :  { %v3934_v61 = vpack.c.bf16 %v216_v59, %v207_v58  ;;  %v206_v63 = vld [vmem:[#allocation5 + $0x240] sm:$0xff]  ;;  %v208_v3 = vld [vmem:[#allocation5 + $0x250] sm:$0xff]  ;;  %v217_v4 = vld [vmem:[#allocation5 + $0x298] sm:$0xff] }
  0x59   :  { %3929 = vmatpush1.bf16.msra.mxu0 %v3928_v36  ;;  %3961 = vmatpush1.bf16.msra.mxu1 %v3960_v37  ;;  %v3968_v5 = vpack.c.bf16 %v217_v4, %v208_v3  ;;  %v225_v6 = vld [vmem:[#allocation5 + $0x2d8] sm:$0xff]  ;;  %v234_v7 = vld [vmem:[#allocation5 + $0x320] sm:$0xff]  ;;  %v227_v8 = vld [vmem:[#allocation5 + $0x2e8] sm:$0xff] }
  0x5a   :  { %3931 = vmatprep.subr.bf16.mxu0 %v3930_v49  ;;  %3963 = vmatprep.subr.bf16.mxu1 %v3962_v53  ;;  %v3938_v9 = vpack.c.bf16 %v234_v7, %v225_v6  ;;  %v236_v10 = vld [vmem:[#allocation5 + $0x330] sm:$0xff]  ;;  %v233_v12 = vld [vmem:[#allocation5 + $0x318] sm:$0xff]  ;;  %v226_v15 = vld [vmem:[#allocation5 + $0x2e0] sm:$0xff] }
  0x5b   :  { %v224_v11 = vld [vmem:[#allocation5 + $0x2d0] sm:$0xff]  ;;  %v3970_v13 = vpack.c.bf16 %v236_v10, %v227_v8  ;;  %v235_v16 = vld [vmem:[#allocation5 + $0x328] sm:$0xff]  ;;  %v245_v20 = vld [vmem:[#allocation5 + $0x378] sm:$0xff] }
  0x5c   :  { %v3940_v14 = vpack.c.bf16 %v233_v12, %v224_v11  ;;  %v3972_v17 = vpack.c.bf16 %v235_v16, %v226_v15  ;;  %v243_v18 = vld [vmem:[#allocation5 + $0x368] sm:$0xff]  ;;  %v252_v19 = vld [vmem:[#allocation5 + $0x3b0] sm:$0xff]  ;;  %v254_v22 = vld [vmem:[#allocation5 + $0x3c0] sm:$0xff] }
  0x5d   :  { %3933 = vmatpush1.bf16.msra.mxu0 %v3932_v54  ;;  %3965 = vmatpush1.bf16.msra.mxu1 %v3964_v57  ;;  %v3942_v21 = vpack.c.bf16 %v252_v19, %v243_v18  ;;  %v242_v23 = vld [vmem:[#allocation5 + $0x360] sm:$0xff]  ;;  %v251_v24 = vld [vmem:[#allocation5 + $0x3a8] sm:$0xff]  ;;  %v3974_v25 = vpack.c.bf16 %v254_v22, %v245_v20  ;;  %v244_v27 = vld [vmem:[#allocation5 + $0x370] sm:$0xff] }
  0x5e   :  { %3935 = vmatprep.subr.bf16.mxu0 %v3934_v61  ;;  %v3944_v26 = vpack.c.bf16 %v251_v24, %v242_v23  ;;  %v253_v28 = vld [vmem:[#allocation5 + $0x3b8] sm:$0xff]  ;;  %v270_v31 = vld [vmem:[#allocation5 + $0x440] sm:$0xff]  ;;  %v263_v32 = vld [vmem:[#allocation5 + $0x408] sm:$0xff] }
  0x5f   :  { %v3976_v29 = vpack.c.bf16 %v253_v28, %v244_v27  ;;  %v261_v30 = vld [vmem:[#allocation5 + $0x3f8] sm:$0xff]  ;;  %v272_v34 = vld [vmem:[#allocation5 + $0x450] sm:$0xff]  ;;  %v150_v48 = vld [vmem:[#allocation5 + $0x80] sm:$0xff] }
  0x60   :  { %v3946_v33 = vpack.c.bf16 %v270_v31, %v261_v30  ;;  %v260_v35 = vld [vmem:[#allocation5 + $0x3f0] sm:$0xff]  ;;  %v269_v36 = vld [vmem:[#allocation5 + $0x438] sm:$0xff]  ;;  %v3978_v37 = vpack.c.bf16 %v272_v34, %v263_v32  ;;  %v138_v59 = vld [vmem:[#allocation5 + $0x20] sm:$0xff] }
  0x61   :  { %v141_v46 = vld [vmem:[#allocation5 + $0x38] sm:$0xff]  ;;  %v3648_v58 = vld [vmem:[%s4978_s2] ss:$0 sm:$0xff]  ;;  %v147_v61 = vld [vmem:[#allocation5 + $0x68] sm:$0xff]  ;;  %s4397_s2 = smov 96  }
  0x62   :  { %v4014_v49 = vpack.c.bf16 %v150_v48, %v141_v46  ;;  %v166_v3 = vld [vmem:[#allocation5 + $0x100] sm:$0xff]  ;;  %v159_v4 = vld [vmem:[#allocation5 + $0xc8] sm:$0xff]  ;;  %v3984_v7 = vpack.c.bf16 %v147_v61, %v138_v59  ;;  %v165_v10 = vld [vmem:[#allocation5 + $0xf8] sm:$0xff] }
  0x63   :  { %v158_v12 = vld [vmem:[#allocation5 + $0xc0] sm:$0xff]  ;;  %v177_v18 = vld [vmem:[#allocation5 + $0x158] sm:$0xff]  ;;  %v183_v23 = vld [vmem:[#allocation5 + $0x188] sm:$0xff] }
  0x64   :  { %v186_v19 = vld [vmem:[#allocation5 + $0x1a0] sm:$0xff]  ;;  %v176_v27 = vld [vmem:[#allocation5 + $0x150] sm:$0xff]  ;;  %v185_v28 = vld [vmem:[#allocation5 + $0x198] sm:$0xff] }
  0x65   :  { %v202_v30 = vld [vmem:[#allocation5 + $0x220] sm:$0xff]  ;;  %v195_v31 = vld [vmem:[#allocation5 + $0x1e8] sm:$0xff]  ;;  %v204_v32 = vld [vmem:[#allocation5 + $0x230] sm:$0xff]  ;;  %v4024_v34 = vpack.c.bf16 %v185_v28, %v176_v27 }
  0x66   :  { %v222_v46 = vld [vmem:[#allocation5 + $0x2c0] sm:$0xff]  ;;  %v240_v59 = vld [vmem:[#allocation5 + $0x350] sm:$0xff]  ;;  %v275_v27 = vld [vmem:[#allocation5 + $0x468] sm:$0xff] }
  0x67   :  { %v142_v28 = vld [vmem:[#allocation5 + $0x40] sm:$0xff] }
  0xd9   :  { %v96_v38 = vpop.xlane.xlu0 %95 }
  0xda   :  { %v100_v39 = vmul.f32 0.0078125, %v96_v38  ;;  %v3948_v38 = vpack.c.bf16 %v269_v36, %v260_v35  ;;  %v192_v35 = vld [vmem:[#allocation5 + $0x1d0] sm:$0xff]  ;;  %v201_v36 = vld [vmem:[#allocation5 + $0x218] sm:$0xff] }
  0xdc   :  { %v4510_v40 = vsub.f32 %v91_v0, %v100_v39  ;;  %v215_v0 = vld [vmem:[#allocation5 + $0x288] sm:$0xff]  ;;  %v262_v39 = vld [vmem:[#allocation5 + $0x400] sm:$0xff] }
  0xdd   :  { %v98_v41 = vpop.xlane.xlu0 %97  ;;  %v3936_v2 = vpack.c.bf16 %v215_v0, %v206_v63  ;;  %v149_v63 = vld [vmem:[#allocation5 + $0x78] sm:$0xff]  ;;  %v3649_v0 = vld [vmem:[%s4979_s3] ss:$0 sm:$0xff]  ;;  %s4398_s3 = smov 64  }
  0xde   :  { %v101_v42 = vmul.f32 0.0078125, %v98_v41  ;;  %v104_v43 = vmul.f32 %v4510_v40, %v4510_v40  ;;  %v271_v41 = vld [vmem:[#allocation5 + $0x448] sm:$0xff] }
  0xdf   :  { %3937 = vmatpush1.bf16.msra.mxu0 %v3936_v2 }
  0xe0   :  { %v4514_v44 = vsub.f32 %v92_v1, %v101_v42  ;;  %106 = vadd.xlane.f32.xlu1 %v104_v43  ;;  %v3966_v1 = vpack.c.bf16 %v218_v62, %v209_v60  ;;  %3939 = vmatprep.subr.bf16.mxu0 %v3938_v9  ;;  %v3980_v42 = vpack.c.bf16 %v271_v41, %v262_v39  ;;  %v139_v43 = vld [vmem:[#allocation5 + $0x28] sm:$0xff]  ;;  %v140_v62 = vld [vmem:[#allocation5 + $0x30] sm:$0xff]  ;;  %v194_v39 = vld [vmem:[#allocation5 + $0x1e0] sm:$0xff] }
  0xe1   :  { %v4016_v8 = vpack.c.bf16 %v149_v63, %v140_v62  ;;  %v156_v9 = vld [vmem:[#allocation5 + $0xb0] sm:$0xff]  ;;  %v203_v41 = vld [vmem:[#allocation5 + $0x228] sm:$0xff]  ;;  %v237_v63 = vld [vmem:[#allocation5 + $0x338] sm:$0xff] }
  0xe2   :  { %v105_v45 = vmul.f32 %v4514_v44, %v4514_v44  ;;  %3967 = vmatprep.subr.bf16.mxu1 %v3966_v1  ;;  %v157_v1 = vld [vmem:[#allocation5 + $0xb8] sm:$0xff]  ;;  %v4028_v48 = vpack.c.bf16 %v203_v41, %v194_v39  ;;  %v228_v62 = vld [vmem:[#allocation5 + $0x2f0] sm:$0xff] }
  0xe3   :  { %3969 = vmatpush1.bf16.msra.mxu1 %v3968_v5  ;;  %3941 = vmatpush1.bf16.msra.mxu0 %v3940_v14  ;;  %v168_v5 = vld [vmem:[#allocation5 + $0x110] sm:$0xff]  ;;  %v175_v14 = vld [vmem:[#allocation5 + $0x148] sm:$0xff]  ;;  %v3986_v15 = vpack.c.bf16 %v166_v3, %v157_v1  ;;  %v205_v41 = vld [vmem:[#allocation5 + $0x238] sm:$0xff] }
  0xe4   :  { %108 = vadd.xlane.f32.xlu1 %v105_v45  ;;  %3971 = vmatprep.subr.bf16.mxu1 %v3970_v13  ;;  %v148_v45 = vld [vmem:[#allocation5 + $0x70] sm:$0xff]  ;;  %v167_v13 = vld [vmem:[#allocation5 + $0x108] sm:$0xff]  ;;  %v4018_v16 = vpack.c.bf16 %v168_v5, %v159_v4 }
  0xe5   :  { %3943 = vmatprep.subr.bf16.mxu0 %v3942_v21  ;;  %v3982_v47 = vpack.c.bf16 %v148_v45, %v139_v43  ;;  %v3988_v21 = vpack.c.bf16 %v165_v10, %v156_v9  ;;  %v4020_v22 = vpack.c.bf16 %v167_v13, %v158_v12  ;;  %v220_v43 = vld [vmem:[#allocation5 + $0x2b0] sm:$0xff]  ;;  %v213_v45 = vld [vmem:[#allocation5 + $0x278] sm:$0xff]  ;;  %v239_v3 = vld [vmem:[#allocation5 + $0x348] sm:$0xff] }
  0xe6   :  { %v247_v4 = vld [vmem:[#allocation5 + $0x388] sm:$0xff]  ;;  %v256_v5 = vld [vmem:[#allocation5 + $0x3d0] sm:$0xff]  ;;  %v246_v10 = vld [vmem:[#allocation5 + $0x380] sm:$0xff] }
  0xe7   :  { %3973 = vmatpush1.bf16.msra.mxu1 %v3972_v17  ;;  %3945 = vmatpush1.bf16.msra.mxu0 %v3944_v26  ;;  %v184_v17 = vld [vmem:[#allocation5 + $0x190] sm:$0xff]  ;;  %v4022_v26 = vpack.c.bf16 %v186_v19, %v177_v18  ;;  %v4006_v12 = vpack.c.bf16 %v256_v5, %v247_v4  ;;  %v267_v18 = vld [vmem:[#allocation5 + $0x428] sm:$0xff] }
  0xe8   :  { %3975 = vmatprep.subr.bf16.mxu1 %v3974_v25  ;;  %3947 = vmatprep.subr.bf16.mxu0 %v3946_v33  ;;  %v3990_v25 = vpack.c.bf16 %v184_v17, %v175_v14  ;;  %v248_v14 = vld [vmem:[#allocation5 + $0x390] sm:$0xff]  ;;  %v274_v17 = vld [vmem:[#allocation5 + $0x460] sm:$0xff] }
  0xe9   :  { %v276_v19 = vld [vmem:[#allocation5 + $0x470] sm:$0xff] }
  0xea   :  { %v196_v39 = vld [vmem:[#allocation5 + $0x1f0] sm:$0xff] }
  0xeb   :  { %3977 = vmatpush1.bf16.msra.mxu1 %v3976_v29  ;;  %3949 = vmatpush1.bf16.msra.mxu0 %v3948_v38  ;;  %v193_v29 = vld [vmem:[#allocation5 + $0x1d8] sm:$0xff]  ;;  %v4026_v38 = vpack.c.bf16 %v204_v32, %v195_v31 }
  0xec   :  { %3979 = vmatprep.subr.bf16.mxu1 %v3978_v37  ;;  %3983 = vmatprep.subr.bf16.mxu0 %v3982_v47  ;;  %v3994_v37 = vpack.c.bf16 %v202_v30, %v193_v29  ;;  %v3996_v47 = vpack.c.bf16 %v201_v36, %v192_v35  ;;  %v151_v29 = vld [vmem:[#allocation5 + $0x88] sm:$0xff]  ;;  %v178_v36 = vld [vmem:[#allocation5 + $0x160] sm:$0xff] }
  0xed   :  { %v4046_v32 = vpack.c.bf16 %v151_v29, %v142_v28 }
  0xef   :  { %3981 = vmatpush1.bf16.msra.mxu1 %v3980_v42  ;;  %v211_v42 = vld [vmem:[#allocation5 + $0x268] sm:$0xff] }
  0xf0   :  { %4015 = vmatprep.subr.bf16.mxu1 %v4014_v49  ;;  %v210_v49 = vld [vmem:[#allocation5 + $0x260] sm:$0xff] }
 0x16d   :  { %v107_v51 = vpop.xlane.xlu1 %106 }
 0x16e   :  { %v110_v52 = vmul.f32 0.0078125, %v107_v51  ;;  %v219_v51 = vld [vmem:[#allocation5 + $0x2a8] sm:$0xff] }
 0x170   :  { %v112_v53 = vadd.f32 1e-05, %v110_v52  ;;  %v3998_v52 = vpack.c.bf16 %v220_v43, %v211_v42  ;;  %v4058_v42 = vpack.c.bf16 %v205_v41, %v196_v39  ;;  %v214_v43 = vld [vmem:[#allocation5 + $0x280] sm:$0xff] }
 0x171   :  { %v109_v54 = vpop.xlane.xlu1 %108 }
 0x172   :  { %4223 = vrsqrt.f32 %v112_v53  ;;  %v111_v55 = vmul.f32 0.0078125, %v109_v54  ;;  %v4030_v53 = vpack.c.bf16 %v222_v46, %v213_v45  ;;  %v212_v54 = vld [vmem:[#allocation5 + $0x270] sm:$0xff]  ;;  %v223_v45 = vld [vmem:[#allocation5 + $0x2c8] sm:$0xff] }
 0x173   :  { %v4062_v46 = vpack.c.bf16 %v223_v45, %v214_v43 }
 0x174   :  { %v113_v56 = vadd.f32 1e-05, %v111_v55  ;;  %v221_v55 = vld [vmem:[#allocation5 + $0x2b8] sm:$0xff] }
 0x175   :  { %v4032_v61 = vpack.c.bf16 %v221_v55, %v212_v54  ;;  %v268_v54 = vld [vmem:[#allocation5 + $0x430] sm:$0xff]  ;;  %v277_v55 = vld [vmem:[#allocation5 + $0x478] sm:$0xff] }
 0x176   :  { %4225 = vrsqrt.f32 %v113_v56  ;;  %v229_v56 = vld [vmem:[#allocation5 + $0x2f8] sm:$0xff] }
 0x17c   :  { %v4224_v57 = vpop.eup %4223 }
 0x17d   :  { %v116_v60 = vmul.f32 %v4224_v57, %v4510_v40  ;;  %v238_v57 = vld [vmem:[#allocation5 + $0x340] sm:$0xff] }
 0x17f   :  { %v124_v2 = vmul.f32 %v3648_v58, %v116_v60  ;;  %v4000_v60 = vpack.c.bf16 %v219_v51, %v210_v49  ;;  %v250_v51 = vld [vmem:[#allocation5 + $0x3a0] sm:$0xff] }
 0x180   :  { %v4226_v6 = vpop.eup %4225 }
 0x181   :  { %v117_v11 = vmul.f32 %v4226_v6, %v4514_v44  ;;  %v4528_v40 = vadd.f32 %v3649_v0, %v124_v2  ;;  %v174_v44 = vld [vmem:[#allocation5 + $0x140] sm:$0xff]  ;;  %v249_v6 = vld [vmem:[#allocation5 + $0x398] sm:$0xff] }
 0x182   :  { %v3992_v33 = vpack.c.bf16 %v183_v23, %v174_v44  ;;  %v230_v2 = vld [vmem:[#allocation5 + $0x300] sm:$0xff]  ;;  %v4042_v23 = vpack.c.bf16 %v276_v19, %v267_v18 }
 0x183   :  { %343 = vmatmul.mubr.f32.vlgmr.msra.gmra.mrb[0].mxu0 %v4528_v40  ;;  %420 = vmatmul.mubr.f32.vlgmr.msra.gmra.mrb[0].mxu1 %v4528_v40  ;;  %v125_v20 = vmul.f32 %v3648_v58, %v117_v11  ;;  %v231_v58 = vld [vmem:[#allocation5 + $0x308] sm:$0xff]  ;;  %v4036_v9 = vpack.c.bf16 %v239_v3, %v230_v2 }
 0x184   :  { %3985 = vmatpush1.bf16.msra.mxu0 %v3984_v7  ;;  %4017 = vmatpush1.bf16.msra.mxu1 %v4016_v8  ;;  %v4034_v1 = vpack.c.bf16 %v240_v59, %v231_v58  ;;  %v258_v7 = vld [vmem:[#allocation5 + $0x3e0] sm:$0xff]  ;;  %v4004_v8 = vpack.c.bf16 %v237_v63, %v228_v62  ;;  %v255_v11 = vld [vmem:[#allocation5 + $0x3c8] sm:$0xff]  ;;  %v666_v58 = vlaneseq }
 0x185   :  { %348 = vmatprep.mubr.f32.mxu0 %v4393_v50  ;;  %425 = vmatprep.mubr.f32.mxu1 %v4393_v50  ;;  %v4534_v24 = vadd.f32 %v3649_v0, %v125_v20  ;;  %v4002_v0 = vpack.c.bf16 %v238_v57, %v229_v56  ;;  %v4038_v13 = vpack.c.bf16 %v258_v7, %v249_v6  ;;  %v4395_v56 = vmov 1983009808  }
 0x186   :  { %3987 = vmatprep.subr.bf16.mxu0 %v3986_v15  ;;  %4019 = vmatprep.subr.bf16.mxu1 %v4018_v16  ;;  %v257_v15 = vld [vmem:[#allocation5 + $0x3d8] sm:$0xff]  ;;  %v4008_v20 = vpack.c.bf16 %v255_v11, %v246_v10  ;;  %v664_v57 = vunpack.c.l.s4 %v4395_v56 }
 0x187   :  { %349 = vmatmul.mubr.f32.gmra.mrb[2].mxu0 %v4534_v24  ;;  %426 = vmatmul.mubr.f32.gmra.mrb[2].mxu1 %v4534_v24  ;;  %v265_v16 = vld [vmem:[#allocation5 + $0x418] sm:$0xff] }
 0x188   :  { %3989 = vmatpush1.bf16.msra.mxu0 %v3988_v21  ;;  %4021 = vmatpush1.bf16.msra.mxu1 %v4020_v22  ;;  %v4040_v21 = vpack.c.bf16 %v257_v15, %v248_v14  ;;  %v264_v22 = vld [vmem:[#allocation5 + $0x410] sm:$0xff]  ;;  %v4010_v44 = vpack.c.bf16 %v274_v17, %v265_v16  ;;  %v665_v59 = vunpack.c.0.s8 %v664_v57 }
 0x189   :  { %3991 = vmatprep.subr.bf16.mxu0 %v3990_v25  ;;  %4023 = vmatprep.subr.bf16.mxu1 %v4022_v26  ;;  %v273_v25 = vld [vmem:[#allocation5 + $0x458] sm:$0xff]  ;;  %v266_v26 = vld [vmem:[#allocation5 + $0x420] sm:$0xff] }
 0x18a   :  { %496 = vmatprep.mubr.f32.mxu0 %v4393_v50  ;;  %573 = vmatprep.mubr.f32.mxu1 %v4393_v50  ;;  %v4012_v30 = vpack.c.bf16 %v273_v25, %v264_v22  ;;  %v4044_v31 = vpack.c.bf16 %v275_v27, %v266_v26 }
 0x18c   :  { %3993 = vmatpush1.bf16.msra.mxu0 %v3992_v33  ;;  %4025 = vmatpush1.bf16.msra.mxu1 %v4024_v34  ;;  %v160_v33 = vld [vmem:[#allocation5 + $0xd0] sm:$0xff]  ;;  %v169_v34 = vld [vmem:[#allocation5 + $0x118] sm:$0xff] }
 0x18d   :  { %3995 = vmatprep.subr.bf16.mxu0 %v3994_v37  ;;  %4027 = vmatprep.subr.bf16.mxu1 %v4026_v38  ;;  %v4050_v35 = vpack.c.bf16 %v169_v34, %v160_v33  ;;  %v187_v37 = vld [vmem:[#allocation5 + $0x1a8] sm:$0xff] }
 0x18e   :  { %v4054_v38 = vpack.c.bf16 %v187_v37, %v178_v36 }
 0x190   :  { %3997 = vmatpush1.bf16.msra.mxu0 %v3996_v47  ;;  %4029 = vmatpush1.bf16.msra.mxu1 %v4028_v48  ;;  %v232_v47 = vld [vmem:[#allocation5 + $0x310] sm:$0xff]  ;;  %v241_v48 = vld [vmem:[#allocation5 + $0x358] sm:$0xff] }
 0x191   :  { %3999 = vmatprep.subr.bf16.mxu0 %v3998_v52  ;;  %4031 = vmatprep.subr.bf16.mxu1 %v4030_v53  ;;  %v4066_v49 = vpack.c.bf16 %v241_v48, %v232_v47  ;;  %v259_v52 = vld [vmem:[#allocation5 + $0x3e8] sm:$0xff] }
 0x192   :  { %v4070_v53 = vpack.c.bf16 %v259_v52, %v250_v51 }
 0x194   :  { %4001 = vmatpush1.bf16.msra.mxu0 %v4000_v60  ;;  %4033 = vmatpush1.bf16.msra.mxu1 %v4032_v61  ;;  %v4555_v60 = vshrl.u32 %v666_v58, 7  ;;  %v4396_v61 = vmov 1934713408  }
 0x195   :  { %4003 = vmatprep.subr.bf16.mxu0 %v4002_v0  ;;  %4035 = vmatprep.subr.bf16.mxu1 %v4034_v1  ;;  %v696_v62 = vunpack.c.l.s4 %v4396_v61 }
 0x196   :  { %v4558_v63 = vsub.s32 %v665_v59, %v4555_v60 }
 0x197   :  { %v697_v1 = vunpack.c.0.s8 %v696_v62 }
 0x198   :  { %4005 = vmatpush1.bf16.msra.mxu0 %v4004_v8  ;;  %4037 = vmatpush1.bf16.msra.mxu1 %v4036_v9 }
 0x199   :  { %4007 = vmatprep.subr.bf16.mxu0 %v4006_v12  ;;  %4039 = vmatprep.subr.bf16.mxu1 %v4038_v13  ;;  %v4565_v12 = vsub.s32 %v697_v1, %v4555_v60 }
 0x19c   :  { %4009 = vmatpush1.bf16.msra.mxu0 %v4008_v20  ;;  %4041 = vmatpush1.bf16.msra.mxu1 %v4040_v21 }
 0x19d   :  { %4011 = vmatprep.subr.bf16.mxu0 %v4010_v44  ;;  %4043 = vmatprep.subr.bf16.mxu1 %v4042_v23 }
 0x1a0   :  { %4013 = vmatpush1.bf16.msra.mxu0 %v4012_v30  ;;  %4045 = vmatpush1.bf16.msra.mxu1 %v4044_v31 }
 0x1a1   :  { %4047 = vmatprep.subr.bf16.mxu0 %v4046_v32  ;;  %3838 = vmatprep.subr.mxu1 %v4393_v50 }
 0x1a3   :  { %497 = vmatmul.mubr.f32.vlgmr.msra.gmra.mrb[4].mxu0 %v4528_v40  ;;  %574 = vmatmul.mubr.f32.vlgmr.msra.gmra.mrb[4].mxu1 %v4528_v40 }
 0x1a4   :  { %4049 = vmatpush3.bf16.msra.mxu0 %v4046_v32  ;;  %502 = vmatprep.mubr.f32.mxu0 %v4393_v50 }
 0x1a5   :  { %579 = vmatprep.mubr.f32.mxu1 %v4393_v50  ;;  %4051 = vmatprep.subr.bf16.mxu0 %v4050_v35 }
 0x1a7   :  { %503 = vmatmul.mubr.f32.gmra.mrb[6].mxu0 %v4534_v24  ;;  %580 = vmatmul.mubr.f32.gmra.mrb[6].mxu1 %v4534_v24 }
 0x1a8   :  { %4053 = vmatpush3.bf16.msra.mxu0 %v4050_v35  ;;  %3835 = vmatprep.mubr.f32.mxu0 %v4528_v40  ;;  %v4074_v40 = vpack.c.bf16 %v277_v55, %v268_v54 }
 0x1a9   :  { %4055 = vmatprep.subr.bf16.mxu0 %v4054_v38  ;;  %3840 = vmatprep.mubr.msk.f32.mxu1 %vm4394_vm0, %v4393_v50 }
 0x1ac   :  { %4057 = vmatpush3.bf16.msra.mxu0 %v4054_v38 }
 0x1ad   :  { %4059 = vmatprep.subr.bf16.mxu0 %v4058_v42 }
 0x1b0   :  { %4061 = vmatpush3.bf16.msra.mxu0 %v4058_v42 }
 0x1b1   :  { %4063 = vmatprep.subr.bf16.mxu0 %v4062_v46 }
 0x1b4   :  { %4065 = vmatpush3.bf16.msra.mxu0 %v4062_v46 }
 0x1b5   :  { %4067 = vmatprep.subr.bf16.mxu0 %v4066_v49 }
 0x1b8   :  { %4069 = vmatpush3.bf16.msra.mxu0 %v4066_v49 }
 0x1b9   :  { %4071 = vmatprep.subr.bf16.mxu0 %v4070_v53 }
 0x1bc   :  { %4073 = vmatpush3.bf16.msra.mxu0 %v4070_v53 }
 0x1bd   :  { %4075 = vmatprep.subr.bf16.mxu0 %v4074_v40 }
 0x1c0   :  { %4077 = vmatpush3.bf16.msra.mxu0 %v4074_v40 }
 0x1c1   :  { %3873 = vmatprep.subr.mxu0 %v4393_v50 }
 0x1c3   :  { %3836 = vmatmul.mubr.f32.vlgmr.msra.gmra.mrb[8].mxu0 %v4534_v24 }
 0x1c4   :  { %3875 = vmatprep.mubr.msk.f32.mxu0 %vm4394_vm0, %v4393_v50 }
 0x256   :  { %v344_v24 = vpop.f32.mrb[0].mxu0  ;;  %v421_v0 = vpop.f32.mrb[0].mxu1 }
 0x257   :  { %v661_v2 = vcombine.low %v344_v24, %v421_v0  ;;  %v662_v3 = vcombine.high %v344_v24, %v421_v0  ;;  %v346_v4 = vpop.f32.mrb[1].mxu0  ;;  %v423_v5 = vpop.f32.mrb[1].mxu1 }
 0x258   :  { %v677_v6 = vcombine.low %v346_v4, %v423_v5  ;;  %v678_v7 = vcombine.high %v346_v4, %v423_v5 }
 0x259   :  { %v669_v8 = vrot.slane %v661_v2, %v4558_v63  ;;  %v676_v9 = vrot.slane %v662_v3, %v4558_v63 }
 0x25a   :  { %v685_v10 = vrot.slane %v677_v6, %v4558_v63  ;;  %v692_v11 = vrot.slane %v678_v7, %v4558_v63  ;;  %v350_v13 = vpop.f32.mrb[2].mxu0  ;;  %v427_v14 = vpop.f32.mrb[2].mxu1 }
 0x25b   :  { %v729_v15 = vcombine.low %v350_v13, %v427_v14  ;;  %v730_v16 = vcombine.high %v350_v13, %v427_v14  ;;  %v352_v17 = vpop.f32.mrb[3].mxu0  ;;  %v429_v18 = vpop.f32.mrb[3].mxu1 }
 0x25c   :  { %v693_v19 = vcombine.low %v669_v8, %v685_v10  ;;  %v694_v20 = vcombine.high %v669_v8, %v685_v10  ;;  %v709_v21 = vcombine.low %v676_v9, %v692_v11  ;;  %v710_v22 = vcombine.high %v676_v9, %v692_v11 }
 0x25d   :  { %v737_v44 = vrot.slane %v729_v15, %v4558_v63  ;;  %v744_v23 = vrot.slane %v730_v16, %v4558_v63  ;;  %v745_v25 = vcombine.low %v352_v17, %v429_v18  ;;  %v746_v26 = vcombine.high %v352_v17, %v429_v18 }
 0x25e   :  { %v701_v27 = vrot.slane %v693_v19, %v4565_v12  ;;  %v708_v28 = vrot.slane %v694_v20, %v4565_v12  ;;  %v717_v29 = vrot.slane %v709_v21, %v4565_v12  ;;  %v724_v30 = vrot.slane %v710_v22, %v4565_v12 }
 0x25f   :  { %v753_v31 = vrot.slane %v745_v25, %v4558_v63  ;;  %v760_v32 = vrot.slane %v746_v26, %v4558_v63 }
 0x260   :  { %v797_v33 = vcombine.low %v701_v27, %v708_v28  ;;  %v3650_v34 = vcombine.high %v701_v27, %v708_v28  ;;  %v813_v35 = vcombine.low %v717_v29, %v724_v30  ;;  %v3651_v36 = vcombine.high %v717_v29, %v724_v30 }
 0x261   :  { %v761_v37 = vcombine.low %v737_v44, %v753_v31  ;;  %v762_v38 = vcombine.high %v737_v44, %v753_v31  ;;  %v777_v39 = vcombine.low %v744_v23, %v760_v32  ;;  %v778_v41 = vcombine.high %v744_v23, %v760_v32 }
 0x262   :  { %v804_v42 = vrot.slane %v797_v33, %v4558_v63  ;;  %v812_v43 = vrot.slane %v3650_v34, %v4558_v63  ;;  %v820_v45 = vrot.slane %v813_v35, %v4558_v63  ;;  %v828_v46 = vrot.slane %v3651_v36, %v4558_v63 }
 0x263   :  { %v769_v47 = vrot.slane %v761_v37, %v4565_v12  ;;  %v776_v48 = vrot.slane %v762_v38, %v4565_v12  ;;  %v785_v49 = vrot.slane %v777_v39, %v4565_v12  ;;  %v792_v51 = vrot.slane %v778_v41, %v4565_v12 }
 0x264   :  { %v829_v52 = vcombine.low %v804_v42, %v812_v43  ;;  %v845_v53 = vcombine.low %v820_v45, %v828_v46  ;;  %v830_v54 = vcombine.high %v804_v42, %v812_v43  ;;  %v846_v55 = vcombine.high %v820_v45, %v828_v46 }
 0x265   :  { %v865_v40 = vcombine.low %v769_v47, %v776_v48  ;;  %v3652_v56 = vcombine.high %v769_v47, %v776_v48  ;;  %v881_v57 = vcombine.low %v785_v49, %v792_v51  ;;  %v3653_v59 = vcombine.high %v785_v49, %v792_v51 }
 0x266   :  { %v4584_v61 = vrot.slane %v829_v52, %v4565_v12  ;;  %v4587_v62 = vrot.slane %v845_v53, %v4565_v12  ;;  %v4590_v24 = vrot.slane %v830_v54, %v4565_v12  ;;  %v4593_v0 = vrot.slane %v846_v55, %v4565_v12 }
 0x267   :  { %v872_v1 = vrot.slane %v865_v40, %v4558_v63  ;;  %v880_v2 = vrot.slane %v3652_v56, %v4558_v63  ;;  %v888_v3 = vrot.slane %v881_v57, %v4558_v63  ;;  %v896_v4 = vrot.slane %v3653_v59, %v4558_v63 }
 0x268   :  { %v861_v5 = vcombine.low %v4584_v61, %v4587_v62  ;;  %v862_v6 = vcombine.high %v4584_v61, %v4587_v62  ;;  %v863_v7 = vcombine.low %v4590_v24, %v4593_v0  ;;  %v864_v8 = vcombine.high %v4590_v24, %v4593_v0 }
 0x269   :  { %v897_v9 = vcombine.low %v872_v1, %v880_v2  ;;  %v913_v10 = vcombine.low %v888_v3, %v896_v4  ;;  %v898_v11 = vcombine.high %v872_v1, %v880_v2  ;;  %v914_v13 = vcombine.high %v888_v3, %v896_v4 }
 0x26b   :  { %v4608_v14 = vrot.slane %v897_v9, %v4565_v12  ;;  %v4611_v15 = vrot.slane %v913_v10, %v4565_v12  ;;  %v4614_v16 = vrot.slane %v898_v11, %v4565_v12  ;;  %v4617_v17 = vrot.slane %v914_v13, %v4565_v12 }
 0x26d   :  { %v929_v18 = vcombine.low %v4608_v14, %v4611_v15  ;;  %v932_v19 = vcombine.high %v4614_v16, %v4617_v17  ;;  %v930_v20 = vcombine.high %v4608_v14, %v4611_v15  ;;  %v931_v21 = vcombine.low %v4614_v16, %v4617_v17 }
 0x276   :  { %v498_v22 = vpop.f32.mrb[4].mxu0  ;;  %v575_v44 = vpop.f32.mrb[4].mxu1 }
 0x277   :  { %v933_v23 = vcombine.low %v498_v22, %v575_v44  ;;  %v934_v25 = vcombine.high %v498_v22, %v575_v44  ;;  %v500_v26 = vpop.f32.mrb[5].mxu0  ;;  %v577_v27 = vpop.f32.mrb[5].mxu1 }
 0x278   :  { %v949_v28 = vcombine.low %v500_v26, %v577_v27  ;;  %v950_v29 = vcombine.high %v500_v26, %v577_v27 }
 0x279   :  { %v941_v30 = vrot.slane %v933_v23, %v4558_v63  ;;  %v948_v31 = vrot.slane %v934_v25, %v4558_v63 }
 0x27a   :  { %v957_v32 = vrot.slane %v949_v28, %v4558_v63  ;;  %v964_v33 = vrot.slane %v950_v29, %v4558_v63  ;;  %v504_v34 = vpop.f32.mrb[6].mxu0  ;;  %v581_v35 = vpop.f32.mrb[6].mxu1 }
 0x27b   :  { %v1001_v36 = vcombine.low %v504_v34, %v581_v35  ;;  %v1002_v37 = vcombine.high %v504_v34, %v581_v35  ;;  %v506_v38 = vpop.f32.mrb[7].mxu0  ;;  %v583_v39 = vpop.f32.mrb[7].mxu1 }
 0x27c   :  { %v965_v41 = vcombine.low %v941_v30, %v957_v32  ;;  %v966_v42 = vcombine.high %v941_v30, %v957_v32  ;;  %v981_v43 = vcombine.low %v948_v31, %v964_v33  ;;  %v982_v45 = vcombine.high %v948_v31, %v964_v33 }
 0x27d   :  { %v1009_v46 = vrot.slane %v1001_v36, %v4558_v63  ;;  %v1016_v47 = vrot.slane %v1002_v37, %v4558_v63  ;;  %v1017_v48 = vcombine.low %v506_v38, %v583_v39  ;;  %v1018_v49 = vcombine.high %v506_v38, %v583_v39 }
 0x27e   :  { %v973_v51 = vrot.slane %v965_v41, %v4565_v12  ;;  %v980_v52 = vrot.slane %v966_v42, %v4565_v12  ;;  %v989_v53 = vrot.slane %v981_v43, %v4565_v12  ;;  %v996_v54 = vrot.slane %v982_v45, %v4565_v12 }
 0x27f   :  { %v1025_v55 = vrot.slane %v1017_v48, %v4558_v63  ;;  %v1032_v40 = vrot.slane %v1018_v49, %v4558_v63 }
 0x280   :  { %v1069_v56 = vcombine.low %v973_v51, %v980_v52  ;;  %v3654_v57 = vcombine.high %v973_v51, %v980_v52  ;;  %v1085_v59 = vcombine.low %v989_v53, %v996_v54  ;;  %v3655_v1 = vcombine.high %v989_v53, %v996_v54 }
 0x281   :  { %v1033_v2 = vcombine.low %v1009_v46, %v1025_v55  ;;  %v1034_v3 = vcombine.high %v1009_v46, %v1025_v55  ;;  %v1049_v4 = vcombine.low %v1016_v47, %v1032_v40  ;;  %v1050_v9 = vcombine.high %v1016_v47, %v1032_v40 }
 0x282   :  { %v1076_v10 = vrot.slane %v1069_v56, %v4558_v63  ;;  %v1084_v11 = vrot.slane %v3654_v57, %v4558_v63  ;;  %v1092_v13 = vrot.slane %v1085_v59, %v4558_v63  ;;  %v1100_v22 = vrot.slane %v3655_v1, %v4558_v63 }
 0x283   :  { %v1041_v44 = vrot.slane %v1033_v2, %v4565_v12  ;;  %v1048_v23 = vrot.slane %v1034_v3, %v4565_v12  ;;  %v1057_v25 = vrot.slane %v1049_v4, %v4565_v12  ;;  %v1064_v26 = vrot.slane %v1050_v9, %v4565_v12 }
 0x284   :  { %v1101_v27 = vcombine.low %v1076_v10, %v1084_v11  ;;  %v1117_v28 = vcombine.low %v1092_v13, %v1100_v22  ;;  %v1102_v29 = vcombine.high %v1076_v10, %v1084_v11  ;;  %v1118_v30 = vcombine.high %v1092_v13, %v1100_v22 }
 0x285   :  { %v1137_v31 = vcombine.low %v1041_v44, %v1048_v23  ;;  %v3656_v32 = vcombine.high %v1041_v44, %v1048_v23  ;;  %v1153_v33 = vcombine.low %v1057_v25, %v1064_v26  ;;  %v3657_v34 = vcombine.high %v1057_v25, %v1064_v26 }
 0x286   :  { %v1109_v35 = vrot.slane %v1101_v27, %v4565_v12  ;;  %v1125_v36 = vrot.slane %v1117_v28, %v4565_v12  ;;  %v1116_v37 = vrot.slane %v1102_v29, %v4565_v12  ;;  %v1132_v38 = vrot.slane %v1118_v30, %v4565_v12 }
 0x287   :  { %v1144_v39 = vrot.slane %v1137_v31, %v4558_v63  ;;  %v1152_v41 = vrot.slane %v3656_v32, %v4558_v63  ;;  %v1160_v42 = vrot.slane %v1153_v33, %v4558_v63  ;;  %v1168_v43 = vrot.slane %v3657_v34, %v4558_v63 }
 0x288   :  { %v1133_v45 = vcombine.low %v1109_v35, %v1125_v36  ;;  %v1134_v46 = vcombine.high %v1109_v35, %v1125_v36  ;;  %v1135_v47 = vcombine.low %v1116_v37, %v1132_v38  ;;  %v1136_v48 = vcombine.high %v1116_v37, %v1132_v38 }
 0x289   :  { %v1169_v49 = vcombine.low %v1144_v39, %v1152_v41  ;;  %v1185_v51 = vcombine.low %v1160_v42, %v1168_v43  ;;  %v1170_v52 = vcombine.high %v1144_v39, %v1152_v41  ;;  %v1186_v53 = vcombine.high %v1160_v42, %v1168_v43 }
 0x28a   :  { %3839 = vmatpush3.xpose.msra.mxu1 %v1133_v45 }
 0x28b   :  { %3843 = vmatprep.subr.mxu1 %v4393_v50  ;;  %v1177_v54 = vrot.slane %v1169_v49, %v4565_v12  ;;  %v1193_v55 = vrot.slane %v1185_v51, %v4565_v12  ;;  %v1184_v40 = vrot.slane %v1170_v52, %v4565_v12  ;;  %v1200_v56 = vrot.slane %v1186_v53, %v4565_v12 }
 0x28d   :  { %3841 = vmatmul.mubr.f32.vlgmr.msra.gmra.mrb[8].mxu1 %v861_v5  ;;  %v1201_v57 = vcombine.low %v1177_v54, %v1193_v55  ;;  %v1204_v59 = vcombine.high %v1184_v40, %v1200_v56  ;;  %v1202_v1 = vcombine.high %v1177_v54, %v1193_v55  ;;  %v1203_v2 = vcombine.low %v1184_v40, %v1200_v56 }
 0x28e   :  { %3845 = vmatprep.mubr.msk.f32.mxu1 %vm4394_vm0, %v4393_v50 }
 0x28f   :  { %3844 = vmatpush3.xpose.msra.mxu1 %v1201_v57  ;;  %3874 = vmatpush3.xpose.msra.mxu0 %v1204_v59 }
 0x290   :  { %3848 = vmatprep.subr.mxu1 %v4393_v50  ;;  %3883 = vmatprep.subr.mxu0 %v4393_v50 }
 0x292   :  { %3846 = vmatmul.mubr.f32.vlgmr.msra.gmra.mrb[10].mxu1 %v929_v18  ;;  %3876 = vmatmul.mubr.f32.vlgmr.msra.gmra.mrb[10].mxu0 %v932_v19 }
 0x293   :  { %3849 = vmatpush3.xpose.msra.mxu1 %v1134_v46  ;;  %3850 = vmatprep.mubr.msk.f32.mxu1 %vm4394_vm0, %v4393_v50 }
 0x294   :  { %3853 = vmatprep.subr.mxu1 %v4393_v50  ;;  %3885 = vmatprep.mubr.msk.f32.mxu0 %vm4394_vm0, %v4393_v50 }
 0x296   :  { %3851 = vmatmul.mubr.f32.vlgmr.msra.gmra.mrb[12].mxu1 %v862_v6  ;;  %v3837_v5 = vpop.f32.mrb[8].mxu0 }
 0x297   :  { %3854 = vmatpush3.xpose.msra.mxu1 %v1202_v1  ;;  %1209 = vrot.lane.b32.xlu1 %v3837_v5, %s4397_s2  ;;  %v652_v18 = vpop.f32.mrb[9].mxu0 }
 0x298   :  { %3855 = vmatprep.mubr.msk.f32.mxu1 %vm4394_vm0, %v4393_v50  ;;  %1207 = vrot.lane.b32.xlu0 %v652_v18, %s4397_s2 }
 0x299   :  { %3858 = vmatprep.subr.mxu1 %v4393_v50 }
 0x29a   :  { %3856 = vmatmul.mubr.f32.vlgmr.msra.gmra.mrb[14].mxu1 %v930_v20 }
 0x29b   :  { %3859 = vmatpush3.xpose.msra.mxu1 %v1135_v47  ;;  %1213 = vrot.lane.b32.xlu1 %v652_v18, %s4398_s3 }
 0x29c   :  { %3860 = vmatprep.mubr.msk.f32.mxu1 %vm4394_vm0, %v4393_v50  ;;  %1215 = vrot.lane.b32.xlu0 %v3837_v5, %s4398_s3 }
 0x29d   :  { %3863 = vmatprep.subr.mxu1 %v4393_v50 }
 0x29e   :  { %3861 = vmatmul.mubr.f32.vlgmr.msra.gmra.mrb[16].mxu1 %v863_v7 }
 0x29f   :  { %3864 = vmatpush3.xpose.msra.mxu1 %v1203_v2  ;;  %1219 = vrot.lane.b32.xlu1 %v652_v18, %s4391_s28 }
 0x2a0   :  { %3865 = vmatprep.mubr.msk.f32.mxu1 %vm4394_vm0, %v4393_v50  ;;  %3868 = vmatprep.subr.mxu1 %v4393_v50 }
 0x2a2   :  { %3866 = vmatmul.mubr.f32.vlgmr.msra.gmra.mrb[18].mxu1 %v931_v21 }
 0x2a3   :  { %3869 = vmatpush3.xpose.msra.mxu1 %v1136_v48  ;;  %1221 = vrot.lane.b32.xlu1 %v3837_v5, %s4391_s28 }
 0x2a4   :  { %3870 = vmatprep.mubr.msk.f32.mxu1 %vm4394_vm0, %v4393_v50  ;;  %3878 = vmatprep.subr.mxu1 %v4393_v50 }
 0x2a6   :  { %3871 = vmatmul.mubr.f32.vlgmr.msra.gmra.mrb[20].mxu1 %v864_v8 }
 0x2a7   :  { %3880 = vmatprep.mubr.msk.f32.mxu1 %vm4394_vm0, %v4393_v50 }
 0x309   :  { %v1210_v61 = vpop.permute.xlu1 %1209 }
 0x30a   :  { %v1208_v62 = vpop.permute.xlu0 %1207 }
 0x30d   :  { %v1214_v6 = vpop.permute.xlu1 %1213 }
 0x30e   :  { %v1225_v7 = vcombine.low %v652_v18, %v1214_v6  ;;  %v1226_v14 = vcombine.high %v652_v18, %v1214_v6  ;;  %v1216_v16 = vpop.permute.xlu0 %1215 }
 0x30f   :  { %v1293_v0 = vcombine.low %v3837_v5, %v1216_v16  ;;  %v1294_v8 = vcombine.high %v3837_v5, %v1216_v16 }
 0x310   :  { %v1233_v20 = vrot.slane %v1225_v7, %v4558_v63  ;;  %v1240_v21 = vrot.slane %v1226_v14, %v4558_v63 }
 0x311   :  { %v1220_v15 = vpop.permute.xlu1 %1219  ;;  %v1301_v28 = vrot.slane %v1293_v0, %v4558_v63  ;;  %v1308_v29 = vrot.slane %v1294_v8, %v4558_v63 }
 0x312   :  { %v1241_v17 = vcombine.low %v1208_v62, %v1220_v15  ;;  %v1242_v19 = vcombine.high %v1208_v62, %v1220_v15 }
 0x314   :  { %v1249_v3 = vrot.slane %v1241_v17, %v4558_v63  ;;  %v1256_v24 = vrot.slane %v1242_v19, %v4558_v63 }
 0x315   :  { %v1222_v4 = vpop.permute.xlu1 %1221 }
 0x316   :  { %v1257_v9 = vcombine.low %v1233_v20, %v1249_v3  ;;  %v1258_v10 = vcombine.high %v1233_v20, %v1249_v3  ;;  %v1273_v11 = vcombine.low %v1240_v21, %v1256_v24  ;;  %v1274_v13 = vcombine.high %v1240_v21, %v1256_v24 }
 0x317   :  { %v1309_v22 = vcombine.low %v1210_v61, %v1222_v4  ;;  %v1310_v44 = vcombine.high %v1210_v61, %v1222_v4 }
 0x318   :  { %v1265_v23 = vrot.slane %v1257_v9, %v4565_v12  ;;  %v1272_v25 = vrot.slane %v1258_v10, %v4565_v12  ;;  %v1281_v26 = vrot.slane %v1273_v11, %v4565_v12  ;;  %v1288_v27 = vrot.slane %v1274_v13, %v4565_v12 }
 0x319   :  { %v1317_v30 = vrot.slane %v1309_v22, %v4558_v63  ;;  %v1324_v31 = vrot.slane %v1310_v44, %v4558_v63  ;;  %v1500_v13 = vand.u32 127, %v666_v58 }
 0x31a   :  { %v1361_v32 = vcombine.low %v1265_v23, %v1272_v25  ;;  %v3658_v33 = vcombine.high %v1265_v23, %v1272_v25  ;;  %v1377_v34 = vcombine.low %v1281_v26, %v1288_v27  ;;  %v3659_v35 = vcombine.high %v1281_v26, %v1288_v27 }
 0x31b   :  { %v1325_v36 = vcombine.low %v1301_v28, %v1317_v30  ;;  %v1326_v37 = vcombine.high %v1301_v28, %v1317_v30  ;;  %v1341_v38 = vcombine.low %v1308_v29, %v1324_v31  ;;  %v1342_v39 = vcombine.high %v1308_v29, %v1324_v31 }
 0x31c   :  { %v1368_v41 = vrot.slane %v1361_v32, %v4558_v63  ;;  %v1376_v42 = vrot.slane %v3658_v33, %v4558_v63  ;;  %v1384_v43 = vrot.slane %v1377_v34, %v4558_v63  ;;  %v1392_v45 = vrot.slane %v3659_v35, %v4558_v63 }
 0x31d   :  { %v1333_v46 = vrot.slane %v1325_v36, %v4565_v12  ;;  %v1340_v47 = vrot.slane %v1326_v37, %v4565_v12  ;;  %v1349_v48 = vrot.slane %v1341_v38, %v4565_v12  ;;  %v1356_v49 = vrot.slane %v1342_v39, %v4565_v12 }
 0x31e   :  { %v1393_v51 = vcombine.low %v1368_v41, %v1376_v42  ;;  %v1409_v52 = vcombine.low %v1384_v43, %v1392_v45  ;;  %v1394_v53 = vcombine.high %v1368_v41, %v1376_v42  ;;  %v1410_v54 = vcombine.high %v1384_v43, %v1392_v45 }
 0x31f   :  { %v1429_v55 = vcombine.low %v1333_v46, %v1340_v47  ;;  %v3660_v40 = vcombine.high %v1333_v46, %v1340_v47  ;;  %v1445_v56 = vcombine.low %v1349_v48, %v1356_v49  ;;  %v3661_v57 = vcombine.high %v1349_v48, %v1356_v49 }
 0x320   :  { %v4734_v59 = vrot.slane %v1393_v51, %v4565_v12  ;;  %v4737_v1 = vrot.slane %v1409_v52, %v4565_v12  ;;  %v4740_v2 = vrot.slane %v1394_v53, %v4565_v12  ;;  %v4743_v5 = vrot.slane %v1410_v54, %v4565_v12 }
 0x321   :  { %v1436_v18 = vrot.slane %v1429_v55, %v4558_v63  ;;  %v1444_v61 = vrot.slane %v3660_v40, %v4558_v63  ;;  %v1452_v62 = vrot.slane %v1445_v56, %v4558_v63  ;;  %v1460_v6 = vrot.slane %v3661_v57, %v4558_v63 }
 0x322   :  { %v1425_v7 = vcombine.low %v4734_v59, %v4737_v1  ;;  %v1426_v14 = vcombine.high %v4734_v59, %v4737_v1  ;;  %v1427_v15 = vcombine.low %v4740_v2, %v4743_v5  ;;  %v1428_v16 = vcombine.high %v4740_v2, %v4743_v5 }
 0x323   :  { %v1461_v17 = vcombine.low %v1436_v18, %v1444_v61  ;;  %v1477_v19 = vcombine.low %v1452_v62, %v1460_v6  ;;  %v1462_v20 = vcombine.high %v1436_v18, %v1444_v61  ;;  %v1478_v21 = vcombine.high %v1452_v62, %v1460_v6 }
 0x324   :  { %3879 = vmatpush3.msra.mxu1 %v1425_v7  ;;  %vm4781_vm1 = vcmp.le.s32.totalorder %v1500_v13, %v4555_v60 }
 0x325   :  { %v4758_v3 = vrot.slane %v1461_v17, %v4565_v12  ;;  %v4761_v24 = vrot.slane %v1477_v19, %v4565_v12  ;;  %3888 = vmatprep.subr.mxu1 %v4393_v50  ;;  %v4765_v0 = vrot.slane %v1462_v20, %v4565_v12  ;;  %v4768_v8 = vrot.slane %v1478_v21, %v4565_v12 }
 0x327   :  { %v1493_v4 = vcombine.low %v4758_v3, %v4761_v24  ;;  %v1494_v9 = vcombine.high %v4758_v3, %v4761_v24  ;;  %v1495_v10 = vcombine.low %v4765_v0, %v4768_v8  ;;  %v1496_v11 = vcombine.high %v4765_v0, %v4768_v8 }
 0x329   :  { %3884 = vmatpush3.msra.mxu0 %v1493_v4 }
 0x32a   :  { %3893 = vmatprep.subr.mxu0 %v4393_v50 }
 0x360   :  { %v1568_v44 = vpop.f32.mrb[8].mxu1 }
 0x361   :  { %v2064_v23 = vsel %vm4781_vm1, %v1568_v44, -inf  ;;  %v3842_v25 = vpop.f32.mrb[9].mxu1 }
 0x362   :  { %v2073_v26 = vsel %vm2072_vm2, %v2064_v23, -inf }
 0x363   :  { %v2074_v27 = vrot.slane %v2073_v26, 4 }
 0x365   :  { %v2075_v28 = vmax.f32 %v2073_v26, %v2074_v27  ;;  %v1638_v29 = vpop.f32.mrb[10].mxu1  ;;  %v2058_v30 = vpop.f32.mrb[10].mxu0 }
 0x366   :  { %v2065_v58 = vsel %vm4781_vm1, %v1638_v29, -inf  ;;  %v2071_v31 = vsel %vm4781_vm1, %v2058_v30, -inf  ;;  %v3847_v32 = vpop.f32.mrb[11].mxu1  ;;  %v3877_v33 = vpop.f32.mrb[11].mxu0 }
 0x367   :  { %v2076_v34 = vrot.slane %v2075_v28, 2  ;;  %v2080_v35 = vsel %vm2072_vm2, %v2065_v58, -inf  ;;  %v2122_v36 = vsel %vm2072_vm2, %v2071_v31, -inf }
 0x368   :  { %v2081_v37 = vrot.slane %v2080_v35, 4  ;;  %v2123_v38 = vrot.slane %v2122_v36, 4 }
 0x369   :  { %v2077_v39 = vmax.f32 %v2075_v28, %v2076_v34  ;;  %v1708_v41 = vpop.f32.mrb[12].mxu1 }
 0x36a   :  { %v2082_v42 = vmax.f32 %v2080_v35, %v2081_v37  ;;  %v2124_v43 = vmax.f32 %v2122_v36, %v2123_v38  ;;  %v2066_v45 = vsel %vm4781_vm1, %v1708_v41, -inf  ;;  %v3852_v46 = vpop.f32.mrb[13].mxu1 }
 0x36b   :  { %v2078_v47 = vrot.slane %v2077_v39, 1  ;;  %v2087_v48 = vsel %vm2072_vm2, %v2066_v45, -inf }
 0x36c   :  { %v2083_v49 = vrot.slane %v2082_v42, 2  ;;  %v2125_v51 = vrot.slane %v2124_v43, 2  ;;  %v2088_v52 = vrot.slane %v2087_v48, 4 }
 0x36d   :  { %v2079_v53 = vmax.f32 %v2077_v39, %v2078_v47  ;;  %v1778_v54 = vpop.f32.mrb[14].mxu1 }
 0x36e   :  { %v2084_v55 = vmax.f32 %v2082_v42, %v2083_v49  ;;  %v2126_v40 = vmax.f32 %v2124_v43, %v2125_v51  ;;  %v2089_v56 = vmax.f32 %v2087_v48, %v2088_v52  ;;  %v2067_v57 = vsel %vm4781_vm1, %v1778_v54, -inf  ;;  %v3857_v18 = vpop.f32.mrb[15].mxu1 }
 0x36f   :  { %v2129_v61 = vsub.f32 %v2064_v23, %v2079_v53  ;;  %v2094_v62 = vsel %vm2072_vm2, %v2067_v57, -inf }
 0x370   :  { %v2085_v6 = vrot.slane %v2084_v55, 1  ;;  %v2127_v7 = vrot.slane %v2126_v40, 1  ;;  %v2090_v17 = vrot.slane %v2089_v56, 2  ;;  %v2095_v19 = vrot.slane %v2094_v62, 4 }
 0x371   :  { %v2137_v20 = vmul.f32 1.442695, %v2129_v61  ;;  %v1848_v21 = vpop.f32.mrb[16].mxu1 }
 0x372   :  { %v2086_v4 = vmax.f32 %v2084_v55, %v2085_v6  ;;  %v2128_v13 = vmax.f32 %v2126_v40, %v2127_v7  ;;  %v2091_v44 = vmax.f32 %v2089_v56, %v2090_v17  ;;  %v2096_v25 = vmax.f32 %v2094_v62, %v2095_v19  ;;  %v3862_v26 = vpop.f32.mrb[17].mxu1 }
 0x373   :  { %4227 = vpow2.f32 %v2137_v20  ;;  %v2068_v27 = vsel %vm4781_vm1, %v1848_v21, -inf }
 0x374   :  { %v2130_v28 = vsub.f32 %v2065_v58, %v2086_v4  ;;  %v2136_v29 = vsub.f32 %v2071_v31, %v2128_v13  ;;  %v2092_v23 = vrot.slane %v2091_v44, 1  ;;  %v2097_v30 = vrot.slane %v2096_v25, 2 }
 0x375   :  { %v2101_v32 = vsel %vm2072_vm2, %v2068_v27, -inf  ;;  %v1918_v33 = vpop.f32.mrb[18].mxu1 }
 0x376   :  { %v2139_v34 = vmul.f32 1.442695, %v2130_v28  ;;  %v2151_v35 = vmul.f32 1.442695, %v2136_v29  ;;  %v2093_v36 = vmax.f32 %v2091_v44, %v2092_v23  ;;  %v2098_v37 = vmax.f32 %v2096_v25, %v2097_v30  ;;  %v3867_v38 = vpop.f32.mrb[19].mxu1 }
 0x377   :  { %v2102_v39 = vrot.slane %v2101_v32, 4  ;;  %v2069_v41 = vsel %vm4781_vm1, %v1918_v33, -inf }
 0x378   :  { %4229 = vpow2.f32 %v2139_v34  ;;  %v2131_v42 = vsub.f32 %v2066_v45, %v2093_v36  ;;  %v2099_v43 = vrot.slane %v2098_v37, 1  ;;  %v2108_v58 = vsel %vm2072_vm2, %v2069_v41, -inf }
 0x379   :  { %v2103_v31 = vmax.f32 %v2101_v32, %v2102_v39  ;;  %v2109_v46 = vrot.slane %v2108_v58, 4  ;;  %v1988_v47 = vpop.f32.mrb[20].mxu1  ;;  %4231 = vpow2.f32 %v2151_v35 }
 0x37a   :  { %v2141_v48 = vmul.f32 1.442695, %v2131_v42  ;;  %v2100_v49 = vmax.f32 %v2098_v37, %v2099_v43  ;;  %v2070_v51 = vsel %vm4781_vm1, %v1988_v47, -inf  ;;  %v3872_v52 = vpop.f32.mrb[21].mxu1 }
 0x37b   :  { %v2104_v53 = vrot.slane %v2103_v31, 2  ;;  %v2110_v54 = vmax.f32 %v2108_v58, %v2109_v46  ;;  %v2115_v55 = vsel %vm2072_vm2, %v2070_v51, -inf }
 0x37c   :  { %4233 = vpow2.f32 %v2141_v48  ;;  %v2132_v40 = vsub.f32 %v2067_v57, %v2100_v49  ;;  %v2116_v45 = vrot.slane %v2115_v55, 4 }
 0x37d   :  { %v4809_v56 = vpop.eup %4227  ;;  %v2105_v18 = vmax.f32 %v2103_v31, %v2104_v53  ;;  %v2111_v61 = vrot.slane %v2110_v54, 2 }
 0x37e   :  { %v2153_v62 = vsel %vm2072_vm2, %v4809_v56, 0.0  ;;  %v2143_v6 = vmul.f32 1.442695, %v2132_v40  ;;  %v2117_v7 = vmax.f32 %v2115_v55, %v2116_v45 }
 0x37f   :  { %v2154_v17 = vrot.slane %v2153_v62, 4  ;;  %v2106_v22 = vrot.slane %v2105_v18, 1  ;;  %v2112_v19 = vmax.f32 %v2110_v54, %v2111_v61 }
 0x380   :  { %4235 = vpow2.f32 %v2143_v6  ;;  %v2118_v20 = vrot.slane %v2117_v7, 2 }
 0x381   :  { %v2155_v21 = vadd.f32 %v2154_v17, %v2153_v62  ;;  %v2107_v4 = vmax.f32 %v2105_v18, %v2106_v22  ;;  %v2113_v13 = vrot.slane %v2112_v19, 1 }
 0x382   :  { %v4813_v44 = vpop.eup %4229  ;;  %v2119_v57 = vmax.f32 %v2117_v7, %v2118_v20 }
 0x383   :  { %v2156_v25 = vrot.slane %v2155_v21, 2  ;;  %v2160_v26 = vsel %vm2072_vm2, %v4813_v44, 0.0  ;;  %v2133_v28 = vsub.f32 %v2068_v27, %v2107_v4  ;;  %v2114_v29 = vmax.f32 %v2112_v19, %v2113_v13  ;;  %v4817_v23 = vpop.eup %4231 }
 0x384   :  { %v2161_v30 = vrot.slane %v2160_v26, 4  ;;  %v2120_v32 = vrot.slane %v2119_v57, 1  ;;  %v2202_v42 = vsel %vm2072_vm2, %v4817_v23, 0.0 }
 0x385   :  { %v2157_v33 = vadd.f32 %v2156_v25, %v2155_v21  ;;  %v2145_v34 = vmul.f32 1.442695, %v2133_v28  ;;  %v2134_v35 = vsub.f32 %v2069_v41, %v2114_v29  ;;  %v2203_v53 = vrot.slane %v2202_v42, 4 }
 0x386   :  { %v4819_v36 = vpop.eup %4233  ;;  %v2162_v37 = vadd.f32 %v2161_v30, %v2160_v26  ;;  %v2121_v38 = vmax.f32 %v2119_v57, %v2120_v32 }
 0x387   :  { %v2158_v39 = vrot.slane %v2157_v33, 1  ;;  %v2167_v43 = vsel %vm2072_vm2, %v4819_v36, 0.0  ;;  %4237 = vpow2.f32 %v2145_v34  ;;  %v2147_v31 = vmul.f32 1.442695, %v2134_v35 }
 0x388   :  { %v2163_v27 = vrot.slane %v2162_v37, 2  ;;  %v2168_v58 = vrot.slane %v2167_v43, 4  ;;  %v2135_v46 = vsub.f32 %v2070_v51, %v2121_v38  ;;  %v2204_v51 = vadd.f32 %v2203_v53, %v2202_v42 }
 0x389   :  { %v2159_v47 = vadd.f32 %v2158_v39, %v2157_v33  ;;  %4239 = vpow2.f32 %v2147_v31 }
 0x38a   :  { %v4825_v48 = vpop.eup %4235  ;;  %v2164_v41 = vadd.f32 %v2163_v27, %v2162_v37  ;;  %v2169_v49 = vadd.f32 %v2168_v58, %v2167_v43  ;;  %v2149_v52 = vmul.f32 1.442695, %v2135_v46  ;;  %v2205_v21 = vrot.slane %v2204_v51, 2 }
 0x38b   :  { %4241 = vrcp.f32 %v2159_v47  ;;  %v2174_v54 = vsel %vm2072_vm2, %v4825_v48, 0.0 }
 0x38c   :  { %v2165_v55 = vrot.slane %v2164_v41, 1  ;;  %v2170_v40 = vrot.slane %v2169_v49, 2  ;;  %v2175_v45 = vrot.slane %v2174_v54, 4  ;;  %4243 = vpow2.f32 %v2149_v52 }
 0x38d   :  { %v2206_v34 = vadd.f32 %v2205_v21, %v2204_v51 }
 0x38e   :  { %v2166_v18 = vadd.f32 %v2165_v55, %v2164_v41  ;;  %v2171_v61 = vadd.f32 %v2170_v40, %v2169_v49  ;;  %v2176_v62 = vadd.f32 %v2175_v45, %v2174_v54 }
 0x38f   :  { %v2207_v58 = vrot.slane %v2206_v34, 1 }
 0x390   :  { %4245 = vrcp.f32 %v2166_v18  ;;  %v2172_v6 = vrot.slane %v2171_v61, 1  ;;  %v2177_v7 = vrot.slane %v2176_v62, 2 }
 0x391   :  { %v4829_v17 = vpop.eup %4237 }
 0x392   :  { %v2173_v22 = vadd.f32 %v2172_v6, %v2171_v61  ;;  %v2178_v19 = vadd.f32 %v2177_v7, %v2176_v62  ;;  %v2181_v20 = vsel %vm2072_vm2, %v4829_v17, 0.0 }
 0x393   :  { %v2182_v4 = vrot.slane %v2181_v20, 4  ;;  %v4240_v13 = vpop.eup %4239 }
 0x394   :  { %4247 = vrcp.f32 %v2173_v22  ;;  %v2179_v57 = vrot.slane %v2178_v19, 1  ;;  %v2188_v28 = vsel %vm2072_vm2, %v4240_v13, 0.0 }
 0x395   :  { %v4242_v25 = vpop.eup %4241  ;;  %v2183_v26 = vadd.f32 %v2182_v4, %v2181_v20  ;;  %v2189_v32 = vrot.slane %v2188_v28, 4 }
 0x396   :  { %v4244_v29 = vpop.eup %4243  ;;  %v2180_v30 = vadd.f32 %v2179_v57, %v2178_v19  ;;  %v2217_v33 = vmul.f32 %v4242_v25, %v4809_v56 }
 0x397   :  { %v2184_v35 = vrot.slane %v2183_v26, 2  ;;  %v2195_v37 = vsel %vm2072_vm2, %v4244_v29, 0.0  ;;  %v2190_v38 = vadd.f32 %v2189_v32, %v2188_v28 }
 0x398   :  { %4249 = vrcp.f32 %v2180_v30  ;;  %v2196_v39 = vrot.slane %v2195_v37, 4  ;;  %3881 = vmatmul.mubr.msk.f32.vlgmr.msra.gmra.mrb[22].mxu1 %vm2072_vm2, %v2217_v33 }
 0x399   :  { %v2185_v42 = vadd.f32 %v2184_v35, %v2183_v26  ;;  %3889 = vmatpush3.msra.mxu1 %v1426_v14  ;;  %3890 = vmatprep.mubr.msk.f32.mxu1 %vm4394_vm0, %v4393_v50  ;;  %v2191_v27 = vrot.slane %v2190_v38, 2  ;;  %v2208_v14 = vadd.f32 %v2207_v58, %v2206_v34 }
 0x39a   :  { %v4246_v43 = vpop.eup %4245  ;;  %v2197_v56 = vadd.f32 %v2196_v39, %v2195_v37  ;;  %3898 = vmatprep.subr.mxu1 %v4393_v50 }
 0x39b   :  { %v2186_v31 = vrot.slane %v2185_v42, 1  ;;  %v2218_v46 = vmul.f32 %v4246_v43, %v4813_v44  ;;  %v2192_v47 = vadd.f32 %v2191_v27, %v2190_v38 }
 0x39c   :  { %v2198_v41 = vrot.slane %v2197_v56, 2 }
 0x39d   :  { %v2187_v49 = vadd.f32 %v2186_v31, %v2185_v42  ;;  %3886 = vmatmul.mubr.msk.f32.vlgmr.msra.gmra.mrb[12].mxu0 %vm2072_vm2, %v2218_v46  ;;  %v2193_v59 = vrot.slane %v2192_v47, 1 }
 0x39e   :  { %v4248_v52 = vpop.eup %4247  ;;  %v2199_v1 = vadd.f32 %v2198_v41, %v2197_v56  ;;  %3894 = vmatpush3.msra.mxu0 %v1494_v9  ;;  %3895 = vmatprep.mubr.msk.f32.mxu0 %vm4394_vm0, %v4393_v50 }
 0x39f   :  { %4251 = vrcp.f32 %v2187_v49  ;;  %v2219_v53 = vmul.f32 %v4248_v52, %v4819_v36  ;;  %3903 = vmatprep.subr.mxu0 %v4393_v50  ;;  %v2194_v44 = vadd.f32 %v2193_v59, %v2192_v47 }
 0x3a0   :  { %v2200_v54 = vrot.slane %v2199_v1, 1 }
 0x3a1   :  { %3891 = vmatmul.mubr.msk.f32.vlgmr.msra.gmra.mrb[24].mxu1 %vm2072_vm2, %v2219_v53  ;;  %4253 = vrcp.f32 %v2194_v44 }
 0x3a2   :  { %v4250_v55 = vpop.eup %4249  ;;  %v2201_v40 = vadd.f32 %v2200_v54, %v2199_v1  ;;  %3899 = vmatpush3.msra.mxu1 %v1427_v15  ;;  %3900 = vmatprep.mubr.msk.f32.mxu1 %vm4394_vm0, %v4393_v50  ;;  %4255 = vrcp.f32 %v2208_v14 }
 0x3a3   :  { %v2220_v3 = vmul.f32 %v4250_v55, %v4825_v48  ;;  %3908 = vmatprep.subr.mxu1 %v4393_v50 }
 0x3a4   :  { %4257 = vrcp.f32 %v2201_v40 }
 0x3a5   :  { %3896 = vmatmul.mubr.msk.f32.vlgmr.msra.gmra.mrb[14].mxu0 %vm2072_vm2, %v2220_v3 }
 0x3a6   :  { %3904 = vmatpush3.msra.mxu0 %v1495_v10  ;;  %3905 = vmatprep.mubr.msk.f32.mxu0 %vm4394_vm0, %v4393_v50 }
 0x3a7   :  { %3913 = vmatprep.subr.mxu0 %v4393_v50 }
 0x3a9   :  { %v4252_v15 = vpop.eup %4251 }
 0x3aa   :  { %v2221_v24 = vmul.f32 %v4252_v15, %v4829_v17 }
 0x3ab   :  { %v4254_v9 = vpop.eup %4253 }
 0x3ac   :  { %3901 = vmatmul.mubr.msk.f32.vlgmr.msra.gmra.mrb[26].mxu1 %vm2072_vm2, %v2221_v24  ;;  %v4256_v36 = vpop.eup %4255  ;;  %v2222_v48 = vmul.f32 %v4254_v9, %v4240_v13 }
 0x3ad   :  { %3909 = vmatpush3.msra.mxu1 %v1428_v16  ;;  %3910 = vmatprep.mubr.msk.f32.mxu1 %vm4394_vm0, %v4393_v50  ;;  %v2224_v2 = vmul.f32 %v4256_v36, %v4817_v23 }
 0x3ae   :  { %v4258_v10 = vpop.eup %4257  ;;  %3906 = vmatmul.mubr.msk.f32.vlgmr.msra.gmra.mrb[16].mxu0 %vm2072_vm2, %v2222_v48 }
 0x3af   :  { %v2223_v45 = vmul.f32 %v4258_v10, %v4244_v29  ;;  %3914 = vmatpush3.msra.mxu0 %v1496_v11  ;;  %3915 = vmatprep.mubr.msk.f32.mxu0 %vm4394_vm0, %v4393_v50 }
 0x3b1   :  { %3911 = vmatmul.mubr.msk.f32.vlgmr.msra.gmra.mrb[28].mxu1 %vm2072_vm2, %v2223_v45 }
 0x3b2   :  { %3306 = vmatprep.mubr.f32.mxu1 %v4393_v50  ;;  %3916 = vmatmul.mubr.msk.f32.vlgmr.msra.gmra.mrb[18].mxu0 %vm2072_vm2, %v2224_v2 }
 0x3b3   :  { %3383 = vmatprep.mubr.f32.mxu0 %v4393_v50 }
 0x46b   :  { %v2294_v5 = vpop.f32.mrb[22].mxu1 }
 0x46c   :  { %v3882_v16 = vpop.f32.mrb[23].mxu1 }
 0x470   :  { %v2367_v18 = vpop.f32.mrb[12].mxu0 }
 0x471   :  { %v3887_v61 = vpop.f32.mrb[13].mxu0 }
 0x474   :  { %v2440_v62 = vpop.f32.mrb[24].mxu1 }
 0x475   :  { %v3892_v0 = vpop.f32.mrb[25].mxu1 }
 0x478   :  { %v2513_v8 = vpop.f32.mrb[14].mxu0 }
 0x479   :  { %v3897_v11 = vpop.f32.mrb[15].mxu0 }
 0x47f   :  { %v2586_v51 = vpop.f32.mrb[26].mxu1 }
 0x480   :  { %v2809_v6 = vcombine.low %v2294_v5, %v2586_v51  ;;  %v2810_v7 = vcombine.high %v2294_v5, %v2586_v51  ;;  %v3902_v17 = vpop.f32.mrb[27].mxu1 }
 0x481   :  { %v2659_v22 = vpop.f32.mrb[16].mxu0 }
 0x482   :  { %v2877_v23 = vcombine.low %v2367_v18, %v2659_v22  ;;  %v2878_v19 = vcombine.high %v2367_v18, %v2659_v22  ;;  %v3907_v20 = vpop.f32.mrb[17].mxu0  ;;  %v2817_v25 = vrot.slane %v2809_v6, %v4558_v63  ;;  %v2824_v26 = vrot.slane %v2810_v7, %v4558_v63 }
 0x484   :  { %v2732_v21 = vpop.f32.mrb[28].mxu1  ;;  %v2885_v42 = vrot.slane %v2877_v23, %v4558_v63  ;;  %v2892_v43 = vrot.slane %v2878_v19, %v4558_v63 }
 0x485   :  { %v2825_v4 = vcombine.low %v2440_v62, %v2732_v21  ;;  %v2826_v13 = vcombine.high %v2440_v62, %v2732_v21  ;;  %v3912_v57 = vpop.f32.mrb[29].mxu1  ;;  %v2805_v28 = vpop.f32.mrb[18].mxu0 }
 0x486   :  { %v2893_v32 = vcombine.low %v2513_v8, %v2805_v28  ;;  %v2894_v33 = vcombine.high %v2513_v8, %v2805_v28  ;;  %v3917_v34 = vpop.f32.mrb[19].mxu0 }
 0x487   :  { %v2833_v29 = vrot.slane %v2825_v4, %v4558_v63  ;;  %v2840_v30 = vrot.slane %v2826_v13, %v4558_v63 }
 0x488   :  { %v2901_v27 = vrot.slane %v2893_v32, %v4558_v63  ;;  %v2908_v56 = vrot.slane %v2894_v33, %v4558_v63 }
 0x489   :  { %v2841_v35 = vcombine.low %v2817_v25, %v2833_v29  ;;  %v2842_v37 = vcombine.high %v2817_v25, %v2833_v29  ;;  %v2857_v38 = vcombine.low %v2824_v26, %v2840_v30  ;;  %v2858_v39 = vcombine.high %v2824_v26, %v2840_v30 }
 0x48a   :  { %v2909_v41 = vcombine.low %v2885_v42, %v2901_v27  ;;  %v2910_v49 = vcombine.high %v2885_v42, %v2901_v27  ;;  %v2925_v52 = vcombine.low %v2892_v43, %v2908_v56  ;;  %v2926_v59 = vcombine.high %v2892_v43, %v2908_v56  ;;  %v4263_v43 = vld [vmem:[#allocation2] sm:$0xff] }
 0x48b   :  { %v2849_v58 = vrot.slane %v2841_v35, %v4565_v12  ;;  %v2856_v31 = vrot.slane %v2842_v37, %v4565_v12  ;;  %v2865_v46 = vrot.slane %v2857_v38, %v4565_v12  ;;  %v2872_v47 = vrot.slane %v2858_v39, %v4565_v12 }
 0x48c   :  { %v2917_v54 = vrot.slane %v2909_v41, %v4565_v12  ;;  %v2924_v55 = vrot.slane %v2910_v49, %v4565_v12  ;;  %v2933_v40 = vrot.slane %v2925_v52, %v4565_v12  ;;  %v2940_v3 = vrot.slane %v2926_v59, %v4565_v12  ;;  %v4264_v41 = vld [vmem:[#allocation2 + $0x8] sm:$0xff]  ;;  %v3157_v52 = vld [vmem:[#allocation7 + $0x8] sm:$0xff] }
 0x48d   :  { %v2945_v1 = vcombine.low %v2849_v58, %v2856_v31  ;;  %v3670_v14 = vcombine.high %v2849_v58, %v2856_v31  ;;  %v2961_v53 = vcombine.low %v2865_v46, %v2872_v47  ;;  %v3671_v44 = vcombine.high %v2865_v46, %v2872_v47  ;;  %v3161_v59 = vld [vmem:[#allocation7 + $0x28] sm:$0xff] }
 0x48e   :  { %v3013_v48 = vcombine.low %v2917_v54, %v2924_v55  ;;  %v3672_v10 = vcombine.high %v2917_v54, %v2924_v55  ;;  %v3029_v45 = vcombine.low %v2933_v40, %v2940_v3  ;;  %v3673_v2 = vcombine.high %v2933_v40, %v2940_v3  ;;  %v3160_v54 = vld [vmem:[#allocation7 + $0x20] sm:$0xff]  ;;  %v3158_v3 = vld [vmem:[#allocation7 + $0x10] sm:$0xff] }
 0x48f   :  { %v2952_v15 = vrot.slane %v2945_v1, %v4558_v63  ;;  %v2960_v24 = vrot.slane %v3670_v14, %v4558_v63  ;;  %v2968_v9 = vrot.slane %v2961_v53, %v4558_v63  ;;  %v2976_v36 = vrot.slane %v3671_v44, %v4558_v63  ;;  %v3159_v1 = vld [vmem:[#allocation7 + $0x18] sm:$0xff]  ;;  %v3156_v44 = vld [vmem:[#allocation7] sm:$0xff] }
 0x490   :  { %v3020_v62 = vrot.slane %v3013_v48, %v4558_v63  ;;  %v3028_v0 = vrot.slane %v3672_v10, %v4558_v63  ;;  %v3036_v8 = vrot.slane %v3029_v45, %v4558_v63  ;;  %v3044_v11 = vrot.slane %v3673_v2, %v4558_v63  ;;  %v3163_v53 = vld [vmem:[#allocation7 + $0x38] sm:$0xff] }
 0x491   :  { %v2978_v5 = vcombine.high %v2952_v15, %v2960_v24  ;;  %v2994_v16 = vcombine.high %v2968_v9, %v2976_v36  ;;  %v2977_v18 = vcombine.low %v2952_v15, %v2960_v24  ;;  %v2993_v61 = vcombine.low %v2968_v9, %v2976_v36  ;;  %v3162_v15 = vld [vmem:[#allocation7 + $0x30] sm:$0xff]  ;;  %v3165_v24 = vld [vmem:[#allocation7 + $0x48] sm:$0xff]  ;;  %v3167_v48 = vld [vmem:[#allocation7 + $0x58] sm:$0xff] }
 0x492   :  { %v3045_v22 = vcombine.low %v3020_v62, %v3028_v0  ;;  %v3061_v23 = vcombine.low %v3036_v8, %v3044_v11  ;;  %v3046_v19 = vcombine.high %v3020_v62, %v3028_v0  ;;  %v3062_v20 = vcombine.high %v3036_v8, %v3044_v11  ;;  %v3169_v36 = vld [vmem:[#allocation7 + $0x68] sm:$0xff]  ;;  %v3171_v10 = vld [vmem:[#allocation7 + $0x78] sm:$0xff]  ;;  %v3170_v62 = vld [vmem:[#allocation7 + $0x70] sm:$0xff] }
 0x493   :  { %v2992_v51 = vrot.slane %v2978_v5, %v4565_v12  ;;  %v3008_v6 = vrot.slane %v2994_v16, %v4565_v12  ;;  %v2985_v7 = vrot.slane %v2977_v18, %v4565_v12  ;;  %v3001_v17 = vrot.slane %v2993_v61, %v4565_v12  ;;  %v3164_v5 = vld [vmem:[#allocation7 + $0x40] sm:$0xff]  ;;  %v3166_v18 = vld [vmem:[#allocation7 + $0x50] sm:$0xff]  ;;  %v3173_v0 = vld [vmem:[#allocation7 + $0x88] sm:$0xff] }
 0x494   :  { %v3053_v25 = vrot.slane %v3045_v22, %v4565_v12  ;;  %v3069_v63 = vrot.slane %v3061_v23, %v4565_v12  ;;  %v3060_v26 = vrot.slane %v3046_v19, %v4565_v12  ;;  %v3076_v28 = vrot.slane %v3062_v20, %v4565_v12  ;;  %v3168_v16 = vld [vmem:[#allocation7 + $0x60] sm:$0xff]  ;;  %v3177_v8 = vld [vmem:[#allocation7 + $0xa8] sm:$0xff]  ;;  %v3174_v19 = vld [vmem:[#allocation7 + $0x90] sm:$0xff] }
 0x495   :  { %v3011_v21 = vcombine.low %v2992_v51, %v3008_v6  ;;  %v3010_v4 = vcombine.high %v2985_v7, %v3001_v17  ;;  %v3009_v13 = vcombine.low %v2985_v7, %v3001_v17  ;;  %v3012_v57 = vcombine.high %v2992_v51, %v3008_v6  ;;  %v3175_v6 = vld [vmem:[#allocation7 + $0x98] sm:$0xff]  ;;  %v3172_v17 = vld [vmem:[#allocation7 + $0x80] sm:$0xff]  ;;  %v3178_v20 = vld [vmem:[#allocation7 + $0xb0] sm:$0xff] }
 0x496   :  { %v3078_v29 = vcombine.high %v3053_v25, %v3069_v63  ;;  %v3077_v30 = vcombine.low %v3053_v25, %v3069_v63  ;;  %v3079_v32 = vcombine.low %v3060_v26, %v3076_v28  ;;  %v3080_v33 = vcombine.high %v3060_v26, %v3076_v28  ;;  %v3179_v7 = vld [vmem:[#allocation7 + $0xb8] sm:$0xff]  ;;  %v3176_v23 = vld [vmem:[#allocation7 + $0xa0] sm:$0xff] }
 0x497   :  { %3091 = vrot.lane.b32.xlu1 %v3011_v21, %s4398_s3  ;;  %3083 = vrot.lane.b32.xlu0 %v3010_v4, %s4391_s28  ;;  %v4078_v14 = vpack.c.bf16 %v3161_v59, %v3157_v52  ;;  %v4110_v55 = vpack.c.bf16 %v3163_v53, %v3159_v1  ;;  %v4080_v40 = vpack.c.bf16 %v3160_v54, %v3156_v44  ;;  %v3195_v52 = vld [vmem:[#allocation7 + $0x138] sm:$0xff]  ;;  %v3188_v59 = vld [vmem:[#allocation7 + $0x100] sm:$0xff]  ;;  %v3190_v44 = vld [vmem:[#allocation7 + $0x110] sm:$0xff] }
 0x498   :  { %v4112_v9 = vpack.c.bf16 %v3162_v15, %v3158_v3  ;;  %v4082_v45 = vpack.c.bf16 %v3169_v36, %v3165_v24  ;;  %v4114_v2 = vpack.c.bf16 %v3171_v10, %v3167_v48  ;;  %v4084_v61 = vpack.c.bf16 %v3168_v16, %v3164_v5  ;;  %v3192_v1 = vld [vmem:[#allocation7 + $0x120] sm:$0xff]  ;;  %v3194_v54 = vld [vmem:[#allocation7 + $0x130] sm:$0xff]  ;;  %v3201_v3 = vld [vmem:[#allocation7 + $0x168] sm:$0xff] }
 0x499   :  { %4079 = vmatprep.subr.bf16.mxu1 %v4078_v14  ;;  %4111 = vmatprep.subr.bf16.mxu0 %v4110_v55  ;;  %v4116_v11 = vpack.c.bf16 %v3170_v62, %v3166_v18  ;;  %v4086_v51 = vpack.c.bf16 %v3177_v8, %v3173_v0  ;;  %v4118_v22 = vpack.c.bf16 %v3179_v7, %v3175_v6  ;;  %v3199_v15 = vld [vmem:[#allocation7 + $0x158] sm:$0xff]  ;;  %v3196_v36 = vld [vmem:[#allocation7 + $0x140] sm:$0xff]  ;;  %v3202_v5 = vld [vmem:[#allocation7 + $0x170] sm:$0xff] }
 0x49a   :  { %4081 = vmatpush1.bf16.msra.mxu1 %v4080_v40  ;;  %4113 = vmatpush1.bf16.msra.mxu0 %v4112_v9  ;;  %v4088_v21 = vpack.c.bf16 %v3176_v23, %v3172_v17  ;;  %v4120_v4 = vpack.c.bf16 %v3178_v20, %v3174_v19  ;;  %v4096_v53 = vpack.c.bf16 %v3192_v1, %v3188_v59  ;;  %v3197_v40 = vld [vmem:[#allocation7 + $0x148] sm:$0xff]  ;;  %v3203_v9 = vld [vmem:[#allocation7 + $0x178] sm:$0xff]  ;;  %v3200_v48 = vld [vmem:[#allocation7 + $0x160] sm:$0xff] }
 0x49b   :  { %3099 = vrot.lane.b32.xlu0 %v3012_v57, %s4397_s2  ;;  %3085 = vrot.lane.b32.xlu1 %v3078_v29, %s4391_s28  ;;  %v4128_v55 = vpack.c.bf16 %v3194_v54, %v3190_v44  ;;  %v4098_v24 = vpack.c.bf16 %v3201_v3, %v3197_v40  ;;  %v4130_v10 = vpack.c.bf16 %v3203_v9, %v3199_v15  ;;  %v3205_v16 = vld [vmem:[#allocation7 + $0x188] sm:$0xff]  ;;  %v3207_v62 = vld [vmem:[#allocation7 + $0x198] sm:$0xff]  ;;  %v3208_v6 = vld [vmem:[#allocation7 + $0x1a0] sm:$0xff] }
 0x49c   :  { %4083 = vmatprep.subr.bf16.mxu1 %v4082_v45  ;;  %4115 = vmatprep.subr.bf16.mxu0 %v4114_v2  ;;  %v4100_v45 = vpack.c.bf16 %v3200_v48, %v3196_v36  ;;  %v3198_v2 = vld [vmem:[#allocation7 + $0x150] sm:$0xff]  ;;  %v3211_v0 = vld [vmem:[#allocation7 + $0x1b8] sm:$0xff]  ;;  %v3213_v23 = vld [vmem:[#allocation7 + $0x1c8] sm:$0xff] }
 0x49d   :  { %v4132_v18 = vpack.c.bf16 %v3202_v5, %v3198_v2  ;;  %v3206_v7 = vld [vmem:[#allocation7 + $0x190] sm:$0xff]  ;;  %v3217_v19 = vld [vmem:[#allocation7 + $0x1e8] sm:$0xff]  ;;  %v3404_v1 = vld [vmem:[#allocation8] sm:$0xff] }
 0x49e   :  { %4085 = vmatpush1.bf16.msra.mxu1 %v4084_v61  ;;  %4117 = vmatpush1.bf16.msra.mxu0 %v4116_v11  ;;  %v3209_v61 = vld [vmem:[#allocation7 + $0x1a8] sm:$0xff]  ;;  %v4134_v11 = vpack.c.bf16 %v3211_v0, %v3207_v62  ;;  %v3422_v54 = vld [vmem:[#allocation8 + $0x90] sm:$0xff]  ;;  %v3423_v40 = vld [vmem:[#allocation8 + $0x98] sm:$0xff] }
 0x49f   :  { %3093 = vrot.lane.b32.xlu0 %v3079_v32, %s4398_s3  ;;  %3101 = vrot.lane.b32.xlu1 %v3080_v33, %s4397_s2  ;;  %v3181_v32 = vld [vmem:[#allocation7 + $0xc8] sm:$0xff]  ;;  %v4102_v8 = vpack.c.bf16 %v3209_v61, %v3205_v16  ;;  %v3454_v3 = vld [vmem:[#allocation8 + $0x190] sm:$0xff]  ;;  %v3455_v15 = vld [vmem:[#allocation8 + $0x198] sm:$0xff]  ;;  %v4146_v5 = vpack.c.bf16 %v3423_v40, %v3422_v54 }
 0x4a0   :  { %4087 = vmatprep.subr.bf16.mxu1 %v4086_v51  ;;  %4119 = vmatprep.subr.bf16.mxu0 %v4118_v22  ;;  %v3185_v33 = vld [vmem:[#allocation7 + $0xe8] sm:$0xff]  ;;  %v3204_v51 = vld [vmem:[#allocation7 + $0x180] sm:$0xff]  ;;  %v3210_v22 = vld [vmem:[#allocation7 + $0x1b0] sm:$0xff]  ;;  %v4178_v16 = vpack.c.bf16 %v3455_v15, %v3454_v3 }
 0x4a1   :  { %v4104_v17 = vpack.c.bf16 %v3208_v6, %v3204_v51  ;;  %v4136_v20 = vpack.c.bf16 %v3210_v22, %v3206_v7  ;;  %v3437_v44 = vld [vmem:[#allocation8 + $0x108] sm:$0xff]  ;;  %v3424_v61 = vld [vmem:[#allocation8 + $0xa0] sm:$0xff]  ;;  %v3415_v54 = vld [vmem:[#allocation8 + $0x58] sm:$0xff] }
 0x4a2   :  { %4089 = vmatpush1.bf16.msra.mxu1 %v4088_v21  ;;  %4121 = vmatpush1.bf16.msra.mxu0 %v4120_v4  ;;  %v4106_v21 = vpack.c.bf16 %v3217_v19, %v3213_v23  ;;  %v3215_v4 = vld [vmem:[#allocation7 + $0x1d8] sm:$0xff]  ;;  %v3425_v62 = vld [vmem:[#allocation8 + $0xa8] sm:$0xff]  ;;  %v3456_v0 = vld [vmem:[#allocation8 + $0x1a0] sm:$0xff] }
 0x4a3   :  { %v3409_v7 = vld [vmem:[#allocation8 + $0x28] sm:$0xff]  ;;  %v4150_v22 = vpack.c.bf16 %v3425_v62, %v3424_v61  ;;  %v3440_v19 = vld [vmem:[#allocation8 + $0x120] sm:$0xff]  ;;  %v3446_v3 = vld [vmem:[#allocation8 + $0x150] sm:$0xff] }
 0x4a4   :  { %v3447_v15 = vld [vmem:[#allocation8 + $0x158] sm:$0xff]  ;;  %v3449_v62 = vld [vmem:[#allocation8 + $0x168] sm:$0xff] }
 0x509   :  { %v3092_v34 = vpop.permute.xlu1 %3091  ;;  %v3084_v35 = vpop.permute.xlu0 %3083 }
 0x50a   :  { %v3106_v12 = vsel %vm3105_vm3, %v3009_v13, %v3084_v35  ;;  %v4090_v35 = vpack.c.bf16 %v3185_v33, %v3181_v32 }
 0x50b   :  { %v3109_v37 = vsel %vm3108_vm4, %v3106_v12, %v3092_v34  ;;  %v3183_v34 = vld [vmem:[#allocation7 + $0xd8] sm:$0xff] }
 0x50c   :  { %v3187_v12 = vld [vmem:[#allocation7 + $0xf8] sm:$0xff]  ;;  %4091 = vmatprep.subr.bf16.mxu1 %v4090_v35  ;;  %v3421_v35 = vld [vmem:[#allocation8 + $0x88] sm:$0xff] }
 0x50d   :  { %v3100_v38 = vpop.permute.xlu0 %3099  ;;  %v3086_v39 = vpop.permute.xlu1 %3085 }
 0x50e   :  { %v3112_v42 = vsel %vm3111_vm5, %v3109_v37, %v3100_v38  ;;  %v3107_v56 = vsel %vm3105_vm3, %v3077_v30, %v3086_v39  ;;  %v3180_v37 = vld [vmem:[#allocation7 + $0xc0] sm:$0xff]  ;;  %v4122_v39 = vpack.c.bf16 %v3187_v12, %v3183_v34 }
 0x50f   :  { %v4923_v27 = vadd.f32 %v4263_v43, %v3112_v42  ;;  %v3184_v38 = vld [vmem:[#allocation7 + $0xe0] sm:$0xff]  ;;  %v3182_v43 = vld [vmem:[#allocation7 + $0xd0] sm:$0xff] }
 0x510   :  { %v4092_v42 = vpack.c.bf16 %v3184_v38, %v3180_v37  ;;  %4123 = vmatprep.subr.bf16.mxu0 %v4122_v39  ;;  %v3420_v34 = vld [vmem:[#allocation8 + $0x80] sm:$0xff]  ;;  %v3453_v38 = vld [vmem:[#allocation8 + $0x188] sm:$0xff] }
 0x511   :  { %3118 = vadd.xlane.f32.xlu0 %v4923_v27  ;;  %v3094_v58 = vpop.permute.xlu0 %3093  ;;  %v3102_v31 = vpop.permute.xlu1 %3101  ;;  %v3452_v12 = vld [vmem:[#allocation8 + $0x180] sm:$0xff]  ;;  %v4142_v37 = vpack.c.bf16 %v3421_v35, %v3420_v34  ;;  %v3443_v34 = vld [vmem:[#allocation8 + $0x138] sm:$0xff] }
 0x512   :  { %v3110_v46 = vsel %vm3108_vm4, %v3107_v56, %v3094_v58  ;;  %v3186_v56 = vld [vmem:[#allocation7 + $0xf0] sm:$0xff]  ;;  %4093 = vmatpush1.bf16.msra.mxu1 %v4092_v42  ;;  %v4174_v39 = vpack.c.bf16 %v3453_v38, %v3452_v12  ;;  %v3428_v35 = vld [vmem:[#allocation8 + $0xc0] sm:$0xff]  ;;  %v3429_v12 = vld [vmem:[#allocation8 + $0xc8] sm:$0xff] }
 0x513   :  { %v3113_v47 = vsel %vm3111_vm5, %v3110_v46, %v3102_v31  ;;  %v4124_v58 = vpack.c.bf16 %v3186_v56, %v3182_v43  ;;  %v3189_v31 = vld [vmem:[#allocation7 + $0x108] sm:$0xff] }
 0x514   :  { %v4926_v49 = vadd.f32 %v4264_v41, %v3113_v47  ;;  %v3193_v46 = vld [vmem:[#allocation7 + $0x128] sm:$0xff]  ;;  %v3191_v47 = vld [vmem:[#allocation7 + $0x118] sm:$0xff] }
 0x515   :  { %4125 = vmatpush1.bf16.msra.mxu0 %v4124_v58  ;;  %v4094_v41 = vpack.c.bf16 %v3193_v46, %v3189_v31  ;;  %v4126_v14 = vpack.c.bf16 %v3195_v52, %v3191_v47  ;;  %v3675_v52 = vld [vmem:[%s4981_s5] ss:$0 sm:$0xff]  ;;  %v3461_v38 = vld [vmem:[#allocation8 + $0x1c8] sm:$0xff] }
 0x516   :  { %3120 = vadd.xlane.f32.xlu1 %v4926_v49 }
 0x517   :  { %4095 = vmatprep.subr.bf16.mxu1 %v4094_v41  ;;  %4127 = vmatprep.subr.bf16.mxu0 %v4126_v14  ;;  %v3674_v41 = vld [vmem:[%s4980_s4] ss:$0 sm:$0xff]  ;;  %v3405_v14 = vld [vmem:[#allocation8 + $0x8] sm:$0xff] }
 0x518   :  { %4097 = vmatpush1.bf16.msra.mxu1 %v4096_v53  ;;  %v3436_v53 = vld [vmem:[#allocation8 + $0x100] sm:$0xff]  ;;  %v4144_v36 = vpack.c.bf16 %v3405_v14, %v3404_v1  ;;  %v3463_v1 = vld [vmem:[#allocation8 + $0x1d8] sm:$0xff] }
 0x519   :  { %4129 = vmatpush1.bf16.msra.mxu0 %v4128_v55  ;;  %4099 = vmatprep.subr.bf16.mxu1 %v4098_v24  ;;  %v4176_v48 = vpack.c.bf16 %v3437_v44, %v3436_v53  ;;  %v3414_v44 = vld [vmem:[#allocation8 + $0x50] sm:$0xff] }
 0x51a   :  { %4131 = vmatprep.subr.bf16.mxu0 %v4130_v10  ;;  %v3406_v10 = vld [vmem:[#allocation8 + $0x10] sm:$0xff] }
 0x51c   :  { %4101 = vmatpush1.bf16.msra.mxu1 %v4100_v45  ;;  %v3407_v45 = vld [vmem:[#allocation8 + $0x18] sm:$0xff] }
 0x51d   :  { %4133 = vmatpush1.bf16.msra.mxu0 %v4132_v18  ;;  %4103 = vmatprep.subr.bf16.mxu1 %v4102_v8  ;;  %v3439_v18 = vld [vmem:[#allocation8 + $0x118] sm:$0xff]  ;;  %v3457_v8 = vld [vmem:[#allocation8 + $0x1a8] sm:$0xff]  ;;  %v4148_v51 = vpack.c.bf16 %v3407_v45, %v3406_v10  ;;  %v4164_v10 = vpack.c.bf16 %v3415_v54, %v3414_v44  ;;  %v4196_v45 = vpack.c.bf16 %v3447_v15, %v3446_v3  ;;  %v3676_v15 = vld [vmem:[%s4985_s9] ss:$0 sm:$0xff]  ;;  %s4353_s9 = scalar_lea.vmem %s3635_s13, 256 }
 0x51e   :  { %4135 = vmatprep.subr.bf16.mxu0 %v4134_v11  ;;  %v4182_v23 = vpack.c.bf16 %v3457_v8, %v3456_v0  ;;  %v3434_v8 = vld [vmem:[#allocation8 + $0xf0] sm:$0xff]  ;;  %p4354_p4 = scmp.ne.s32.totalorder %s3635_s13, %s4353_s9  ;;  %p4359_p6 = scmp.lt.s32.totalorder %s4353_s9, %s4353_s9 }
 0x520   :  { %4105 = vmatpush1.bf16.msra.mxu1 %v4104_v17  ;;  %p4360_p7 = por %p4359_p6, %p4358_p5 }
 0x521   :  { %4137 = vmatpush1.bf16.msra.mxu0 %v4136_v20  ;;  %4107 = vmatprep.subr.bf16.mxu1 %v4106_v21  ;;  %v3441_v20 = vld [vmem:[#allocation8 + $0x128] sm:$0xff]  ;;  %v3426_v21 = vld [vmem:[#allocation8 + $0xb0] sm:$0xff] }
 0x522   :  { %p4361_p8 = pnand %p4360_p7, %p4354_p4 }
 0x59e   :  { %v3119_v13 = vpop.xlane.xlu0 %3118 }
 0x59f   :  { %v3122_v57 = vmul.f32 0.0078125, %v3119_v13  ;;  %v3219_v13 = vld [vmem:[#allocation7 + $0x1f8] sm:$0xff] }
 0x5a1   :  { %v4930_v25 = vsub.f32 %v4923_v27, %v3122_v57  ;;  %v3212_v57 = vld [vmem:[#allocation7 + $0x1c0] sm:$0xff] }
 0x5a3   :  { %v3121_v63 = vpop.xlane.xlu1 %3120  ;;  %v3126_v26 = vmul.f32 %v4930_v25, %v4930_v25 }
 0x5a4   :  { %v3123_v28 = vmul.f32 0.0078125, %v3121_v63  ;;  %v4138_v63 = vpack.c.bf16 %v3219_v13, %v3215_v4  ;;  %v3427_v4 = vld [vmem:[#allocation8 + $0xb8] sm:$0xff]  ;;  %v3458_v13 = vld [vmem:[#allocation8 + $0x1b0] sm:$0xff] }
 0x5a5   :  { %3128 = vadd.xlane.f32.xlu0 %v3126_v26  ;;  %v3216_v26 = vld [vmem:[#allocation7 + $0x1e0] sm:$0xff] }
 0x5a6   :  { %v4935_v29 = vsub.f32 %v4926_v49, %v3123_v28  ;;  %v3214_v28 = vld [vmem:[#allocation7 + $0x1d0] sm:$0xff]  ;;  %v4108_v32 = vpack.c.bf16 %v3216_v26, %v3212_v57  ;;  %4139 = vmatprep.subr.bf16.mxu0 %v4138_v63  ;;  %v3459_v57 = vld [vmem:[#allocation8 + $0x1b8] sm:$0xff]  ;;  %v4184_v63 = vpack.c.bf16 %v3441_v20, %v3440_v19 }
 0x5a7   :  { %v3410_v26 = vld [vmem:[#allocation8 + $0x30] sm:$0xff]  ;;  %v3451_v20 = vld [vmem:[#allocation8 + $0x178] sm:$0xff] }
 0x5a8   :  { %v3127_v30 = vmul.f32 %v4935_v29, %v4935_v29  ;;  %4109 = vmatpush1.bf16.msra.mxu1 %v4108_v32  ;;  %v4186_v32 = vpack.c.bf16 %v3459_v57, %v3458_v13  ;;  %v3450_v19 = vld [vmem:[#allocation8 + $0x170] sm:$0xff]  ;;  %v3232_v13 = vsub.s32 2, %v4555_v60 }
 0x5a9   :  { %4143 = vmatprep.subr.bf16.mxu1 %v4142_v37  ;;  %v3460_v37 = vld [vmem:[#allocation8 + $0x1c0] sm:$0xff]  ;;  %v3220_v57 = vld [vmem:[%s4983_s7] sm:$0xf] }
 0x5aa   :  { %3130 = vadd.xlane.f32.xlu0 %v3127_v30  ;;  %v3218_v30 = vld [vmem:[#allocation7 + $0x1f0] sm:$0xff] }
 0x5ab   :  { %v4140_v33 = vpack.c.bf16 %v3218_v30, %v3214_v28  ;;  %v3411_v28 = vld [vmem:[#allocation8 + $0x38] sm:$0xff]  ;;  %v4154_v30 = vpack.c.bf16 %v3427_v4, %v3426_v21  ;;  %v4204_v21 = vpack.c.bf16 %v3451_v20, %v3450_v19  ;;  %v3224_v4 = vsub.s32 0, %v4555_v60 }
 0x5ad   :  { %4141 = vmatpush1.bf16.msra.mxu0 %v4140_v33  ;;  %v3442_v33 = vld [vmem:[#allocation8 + $0x130] sm:$0xff] }
 0x5ae   :  { %4175 = vmatprep.subr.bf16.mxu0 %v4174_v39  ;;  %v4156_v39 = vpack.c.bf16 %v3411_v28, %v3410_v26  ;;  %v3225_v26 = vrot.slane %v3220_v57, %v3224_v4  ;;  %v3233_v28 = vrot.slane %v3220_v57, %v3232_v13 }
 0x632   :  { %v3129_v42 = vpop.xlane.xlu0 %3128 }
 0x633   :  { %v3132_v43 = vmul.f32 0.0078125, %v3129_v42  ;;  %v4188_v42 = vpack.c.bf16 %v3443_v34, %v3442_v33 }
 0x635   :  { %v3134_v56 = vadd.f32 1e-05, %v3132_v43  ;;  %v3412_v43 = vld [vmem:[#allocation8 + $0x40] sm:$0xff] }
 0x637   :  { %4259 = vrsqrt.f32 %v3134_v56  ;;  %v3131_v58 = vpop.xlane.xlu0 %3130  ;;  %v3413_v56 = vld [vmem:[#allocation8 + $0x48] sm:$0xff] }
 0x638   :  { %v3133_v31 = vmul.f32 0.0078125, %v3131_v58  ;;  %v4158_v58 = vpack.c.bf16 %v3429_v12, %v3428_v35  ;;  %v4160_v14 = vpack.c.bf16 %v3413_v56, %v3412_v43 }
 0x63a   :  { %v3135_v46 = vadd.f32 1e-05, %v3133_v31  ;;  %v4190_v31 = vpack.c.bf16 %v3461_v38, %v3460_v37 }
 0x63c   :  { %4261 = vrsqrt.f32 %v3135_v46  ;;  %v3444_v46 = vld [vmem:[#allocation8 + $0x140] sm:$0xff] }
 0x641   :  { %v4260_v47 = vpop.eup %4259 }
 0x642   :  { %v3138_v59 = vmul.f32 %v4260_v47, %v4930_v25  ;;  %v3438_v25 = vld [vmem:[#allocation8 + $0x110] sm:$0xff]  ;;  %v3445_v47 = vld [vmem:[#allocation8 + $0x148] sm:$0xff] }
 0x643   :  { %v4180_v6 = vpack.c.bf16 %v3439_v18, %v3438_v25  ;;  %v4192_v53 = vpack.c.bf16 %v3445_v47, %v3444_v46  ;;  %v3417_v25 = vld [vmem:[#allocation8 + $0x68] sm:$0xff]  ;;  %v3448_v18 = vld [vmem:[#allocation8 + $0x160] sm:$0xff] }
 0x644   :  { %v3146_v55 = vmul.f32 %v3674_v41, %v3138_v59  ;;  %v3462_v59 = vld [vmem:[#allocation8 + $0x1d0] sm:$0xff]  ;;  %v4200_v0 = vpack.c.bf16 %v3449_v62, %v3448_v18 }
 0x645   :  { %v4194_v40 = vpack.c.bf16 %v3463_v1, %v3462_v59 }
 0x646   :  { %v4262_v24 = vpop.eup %4261  ;;  %v3154_v9 = vadd.f32 %v3675_v52, %v3146_v55 }
 0x647   :  { %v3139_v2 = vmul.f32 %v4262_v24, %v4935_v29  ;;  %v3408_v29 = vld [vmem:[#allocation8 + $0x20] sm:$0xff] }
 0x648   :  { %3307 = vmatmul.mubr.f32.vlgmr.msra.gmra.mrb[30].mxu1 %v3154_v9  ;;  %3384 = vmatmul.mubr.f32.vlgmr.msra.gmra.mrb[20].mxu0 %v3154_v9  ;;  %v3432_v24 = vld [vmem:[#allocation8 + $0xe0] sm:$0xff]  ;;  %v3433_v9 = vld [vmem:[#allocation8 + $0xe8] sm:$0xff] }
 0x649   :  { %3312 = vmatprep.mubr.f32.mxu1 %v4393_v50  ;;  %3389 = vmatprep.mubr.f32.mxu0 %v4393_v50  ;;  %v3147_v11 = vmul.f32 %v3674_v41, %v3139_v2  ;;  %v4152_v50 = vpack.c.bf16 %v3409_v7, %v3408_v29  ;;  %v3430_v41 = vld [vmem:[#allocation8 + $0xd0] sm:$0xff]  ;;  %v4166_v2 = vpack.c.bf16 %v3433_v9, %v3432_v24  ;;  %v3467_v29 = vld [vmem:[#allocation8 + $0x1f8] sm:$0xff] }
 0x64a   :  { %4145 = vmatpush3.bf16.msra.mxu1 %v4144_v36  ;;  %4177 = vmatpush3.bf16.msra.mxu0 %v4176_v48  ;;  %v3464_v36 = vld [vmem:[#allocation8 + $0x1e0] sm:$0xff]  ;;  %v3465_v48 = vld [vmem:[#allocation8 + $0x1e8] sm:$0xff]  ;;  %v3418_v7 = vld [vmem:[#allocation8 + $0x70] sm:$0xff] }
 0x64b   :  { %v3155_v17 = vadd.f32 %v3675_v52, %v3147_v11  ;;  %4147 = vmatprep.subr.bf16.mxu1 %v4146_v5  ;;  %4179 = vmatprep.subr.bf16.mxu0 %v4178_v16  ;;  %v3431_v52 = vld [vmem:[#allocation8 + $0xd8] sm:$0xff]  ;;  %v4198_v5 = vpack.c.bf16 %v3465_v48, %v3464_v36  ;;  %v3416_v16 = vld [vmem:[#allocation8 + $0x60] sm:$0xff] }
 0x64c   :  { %v4162_v55 = vpack.c.bf16 %v3431_v52, %v3430_v41  ;;  %v4168_v61 = vpack.c.bf16 %v3417_v25, %v3416_v16  ;;  %v3435_v11 = vld [vmem:[#allocation8 + $0xf8] sm:$0xff] }
 0x64d   :  { %3313 = vmatmul.mubr.f32.gmra.mrb[32].mxu1 %v3155_v17  ;;  %3390 = vmatmul.mubr.f32.gmra.mrb[22].mxu0 %v3155_v17  ;;  %v3419_v17 = vld [vmem:[#allocation8 + $0x78] sm:$0xff] }
 0x64e   :  { %4149 = vmatpush3.bf16.msra.mxu1 %v4148_v51  ;;  %4181 = vmatpush3.bf16.msra.mxu0 %v4180_v6  ;;  %v3466_v51 = vld [vmem:[#allocation8 + $0x1f0] sm:$0xff]  ;;  %v4170_v6 = vpack.c.bf16 %v3435_v11, %v3434_v8 }
 0x64f   :  { %4151 = vmatprep.subr.bf16.mxu1 %v4150_v22  ;;  %4183 = vmatprep.subr.bf16.mxu0 %v4182_v23  ;;  %v4202_v22 = vpack.c.bf16 %v3467_v29, %v3466_v51  ;;  %v4172_v23 = vpack.c.bf16 %v3419_v17, %v3418_v7 }
 0x652   :  { %4153 = vmatpush3.bf16.msra.mxu1 %v4152_v50  ;;  %4185 = vmatpush3.bf16.msra.mxu0 %v4184_v63  ;;  %v3228_v50 = vsub.s32 1, %v4555_v60  ;;  %v3236_v63 = vsub.s32 3, %v4555_v60 }
 0x653   :  { %4155 = vmatprep.subr.bf16.mxu1 %v4154_v30  ;;  %4187 = vmatprep.subr.bf16.mxu0 %v4186_v32 }
 0x654   :  { %v3229_v30 = vrot.slane %v3220_v57, %v3228_v50  ;;  %v3237_v32 = vrot.slane %v3220_v57, %v3236_v63 }
 0x656   :  { %4157 = vmatpush3.bf16.msra.mxu1 %v4156_v39  ;;  %4189 = vmatpush3.bf16.msra.mxu0 %v4188_v42 }
 0x657   :  { %4159 = vmatprep.subr.bf16.mxu1 %v4158_v58  ;;  %4191 = vmatprep.subr.bf16.mxu0 %v4190_v31 }
 0x65a   :  { %4161 = vmatpush3.bf16.msra.mxu1 %v4160_v14  ;;  %4193 = vmatpush3.bf16.msra.mxu0 %v4192_v53 }
 0x65b   :  { %4163 = vmatprep.subr.bf16.mxu1 %v4162_v55  ;;  %4195 = vmatprep.subr.bf16.mxu0 %v4194_v40 }
 0x65e   :  { %4165 = vmatpush3.bf16.msra.mxu1 %v4164_v10  ;;  %4197 = vmatpush3.bf16.msra.mxu0 %v4196_v45 }
 0x65f   :  { %4167 = vmatprep.subr.bf16.mxu1 %v4166_v2  ;;  %4199 = vmatprep.subr.bf16.mxu0 %v4198_v5 }
 0x662   :  { %4169 = vmatpush3.bf16.msra.mxu1 %v4168_v61  ;;  %4201 = vmatpush3.bf16.msra.mxu0 %v4200_v0 }
 0x663   :  { %4171 = vmatprep.subr.bf16.mxu1 %v4170_v6  ;;  %4203 = vmatprep.subr.bf16.mxu0 %v4202_v22 }
 0x666   :  { %4173 = vmatpush3.bf16.msra.mxu1 %v4172_v23  ;;  %4205 = vmatpush3.bf16.msra.mxu0 %v4204_v21 }
 0x71b   :  { %v3308_v33 = vpop.f32.mrb[30].mxu1  ;;  %v3385_v34 = vpop.f32.mrb[20].mxu0 }
 0x71c   :  { %v3309_v35 = vadd.f32 %v3308_v33, %v3225_v26  ;;  %v3386_v12 = vadd.f32 %v3385_v34, %v3233_v28  ;;  %v3310_v37 = vpop.f32.mrb[31].mxu1  ;;  %v3387_v38 = vpop.f32.mrb[21].mxu0 }
 0x71d   :  { %v3311_v39 = vadd.f32 %v3310_v37, %v3229_v30  ;;  %v3388_v42 = vadd.f32 %v3387_v38, %v3237_v32 }
 0x71e   :  { %v3396_v58 = vmax.f32 %v3309_v35, 0.0  ;;  %v3398_v31 = vmax.f32 %v3386_v12, 0.0 }
 0x71f   :  { %v3397_v43 = vmax.f32 %v3311_v39, 0.0  ;;  %v3399_v56 = vmax.f32 %v3388_v42, 0.0 }
 0x720   :  { %v3314_v46 = vpop.f32.mrb[32].mxu1  ;;  %v3391_v47 = vpop.f32.mrb[22].mxu0 }
 0x721   :  { %v3315_v41 = vadd.f32 %v3314_v46, %v3225_v26  ;;  %v3392_v60 = vadd.f32 %v3391_v47, %v3233_v28  ;;  %v3316_v52 = vpop.f32.mrb[33].mxu1  ;;  %v3393_v59 = vpop.f32.mrb[23].mxu0  ;;  %3539 = vmatprep.mubr.f32.mxu1 %v3397_v43  ;;  %3614 = vmatprep.mubr.f32.mxu0 %v3399_v56 }
 0x722   :  { %v3317_v1 = vadd.f32 %v3316_v52, %v3229_v30  ;;  %v3394_v14 = vadd.f32 %v3393_v59, %v3237_v32  ;;  %3540 = vmatmul.mubr.f32.vlgmr.msra.gmra.mrb[34].mxu1 %v3396_v58  ;;  %3615 = vmatmul.mubr.f32.vlgmr.msra.gmra.mrb[24].mxu0 %v3398_v31 }
 0x723   :  { %v3400_v54 = vmax.f32 %v3315_v41, 0.0  ;;  %v3402_v55 = vmax.f32 %v3392_v60, 0.0 }
 0x724   :  { %v3401_v53 = vmax.f32 %v3317_v1, 0.0  ;;  %v3403_v44 = vmax.f32 %v3394_v14, 0.0 }
 0x726   :  { %3544 = vmatprep.mubr.f32.mxu1 %v3401_v53  ;;  %3619 = vmatprep.mubr.f32.mxu0 %v3403_v44 }
 0x727   :  { %3545 = vmatmul.mubr.f32.gmra.mrb[36].mxu1 %v3400_v54  ;;  %3620 = vmatmul.mubr.f32.gmra.mrb[26].mxu0 %v3402_v55 }
 0x7f5   :  { %v3759_v40 = vpop.f32.mrb[34].mxu1  ;;  %v3797_v3 = vpop.f32.mrb[24].mxu0 }
 0x7f6   :  { %v3760_v24 = vpop.f32.mrb[35].mxu1  ;;  %v3798_v9 = vpop.f32.mrb[25].mxu0 }
 0x7f7   :  { %v3761_v36 = vadd.f32 %v3760_v24, %v3759_v40  ;;  %v3799_v48 = vadd.f32 %v3798_v9, %v3797_v3 }
 0x7f9   :  { %v3542_v10 = vadd.f32 %v3761_v36, %v3676_v15 }
 0x7fa   :  { %v3762_v45 = vpop.f32.mrb[36].mxu1  ;;  %v3800_v2 = vpop.f32.mrb[26].mxu0 }
 0x7fb   :  { %v3617_v5 = vadd.f32 %v3799_v48, %v3542_v10  ;;  %v3763_v16 = vpop.f32.mrb[37].mxu1  ;;  %v3801_v25 = vpop.f32.mrb[27].mxu0 }
 0x7fc   :  { %v3764_v18 = vadd.f32 %v3763_v16, %v3762_v45  ;;  %v3802_v61 = vadd.f32 %v3801_v25, %v3800_v2 }
 0x7fd   :  { %v3625_v62 = vadd.f32 %v3617_v5, %v4923_v27 }
 0x7fe   :  { %v3547_v0 = vadd.f32 %v3764_v18, %v3676_v15 }
 0x7ff   :  { %3627 = vst [vmem:[#allocation10] sm:$0xff] %v3625_v62 }
 0x800   :  { %v3622_v8 = vadd.f32 %v3802_v61, %v3547_v0 }
 0x802   :  { %v3626_v11 = vadd.f32 %v3622_v8, %v4926_v49 }
 0x804   :  { %3628 = vst [vmem:[#allocation10 + $0x8] sm:$0xff] %v3626_v11 }
 0x805   :  { %4364 = shalt.err (!%p4361_p8)
}
 0x806   :  { %s4365_s17 = scalar_lea.hbm %s4986_s10, 256 }
 0x807   :  { %p4366_p9 = scmp.ne.s32.totalorder %s4986_s10, %s4365_s17  ;;  %p4369_p10 = scmp.lt.u32.totalorder %s4365_s17, %s4986_s10 }
 0x809   :  { %p4371_p11 = pnand %p4369_p10, %p4366_p9 }
 0x80b   :  { %4374 = shalt.err (!%p4371_p11)
}
 0x80c   :  { %3640 = dma.vmem_to_hbm [thread:$0]  %s3635_s13, 256, %s4986_s10, [#allocation4], %s4387_s1, %s4387_s1, %s4388_s14  }
 0x80d   :  { %4381 = dma.done.wait [#allocation4], 256  }
 0x80e   :  { %4382 = vsyncadd [#allocation4], 4294967040 }
 0x80f   :  { %3644 = vsyncpa [#allocation3], 1 }
 0x810   :  { %3645 = vsyncpa [#allocation6], 1 }
 0x811   :  { %3646 = vsyncpa [#allocation9], 1 }
 0x812   :  { %3647 = vsyncpa [#allocation4], 1 }

</bundles_post_ra>
